<compile_context>
chip_gen: v5e
topology: v5e:2x2
jax: 0.10.0
libtpu: 0.0.40
codegen_flags: <defaults>
</compile_context>

<pallas_src>
import functools

import jax
import jax.numpy as jnp
from jax import lax
from jax.experimental import pallas as pl
from jax.experimental.pallas import tpu as pltpu

BN_EPS = 1e-5
NEG_INF = -1e30   # additive mask; exp() underflows to exactly 0.0


# --------------------------------------------------------- integer helpers ---
def _idiv(x, d):
  """x // d for non-negative int32 x, static positive int d (pow2 -> shift)."""
  if d == 1:
    return x
  if d & (d - 1) == 0:
    return jnp.right_shift(x, d.bit_length() - 1)
  # TODO(synk): non-power-of-two divisor path (not exercised by this module's
  # configuration) relies on Mosaic int-division lowering.
  return x // d


def _imod(x, d):
  if d == 1:
    return jnp.zeros_like(x)
  if d & (d - 1) == 0:
    return jnp.bitwise_and(x, d - 1)
  return x % d


# ------------------------------------------------------------------ kernel ---
def _encoder_cluster_kernel(x_ref, cv_ref, wphi_ref, bphi_ref, wth_ref,
                            bth_ref, wg_ref, bg_ref, wmsk_ref, bmsk_ref,
                            o_ref, *, W, P_h, P_w, Q_w):
  """Both NonLocalBlock passes of EncoderCluster + residual, one image.

  x block: (1, C, HW), channel-major, tokens in row order h*W + w.  The
  patch<->grid regrouping between the two NLB applications is expressed as
  masked full attention over all HW tokens (additive 0 / -1e30 group bias),
  which is exactly equivalent to the per-group attention of the PyTorch
  module because the NLB is per-position except for the attention.
  """
  x = x_ref[0].astype(jnp.float32)                      # (C, HW)
  HW = x.shape[1]

  # --- group masks generated in-kernel (no (HW,HW) DMA) ---------------------
  tn = lax.broadcasted_iota(jnp.int32, (HW, 1), 0)      # token id, column form
  tm = lax.broadcasted_iota(jnp.int32, (1, HW), 1)      # token id, row form

  def group_mask(gid_fn):
    def gid(t):
      h, w = _idiv(t, W), _imod(t, W)
      return gid_fn(h, w)
    eq = gid(tn) == gid(tm)                             # (HW, HW) bool
    return jnp.where(eq, 0.0, NEG_INF).astype(jnp.float32)

  # phase 1: tokens grouped by the (P_h x P_w) patch they belong to
  m1 = group_mask(lambda h, w: _idiv(h, P_h) * Q_w + _idiv(w, P_w))
  # phase 2: tokens grouped by their in-patch offset (grid regrouping)
  m2 = group_mask(lambda h, w: _imod(h, P_h) * P_w + _imod(w, P_w))

  wphi, bphi = wphi_ref[...], bphi_ref[...]             # (IC, C), (IC, 1)
  wth, bth = wth_ref[...], bth_ref[...]
  wg, bg = wg_ref[...], bg_ref[...]
  wmsk, bmsk = wmsk_ref[...], bmsk_ref[...]             # (C, IC), (C, 1)

  def nlb(xin, neg_bias):
    # 1x1 convs + folded eval-mode BN + ReLU (channel-major)
    phi = jnp.maximum(
        jnp.dot(wphi, xin, preferred_element_type=jnp.float32) + bphi, 0.0)
    th = jnp.maximum(
        jnp.dot(wth, xin, preferred_element_type=jnp.float32) + bth, 0.0)
    g = jnp.maximum(
        jnp.dot(wg, xin, preferred_element_type=jnp.float32) + bg, 0.0)
    # scores s[n, m] = <theta[:, n], phi[:, m]>
    s = lax.dot_general(th, phi, (((0,), (0,)), ((), ())),
                        preferred_element_type=jnp.float32)        # (HW, HW)
    s = s + neg_bias                     # restrict attention to the group
    # torch nn.Softmax(dim=1): normalise over the theta index n -> axis 0
    s = s - jnp.max(s, axis=0, keepdims=True)
    e = jnp.exp(s)                       # out-of-group entries become 0.0
    a = e * pl.reciprocal(jnp.sum(e, axis=0, keepdims=True), approx=False)
    # y[:, n] = sum_m a[n, m] * g[:, m]
    y = lax.dot_general(g, a, (((1,), (1,)), ((), ())),
                        preferred_element_type=jnp.float32)        # (IC, HW)
    m = jnp.maximum(
        jnp.dot(wmsk, y, preferred_element_type=jnp.float32) + bmsk, 0.0)
    return m + xin

  out = nlb(nlb(x, m1), m2)
  # fused residual add with the parallel conv branch
  o_ref[0] = (out + cv_ref[0].astype(jnp.float32)).astype(o_ref.dtype)


# ------------------------------------------------------------- host helpers ---
def _fold_params(p):
  """Fold eval-mode BatchNorm into the 1x1-conv weights (torch (out,in))."""
  def fold(w, bn):
    gamma, beta, mean, var = bn
    s = gamma / jnp.sqrt(var + BN_EPS)                  # (out,)
    return w * s[:, None], (beta - mean * s)[:, None]   # (out,in), (out,1)

  wphi, bphi = fold(p["w_phi"], p["bn_phi"])
  wth, bth = fold(p["w_theta"], p["bn_theta"])
  wg, bg = fold(p["w_g"], p["bn_g"])
  wmsk, bmsk = fold(p["w_mask"], p["bn_mask"])
  return wphi, bphi, wth, bth, wg, bg, wmsk, bmsk


def encoder_cluster_pallas(x, cv, P_h, P_w, p):
  """Fused EncoderCluster (+ residual conv branch) for one scale.

  x, cv: (N, C, H, W).  Only free trailing-dim reshapes on the host.
  """
  N, C, H, W = x.shape
  HW = H * W
  x2 = x.reshape(N, C, HW)
  cv2 = cv.reshape(N, C, HW)
  weights = _fold_params(p)

  kernel = functools.partial(_encoder_cluster_kernel,
                             W=W, P_h=P_h, P_w=P_w, Q_w=W // P_w)

  img_spec = pl.BlockSpec((1, C, HW), lambda b: (b, 0, 0))

  def const_spec(a):
    return pl.BlockSpec(a.shape, lambda b: (0, 0))

  y2 = pl.pallas_call(
      kernel,
      out_shape=jax.ShapeDtypeStruct((N, C, HW), x.dtype),
      grid=(N,),
      in_specs=[img_spec, img_spec] + [const_spec(a) for a in weights],
      out_specs=img_spec,
      compiler_params=pltpu.CompilerParams(
          dimension_semantics=("parallel",)),   # v7x: one image per TensorCore
  )(x2, cv2, *weights)

  return y2.reshape(N, C, H, W)


@functools.partial(jax.jit, static_argnums=(2, 3))
def _ecm_scale_pallas(x, cv, P_h, P_w, p):
  return encoder_cluster_pallas(x, cv, P_h, P_w, p)


def ecm_forward_pallas(outs, convs, params, patch_sizes):
  return [_ecm_scale_pallas(x, cv, ph, pw, p)
          for x, cv, p, (ph, pw) in zip(outs, convs, params, patch_sizes)]


# ------------------------------------------------------ pure-JAX reference ---
def _nonlocal_block_ref(x, p):
  """Faithful NonLocalBlock (eval-mode BN) on NCHW input."""
  B, C, h, w = x.shape
  ic = C // 2

  def cbr(z, wght, bn):
    y = jnp.einsum("oc,bchw->bohw", wght, z)
    gamma, beta, mean, var = bn
    y = ((y - mean[None, :, None, None])
         / jnp.sqrt(var[None, :, None, None] + BN_EPS)
         * gamma[None, :, None, None] + beta[None, :, None, None])
    return jnp.maximum(y, 0.0)

  phi = cbr(x, p["w_phi"], p["bn_phi"]).reshape(B, ic, h * w)
  theta = cbr(x, p["w_theta"], p["bn_theta"]).reshape(B, ic, h * w)
  theta = theta.transpose(0, 2, 1)
  g = cbr(x, p["w_g"], p["bn_g"]).reshape(B, ic, h * w).transpose(0, 2, 1)
  attn = jnp.einsum("bnc,bcm->bnm", theta, phi)
  attn = jax.nn.softmax(attn, axis=1)                 # torch nn.Softmax(dim=1)
  y = jnp.einsum("bnm,bmc->bnc", attn, g)
  y = y.transpose(0, 2, 1).reshape(B, ic, h, w)
  mask = cbr(y, p["w_mask"], p["bn_mask"])
  return mask + x


def encoder_cluster_ref(x, P_h, P_w, p):
  """Mirrors the PyTorch EncoderCluster reshape/permute chain exactly."""
  N, C, H, W = x.shape
  Q_h, Q_w = H // P_h, W // P_w
  x = x.reshape(N, C, Q_h, P_h, Q_w, P_w).transpose(0, 2, 4, 1, 3, 5)
  x = x.reshape(N * Q_h * Q_w, C, P_h, P_w)
  x = _nonlocal_block_ref(x, p)
  x = x.reshape(N, Q_h, Q_w, C, P_h, P_w).transpose(0, 4, 5, 3, 1, 2)
  x = x.reshape(N * P_h * P_w, C, Q_h, Q_w)
  x = _nonlocal_block_ref(x, p)
  x = x.reshape(N, P_h, P_w, C, Q_h, Q_w)
  return x.transpose(0, 3, 4, 1, 5, 2).reshape(N, C, H, W)


def ecm_forward_ref(outs, convs, params, patch_sizes):
  return [encoder_cluster_ref(x, ph, pw, p) + cv
          for x, cv, p, (ph, pw) in zip(outs, convs, params, patch_sizes)]


# ------------------------------------------------------------------ params ---
def make_nlb_params(key, channel):
  ic = channel // 2
  ks = jax.random.split(key, 4)

  def kaiming(k, fan_in, shape):
    std = (2.0 / fan_in) ** 0.5                # kaiming_normal, fan_in, relu
    return std * jax.random.normal(k, shape, dtype=jnp.float32)

  # TODO(synk): BatchNorm2d is implemented in eval mode (running stats
  # gamma=1, beta=0, mean=0, var=1); train-mode batch statistics are not used.
  def bn(n):
    return (jnp.ones((n,), jnp.float32), jnp.zeros((n,), jnp.float32),
            jnp.zeros((n,), jnp.float32), jnp.ones((n,), jnp.float32))

  return dict(
      w_phi=kaiming(ks[0], channel, (ic, channel)),     # torch (out, in)
      w_theta=kaiming(ks[1], channel, (ic, channel)),
      w_g=kaiming(ks[2], channel, (ic, channel)),
      w_mask=kaiming(ks[3], ic, (channel, ic)),
      bn_phi=bn(ic), bn_theta=bn(ic), bn_g=bn(ic), bn_mask=bn(channel))


# -------------------------------------------------------------------- main ---
if __name__ == "__main__":
  key = jax.random.PRNGKey(0)
  N = 2
  channels = [8, 8, 16, 16, 32]                        # list_cvt[1]
  patch_sizes = [(8, 8), (8, 8), (4, 4), (2, 2), (1, 1)]
  spatial = [(16, 16), (8, 8), (8, 8), (4, 4), (4, 4)]

  keys = jax.random.split(key, 15)
  params = [make_nlb_params(keys[i], channels[i]) for i in range(5)]
  outs, convs = [], []
  for i in range(5):
    c = channels[i]
    h, w = spatial[i]
    outs.append(jax.random.normal(keys[5 + i], (N, c, h, w), jnp.float32))
    convs.append(jax.random.normal(keys[10 + i], (N, c, h, w), jnp.float32))

  ecm_out = ecm_forward_pallas(outs, convs, params, patch_sizes)
  ecm_out = jax.block_until_ready(ecm_out)

  ecm_ref = ecm_forward_ref(outs, convs, params, patch_sizes)
  for a, b in zip(ecm_out, ecm_ref):
    err = float(jnp.max(jnp.abs(a - b)))
    assert jnp.allclose(a, b, rtol=1e-4, atol=1e-4), f"max abs err {err}"

  print("KERNEL_OK")
</pallas_src>

<mosaic_0001>
module attributes {stable_mosaic.version = 11 : i64} {
  func.func @_encoder_cluster_kernel(%arg0: i32, %arg1: memref<1x8x256xf32, #tpu.memory_space<vmem>>, %arg2: memref<1x8x256xf32, #tpu.memory_space<vmem>>, %arg3: memref<4x8xf32, #tpu.memory_space<vmem>>, %arg4: memref<4x1xf32, #tpu.memory_space<vmem>>, %arg5: memref<4x8xf32, #tpu.memory_space<vmem>>, %arg6: memref<4x1xf32, #tpu.memory_space<vmem>>, %arg7: memref<4x8xf32, #tpu.memory_space<vmem>>, %arg8: memref<4x1xf32, #tpu.memory_space<vmem>>, %arg9: memref<8x4xf32, #tpu.memory_space<vmem>>, %arg10: memref<8x1xf32, #tpu.memory_space<vmem>>, %arg11: memref<1x8x256xf32, #tpu.memory_space<vmem>>) attributes {dimension_semantics = [#tpu.dimension_semantics<parallel>], iteration_bounds = array<i64: 2>, scalar_prefetch = 0 : i64, scratch_operands = 0 : i64, tpu.core_type = #tpu.core_type<tc>, window_params = [{transform_indices = @transform_0, window_bounds = array<i64: 1, 8, 256>}, {transform_indices = @transform_1, window_bounds = array<i64: 1, 8, 256>}, {pipeline_mode = #tpu.pipeline_mode<synchronous>, transform_indices = @transform_2, window_bounds = array<i64: 4, 8>}, {pipeline_mode = #tpu.pipeline_mode<synchronous>, transform_indices = @transform_3, window_bounds = array<i64: 4, 1>}, {pipeline_mode = #tpu.pipeline_mode<synchronous>, transform_indices = @transform_4, window_bounds = array<i64: 4, 8>}, {pipeline_mode = #tpu.pipeline_mode<synchronous>, transform_indices = @transform_5, window_bounds = array<i64: 4, 1>}, {pipeline_mode = #tpu.pipeline_mode<synchronous>, transform_indices = @transform_6, window_bounds = array<i64: 4, 8>}, {pipeline_mode = #tpu.pipeline_mode<synchronous>, transform_indices = @transform_7, window_bounds = array<i64: 4, 1>}, {pipeline_mode = #tpu.pipeline_mode<synchronous>, transform_indices = @transform_8, window_bounds = array<i64: 8, 4>}, {pipeline_mode = #tpu.pipeline_mode<synchronous>, transform_indices = @transform_9, window_bounds = array<i64: 8, 1>}, {transform_indices = @transform_10, window_bounds = array<i64: 1, 8, 256>}]} {
    %c0 = arith.constant 0 : index
    %c0_0 = arith.constant 0 : index
    %c0_1 = arith.constant 0 : index
    %0 = vector.load %arg1[%c0, %c0_0, %c0_1] : memref<1x8x256xf32, #tpu.memory_space<vmem>>, vector<1x8x256xf32>
    %1 = vector.shape_cast %0 : vector<1x8x256xf32> to vector<8x256xf32>
    %2 = tpu.iota {dimensions = array<i32: 0>} : vector<256x1xi32>
    %3 = tpu.iota {dimensions = array<i32: 1>} : vector<1x256xi32>
    %c4_i32 = arith.constant 4 : i32
    %4 = vector.broadcast %c4_i32 : i32 to vector<256x1xi32>
    %5 = arith.shrsi %2, %4 : vector<256x1xi32>
    %c15_i32 = arith.constant 15 : i32
    %6 = vector.broadcast %c15_i32 : i32 to vector<256x1xi32>
    %7 = arith.andi %2, %6 : vector<256x1xi32>
    %c3_i32 = arith.constant 3 : i32
    %8 = vector.broadcast %c3_i32 : i32 to vector<256x1xi32>
    %9 = arith.shrsi %5, %8 : vector<256x1xi32>
    %c2_i32 = arith.constant 2 : i32
    %10 = vector.broadcast %c2_i32 : i32 to vector<256x1xi32>
    %11 = arith.muli %9, %10 : vector<256x1xi32>
    %c3_i32_2 = arith.constant 3 : i32
    %12 = vector.broadcast %c3_i32_2 : i32 to vector<256x1xi32>
    %13 = arith.shrsi %7, %12 : vector<256x1xi32>
    %14 = arith.addi %11, %13 : vector<256x1xi32>
    %c4_i32_3 = arith.constant 4 : i32
    %15 = vector.broadcast %c4_i32_3 : i32 to vector<1x256xi32>
    %16 = arith.shrsi %3, %15 : vector<1x256xi32>
    %c15_i32_4 = arith.constant 15 : i32
    %17 = vector.broadcast %c15_i32_4 : i32 to vector<1x256xi32>
    %18 = arith.andi %3, %17 : vector<1x256xi32>
    %c3_i32_5 = arith.constant 3 : i32
    %19 = vector.broadcast %c3_i32_5 : i32 to vector<1x256xi32>
    %20 = arith.shrsi %16, %19 : vector<1x256xi32>
    %c2_i32_6 = arith.constant 2 : i32
    %21 = vector.broadcast %c2_i32_6 : i32 to vector<1x256xi32>
    %22 = arith.muli %20, %21 : vector<1x256xi32>
    %c3_i32_7 = arith.constant 3 : i32
    %23 = vector.broadcast %c3_i32_7 : i32 to vector<1x256xi32>
    %24 = arith.shrsi %18, %23 : vector<1x256xi32>
    %25 = arith.addi %22, %24 : vector<1x256xi32>
    %26 = vector.broadcast %14 : vector<256x1xi32> to vector<256x256xi32>
    %27 = vector.broadcast %25 : vector<1x256xi32> to vector<256x256xi32>
    %28 = arith.cmpi eq, %26, %27 : vector<256x256xi32>
    %cst = arith.constant 0.000000e+00 : f32
    %cst_8 = arith.constant -1.000000e+30 : f32
    %29 = vector.broadcast %cst : f32 to vector<256x256xf32>
    %30 = vector.broadcast %cst_8 : f32 to vector<256x256xf32>
    %31 = arith.select %28, %29, %30 : vector<256x256xi1>, vector<256x256xf32>
    %c4_i32_9 = arith.constant 4 : i32
    %32 = vector.broadcast %c4_i32_9 : i32 to vector<256x1xi32>
    %33 = arith.shrsi %2, %32 : vector<256x1xi32>
    %c15_i32_10 = arith.constant 15 : i32
    %34 = vector.broadcast %c15_i32_10 : i32 to vector<256x1xi32>
    %35 = arith.andi %2, %34 : vector<256x1xi32>
    %c7_i32 = arith.constant 7 : i32
    %36 = vector.broadcast %c7_i32 : i32 to vector<256x1xi32>
    %37 = arith.andi %33, %36 : vector<256x1xi32>
    %c8_i32 = arith.constant 8 : i32
    %38 = vector.broadcast %c8_i32 : i32 to vector<256x1xi32>
    %39 = arith.muli %37, %38 : vector<256x1xi32>
    %c7_i32_11 = arith.constant 7 : i32
    %40 = vector.broadcast %c7_i32_11 : i32 to vector<256x1xi32>
    %41 = arith.andi %35, %40 : vector<256x1xi32>
    %42 = arith.addi %39, %41 : vector<256x1xi32>
    %c4_i32_12 = arith.constant 4 : i32
    %43 = vector.broadcast %c4_i32_12 : i32 to vector<1x256xi32>
    %44 = arith.shrsi %3, %43 : vector<1x256xi32>
    %c15_i32_13 = arith.constant 15 : i32
    %45 = vector.broadcast %c15_i32_13 : i32 to vector<1x256xi32>
    %46 = arith.andi %3, %45 : vector<1x256xi32>
    %c7_i32_14 = arith.constant 7 : i32
    %47 = vector.broadcast %c7_i32_14 : i32 to vector<1x256xi32>
    %48 = arith.andi %44, %47 : vector<1x256xi32>
    %c8_i32_15 = arith.constant 8 : i32
    %49 = vector.broadcast %c8_i32_15 : i32 to vector<1x256xi32>
    %50 = arith.muli %48, %49 : vector<1x256xi32>
    %c7_i32_16 = arith.constant 7 : i32
    %51 = vector.broadcast %c7_i32_16 : i32 to vector<1x256xi32>
    %52 = arith.andi %46, %51 : vector<1x256xi32>
    %53 = arith.addi %50, %52 : vector<1x256xi32>
    %54 = vector.broadcast %42 : vector<256x1xi32> to vector<256x256xi32>
    %55 = vector.broadcast %53 : vector<1x256xi32> to vector<256x256xi32>
    %56 = arith.cmpi eq, %54, %55 : vector<256x256xi32>
    %cst_17 = arith.constant 0.000000e+00 : f32
    %cst_18 = arith.constant -1.000000e+30 : f32
    %57 = vector.broadcast %cst_17 : f32 to vector<256x256xf32>
    %58 = vector.broadcast %cst_18 : f32 to vector<256x256xf32>
    %59 = arith.select %56, %57, %58 : vector<256x256xi1>, vector<256x256xf32>
    %c0_19 = arith.constant 0 : index
    %c0_20 = arith.constant 0 : index
    %60 = vector.load %arg3[%c0_19, %c0_20] : memref<4x8xf32, #tpu.memory_space<vmem>>, vector<4x8xf32>
    %c0_21 = arith.constant 0 : index
    %c0_22 = arith.constant 0 : index
    %61 = vector.load %arg4[%c0_21, %c0_22] : memref<4x1xf32, #tpu.memory_space<vmem>>, vector<4x1xf32>
    %c0_23 = arith.constant 0 : index
    %c0_24 = arith.constant 0 : index
    %62 = vector.load %arg5[%c0_23, %c0_24] : memref<4x8xf32, #tpu.memory_space<vmem>>, vector<4x8xf32>
    %c0_25 = arith.constant 0 : index
    %c0_26 = arith.constant 0 : index
    %63 = vector.load %arg6[%c0_25, %c0_26] : memref<4x1xf32, #tpu.memory_space<vmem>>, vector<4x1xf32>
    %c0_27 = arith.constant 0 : index
    %c0_28 = arith.constant 0 : index
    %64 = vector.load %arg7[%c0_27, %c0_28] : memref<4x8xf32, #tpu.memory_space<vmem>>, vector<4x8xf32>
    %c0_29 = arith.constant 0 : index
    %c0_30 = arith.constant 0 : index
    %65 = vector.load %arg8[%c0_29, %c0_30] : memref<4x1xf32, #tpu.memory_space<vmem>>, vector<4x1xf32>
    %c0_31 = arith.constant 0 : index
    %c0_32 = arith.constant 0 : index
    %66 = vector.load %arg9[%c0_31, %c0_32] : memref<8x4xf32, #tpu.memory_space<vmem>>, vector<8x4xf32>
    %c0_33 = arith.constant 0 : index
    %c0_34 = arith.constant 0 : index
    %67 = vector.load %arg10[%c0_33, %c0_34] : memref<8x1xf32, #tpu.memory_space<vmem>>, vector<8x1xf32>
    %cst_35 = arith.constant dense<0.000000e+00> : vector<4x256xf32>
    %68 = tpu.matmul %60, %1, %cst_35 {dimension_numbers = #tpu.dot_dimension_numbers<[1], [0], [0], [1], [0, 0, 1, 1], [], []>} : vector<4x8xf32>, vector<8x256xf32>, vector<4x256xf32> -> vector<4x256xf32>
    %69 = vector.broadcast %61 : vector<4x1xf32> to vector<4x256xf32>
    %70 = arith.addf %68, %69 : vector<4x256xf32>
    %cst_36 = arith.constant 0.000000e+00 : f32
    %71 = vector.broadcast %cst_36 : f32 to vector<4x256xf32>
    %72 = arith.maximumf %70, %71 : vector<4x256xf32>
    %cst_37 = arith.constant dense<0.000000e+00> : vector<4x256xf32>
    %73 = tpu.matmul %62, %1, %cst_37 {dimension_numbers = #tpu.dot_dimension_numbers<[1], [0], [0], [1], [0, 0, 1, 1], [], []>} : vector<4x8xf32>, vector<8x256xf32>, vector<4x256xf32> -> vector<4x256xf32>
    %74 = vector.broadcast %63 : vector<4x1xf32> to vector<4x256xf32>
    %75 = arith.addf %73, %74 : vector<4x256xf32>
    %cst_38 = arith.constant 0.000000e+00 : f32
    %76 = vector.broadcast %cst_38 : f32 to vector<4x256xf32>
    %77 = arith.maximumf %75, %76 : vector<4x256xf32>
    %cst_39 = arith.constant dense<0.000000e+00> : vector<4x256xf32>
    %78 = tpu.matmul %64, %1, %cst_39 {dimension_numbers = #tpu.dot_dimension_numbers<[1], [0], [0], [1], [0, 0, 1, 1], [], []>} : vector<4x8xf32>, vector<8x256xf32>, vector<4x256xf32> -> vector<4x256xf32>
    %79 = vector.broadcast %65 : vector<4x1xf32> to vector<4x256xf32>
    %80 = arith.addf %78, %79 : vector<4x256xf32>
    %cst_40 = arith.constant 0.000000e+00 : f32
    %81 = vector.broadcast %cst_40 : f32 to vector<4x256xf32>
    %82 = arith.maximumf %80, %81 : vector<4x256xf32>
    %cst_41 = arith.constant dense<0.000000e+00> : vector<256x256xf32>
    %83 = tpu.matmul %77, %72, %cst_41 {dimension_numbers = #tpu.dot_dimension_numbers<[0], [0], [1], [1], [0, 1, 1, 1], [], []>} : vector<4x256xf32>, vector<4x256xf32>, vector<256x256xf32> -> vector<256x256xf32>
    %84 = arith.addf %83, %31 : vector<256x256xf32>
    %cst_42 = arith.constant dense<0xFF800000> : vector<256xf32>
    %85 = vector.multi_reduction <maximumf>, %84, %cst_42 [0] : vector<256x256xf32> to vector<256xf32>
    %86 = vector.shape_cast %85 : vector<256xf32> to vector<1x256xf32>
    %87 = vector.broadcast %86 : vector<1x256xf32> to vector<256x256xf32>
    %88 = arith.subf %84, %87 : vector<256x256xf32>
    %89 = math.exp %88 : vector<256x256xf32>
    %cst_43 = arith.constant dense<0.000000e+00> : vector<256xf32>
    %90 = vector.multi_reduction <add>, %89, %cst_43 [0] : vector<256x256xf32> to vector<256xf32>
    %91 = vector.shape_cast %90 : vector<256xf32> to vector<1x256xf32>
    %92 = tpu.reciprocal %91 : vector<1x256xf32> -> vector<1x256xf32>
    %93 = vector.broadcast %92 : vector<1x256xf32> to vector<256x256xf32>
    %94 = arith.mulf %89, %93 : vector<256x256xf32>
    %cst_44 = arith.constant dense<0.000000e+00> : vector<4x256xf32>
    %95 = tpu.matmul %82, %94, %cst_44 {dimension_numbers = #tpu.dot_dimension_numbers<[1], [1], [0], [0], [0, 0, 1, 0], [], []>} : vector<4x256xf32>, vector<256x256xf32>, vector<4x256xf32> -> vector<4x256xf32>
    %cst_45 = arith.constant dense<0.000000e+00> : vector<8x256xf32>
    %96 = tpu.matmul %66, %95, %cst_45 {dimension_numbers = #tpu.dot_dimension_numbers<[1], [0], [0], [1], [0, 0, 1, 1], [], []>} : vector<8x4xf32>, vector<4x256xf32>, vector<8x256xf32> -> vector<8x256xf32>
    %97 = vector.broadcast %67 : vector<8x1xf32> to vector<8x256xf32>
    %98 = arith.addf %96, %97 : vector<8x256xf32>
    %cst_46 = arith.constant 0.000000e+00 : f32
    %99 = vector.broadcast %cst_46 : f32 to vector<8x256xf32>
    %100 = arith.maximumf %98, %99 : vector<8x256xf32>
    %101 = arith.addf %100, %1 : vector<8x256xf32>
    %cst_47 = arith.constant dense<0.000000e+00> : vector<4x256xf32>
    %102 = tpu.matmul %60, %101, %cst_47 {dimension_numbers = #tpu.dot_dimension_numbers<[1], [0], [0], [1], [0, 0, 1, 1], [], []>} : vector<4x8xf32>, vector<8x256xf32>, vector<4x256xf32> -> vector<4x256xf32>
    %103 = vector.broadcast %61 : vector<4x1xf32> to vector<4x256xf32>
    %104 = arith.addf %102, %103 : vector<4x256xf32>
    %cst_48 = arith.constant 0.000000e+00 : f32
    %105 = vector.broadcast %cst_48 : f32 to vector<4x256xf32>
    %106 = arith.maximumf %104, %105 : vector<4x256xf32>
    %cst_49 = arith.constant dense<0.000000e+00> : vector<4x256xf32>
    %107 = tpu.matmul %62, %101, %cst_49 {dimension_numbers = #tpu.dot_dimension_numbers<[1], [0], [0], [1], [0, 0, 1, 1], [], []>} : vector<4x8xf32>, vector<8x256xf32>, vector<4x256xf32> -> vector<4x256xf32>
    %108 = vector.broadcast %63 : vector<4x1xf32> to vector<4x256xf32>
    %109 = arith.addf %107, %108 : vector<4x256xf32>
    %cst_50 = arith.constant 0.000000e+00 : f32
    %110 = vector.broadcast %cst_50 : f32 to vector<4x256xf32>
    %111 = arith.maximumf %109, %110 : vector<4x256xf32>
    %cst_51 = arith.constant dense<0.000000e+00> : vector<4x256xf32>
    %112 = tpu.matmul %64, %101, %cst_51 {dimension_numbers = #tpu.dot_dimension_numbers<[1], [0], [0], [1], [0, 0, 1, 1], [], []>} : vector<4x8xf32>, vector<8x256xf32>, vector<4x256xf32> -> vector<4x256xf32>
    %113 = vector.broadcast %65 : vector<4x1xf32> to vector<4x256xf32>
    %114 = arith.addf %112, %113 : vector<4x256xf32>
    %cst_52 = arith.constant 0.000000e+00 : f32
    %115 = vector.broadcast %cst_52 : f32 to vector<4x256xf32>
    %116 = arith.maximumf %114, %115 : vector<4x256xf32>
    %cst_53 = arith.constant dense<0.000000e+00> : vector<256x256xf32>
    %117 = tpu.matmul %111, %106, %cst_53 {dimension_numbers = #tpu.dot_dimension_numbers<[0], [0], [1], [1], [0, 1, 1, 1], [], []>} : vector<4x256xf32>, vector<4x256xf32>, vector<256x256xf32> -> vector<256x256xf32>
    %118 = arith.addf %117, %59 : vector<256x256xf32>
    %cst_54 = arith.constant dense<0xFF800000> : vector<256xf32>
    %119 = vector.multi_reduction <maximumf>, %118, %cst_54 [0] : vector<256x256xf32> to vector<256xf32>
    %120 = vector.shape_cast %119 : vector<256xf32> to vector<1x256xf32>
    %121 = vector.broadcast %120 : vector<1x256xf32> to vector<256x256xf32>
    %122 = arith.subf %118, %121 : vector<256x256xf32>
    %123 = math.exp %122 : vector<256x256xf32>
    %cst_55 = arith.constant dense<0.000000e+00> : vector<256xf32>
    %124 = vector.multi_reduction <add>, %123, %cst_55 [0] : vector<256x256xf32> to vector<256xf32>
    %125 = vector.shape_cast %124 : vector<256xf32> to vector<1x256xf32>
    %126 = tpu.reciprocal %125 : vector<1x256xf32> -> vector<1x256xf32>
    %127 = vector.broadcast %126 : vector<1x256xf32> to vector<256x256xf32>
    %128 = arith.mulf %123, %127 : vector<256x256xf32>
    %cst_56 = arith.constant dense<0.000000e+00> : vector<4x256xf32>
    %129 = tpu.matmul %116, %128, %cst_56 {dimension_numbers = #tpu.dot_dimension_numbers<[1], [1], [0], [0], [0, 0, 1, 0], [], []>} : vector<4x256xf32>, vector<256x256xf32>, vector<4x256xf32> -> vector<4x256xf32>
    %cst_57 = arith.constant dense<0.000000e+00> : vector<8x256xf32>
    %130 = tpu.matmul %66, %129, %cst_57 {dimension_numbers = #tpu.dot_dimension_numbers<[1], [0], [0], [1], [0, 0, 1, 1], [], []>} : vector<8x4xf32>, vector<4x256xf32>, vector<8x256xf32> -> vector<8x256xf32>
    %131 = vector.broadcast %67 : vector<8x1xf32> to vector<8x256xf32>
    %132 = arith.addf %130, %131 : vector<8x256xf32>
    %cst_58 = arith.constant 0.000000e+00 : f32
    %133 = vector.broadcast %cst_58 : f32 to vector<8x256xf32>
    %134 = arith.maximumf %132, %133 : vector<8x256xf32>
    %135 = arith.addf %134, %101 : vector<8x256xf32>
    %c0_59 = arith.constant 0 : index
    %c0_60 = arith.constant 0 : index
    %c0_61 = arith.constant 0 : index
    %136 = vector.load %arg2[%c0_59, %c0_60, %c0_61] : memref<1x8x256xf32, #tpu.memory_space<vmem>>, vector<1x8x256xf32>
    %137 = vector.shape_cast %136 : vector<1x8x256xf32> to vector<8x256xf32>
    %138 = arith.addf %135, %137 : vector<8x256xf32>
    %c0_62 = arith.constant 0 : index
    %c0_63 = arith.constant 0 : index
    %c0_64 = arith.constant 0 : index
    %139 = vector.load %arg11[%c0_62, %c0_63, %c0_64] : memref<1x8x256xf32, #tpu.memory_space<vmem>>, vector<1x8x256xf32>
    %140 = vector.shape_cast %139 : vector<1x8x256xf32> to vector<8x256xf32>
    %141 = vector.shape_cast %138 : vector<8x256xf32> to vector<1x8x256xf32>
    tpu.vector_store %arg11[%c0_62, %c0_63, %c0_64], %141 {strides = array<i32>} : memref<1x8x256xf32, #tpu.memory_space<vmem>>, vector<1x8x256xf32>,
    return
  }
  func.func @transform_0(%arg0: i32) -> (i32, i32, i32) {
    %c0_i32 = arith.constant 0 : i32
    %c0_i32_0 = arith.constant 0 : i32
    %c0_i32_1 = arith.constant 0 : i32
    return %arg0, %c0_i32, %c0_i32_0 : i32, i32, i32
  }
  func.func @transform_1(%arg0: i32) -> (i32, i32, i32) {
    %c0_i32 = arith.constant 0 : i32
    %c0_i32_0 = arith.constant 0 : i32
    %c0_i32_1 = arith.constant 0 : i32
    return %arg0, %c0_i32, %c0_i32_0 : i32, i32, i32
  }
  func.func @transform_2(%arg0: i32) -> (i32, i32) {
    %c0_i32 = arith.constant 0 : i32
    %c0_i32_0 = arith.constant 0 : i32
    %c0_i32_1 = arith.constant 0 : i32
    return %c0_i32, %c0_i32_0 : i32, i32
  }
  func.func @transform_3(%arg0: i32) -> (i32, i32) {
    %c0_i32 = arith.constant 0 : i32
    %c0_i32_0 = arith.constant 0 : i32
    %c0_i32_1 = arith.constant 0 : i32
    return %c0_i32, %c0_i32_0 : i32, i32
  }
  func.func @transform_4(%arg0: i32) -> (i32, i32) {
    %c0_i32 = arith.constant 0 : i32
    %c0_i32_0 = arith.constant 0 : i32
    %c0_i32_1 = arith.constant 0 : i32
    return %c0_i32, %c0_i32_0 : i32, i32
  }
  func.func @transform_5(%arg0: i32) -> (i32, i32) {
    %c0_i32 = arith.constant 0 : i32
    %c0_i32_0 = arith.constant 0 : i32
    %c0_i32_1 = arith.constant 0 : i32
    return %c0_i32, %c0_i32_0 : i32, i32
  }
  func.func @transform_6(%arg0: i32) -> (i32, i32) {
    %c0_i32 = arith.constant 0 : i32
    %c0_i32_0 = arith.constant 0 : i32
    %c0_i32_1 = arith.constant 0 : i32
    return %c0_i32, %c0_i32_0 : i32, i32
  }
  func.func @transform_7(%arg0: i32) -> (i32, i32) {
    %c0_i32 = arith.constant 0 : i32
    %c0_i32_0 = arith.constant 0 : i32
    %c0_i32_1 = arith.constant 0 : i32
    return %c0_i32, %c0_i32_0 : i32, i32
  }
  func.func @transform_8(%arg0: i32) -> (i32, i32) {
    %c0_i32 = arith.constant 0 : i32
    %c0_i32_0 = arith.constant 0 : i32
    %c0_i32_1 = arith.constant 0 : i32
    return %c0_i32, %c0_i32_0 : i32, i32
  }
  func.func @transform_9(%arg0: i32) -> (i32, i32) {
    %c0_i32 = arith.constant 0 : i32
    %c0_i32_0 = arith.constant 0 : i32
    %c0_i32_1 = arith.constant 0 : i32
    return %c0_i32, %c0_i32_0 : i32, i32
  }
  func.func @transform_10(%arg0: i32) -> (i32, i32, i32) {
    %c0_i32 = arith.constant 0 : i32
    %c0_i32_0 = arith.constant 0 : i32
    %c0_i32_1 = arith.constant 0 : i32
    return %arg0, %c0_i32, %c0_i32_0 : i32, i32, i32
  }
}

</mosaic_0001>

<bundles_post_ra>
// kernel: _ecm_scale_pallas.1
= control target key start
LH: loop header
LB: loop body
LE: loop exit
PB: predicated region body
PF: predicated region fallthrough
CT: control target
= control target key end

     0   :  { %s3805_s13 = smov 0   ;;  %s6604_s0 = inlined_call_operand.vmem [shape: f32[2,8,256], index: 0, kind: input, shape index: {}]   ;;  %s6605_s1 = inlined_call_operand.vmem [shape: f32[2,8,256], index: 1, kind: input, shape index: {}]   ;;  %s6606_s2 = inlined_call_operand.vmem [shape: f32[4,8], index: 2, kind: input, shape index: {}]   ;;  %s6607_s3 = inlined_call_operand.vmem [shape: f32[4,1], index: 3, kind: input, shape index: {}]   ;;  %s6608_s4 = inlined_call_operand.vmem [shape: f32[4,8], index: 4, kind: input, shape index: {}]   ;;  %s6609_s5 = inlined_call_operand.vmem [shape: f32[4,1], index: 5, kind: input, shape index: {}]   ;;  %s6610_s6 = inlined_call_operand.vmem [shape: f32[4,8], index: 6, kind: input, shape index: {}]   ;;  %s6611_s7 = inlined_call_operand.vmem [shape: f32[4,1], index: 7, kind: input, shape index: {}]   ;;  %s6612_s8 = inlined_call_operand.vmem [shape: f32[8,4], index: 8, kind: input, shape index: {}]   ;;  %s6613_s9 = inlined_call_operand.vmem [shape: f32[8,1], index: 9, kind: input, shape index: {}]   ;;  %s6614_s10 = inlined_call_operand.vmem [shape: f32[2,8,256], index: 10, kind: output, shape index: {}]  }
   0x1 LB: > { %s3290_s14 = sadd.s32 4294967295, %s3746_s13   ;;  %p3294_p0 = scmp.ge.s32.totalorder %s3746_s13, 1  ;;  %s3746_s13 = sphi %s3805_s13, %s20_s13  }
   0x2   : > { %p322_p1 = scmp.lt.s32.totalorder %s3746_s13, 3 }
   0x4   : > { %p323_p2 = pnand %p3294_p0, %p322_p1 }
   0x6   : > { %326 = sbr.rel (%p323_p2) target bundleno = 2420 (0x974), region = 60 }
   0xb   : > { %p365_p3 = scmp.lt.s32.totalorder %s3290_s14, 1  ;;  %v1017_v0 = vld [vmem:[%s6609_s5] sm:$0xf]  ;;  %v3748_v1 = vmov 0   ;;  %vm1027_vm0 = vcmask 64512   ;;  %vm1334_vm1 = vcmask 1043456   ;;  %v382_v36 = vlaneseq }
   0xc   : > { %3469 = vset.pattern.permute.xlu0 %v3748_v1  ;;  %3470 = vset.pattern.permute.xlu2 %v3748_v1  ;;  %v1016_v2 = vld [vmem:[%s6608_s4] sm:$0xf]  ;;  %vm1237_vm2 = vcmask 31744  }
   0xd   : > { %s7297_s14 = smov (!%p365_p3, %s3290_s14), 1  ;;  %1075 = vperm.xlu0 %3469, %v1017_v0   ;;  %v1014_v5 = vld [vmem:[%s6606_s2] sm:$0xf]  ;;  %v3879_v37 = vand.u32 127, %v382_v36  ;;  %v3881_v39 = vshrl.u32 %v382_v36, 7 }
   0xe   : > { %s3816_s17 = sshll.u32 %s7297_s14, 4  ;;  %v1015_v6 = vld [vmem:[%s6607_s3] sm:$0xf] }
   0xf   : > { %s3822_s20 = scalar_lea.vmem %s6604_s0, %s3816_s17  ;;  %6880 = vst [vmem:[#allocation4_spill] sm:$0xff] %v3879_v37  ;;  %v3886_v40 = vadd.s32 128, %v3879_v37  ;;  %v3889_v41 = vadd.s32 16, %v3881_v39  ;;  %v6637_v42 = vshra.s32 %v3881_v39, 4  ;;  %v6636_v43 = vshra.s32 %v3879_v37, 4  ;;  %s374_s25 = scalar_lea.vmem %s6605_s1, %s3816_s17 }
  0x10   : > { %v380_v3 = vld [vmem:[%s3822_s20] sm:$0xff]  ;;  %v381_v4 = vld [vmem:[%s3822_s20 + $0x8] sm:$0xff]  ;;  %6881 = vst [vmem:[#allocation5_spill] sm:$0xff] %v3881_v39  ;;  %v3896_v47 = vadd.s32 8, %v3881_v39  ;;  %v3899_v48 = vadd.s32 24, %v3881_v39  ;;  %v6633_v49 = vand.u32 15, %v3881_v39  ;;  %s379_s28 = scalar_lea.vmem %s6614_s10, %s3816_s17 }
  0x11   : > { %1096 = vmatpush.msra.mxu2 %v380_v3  ;;  %1046 = vmatpush.msra.mxu0 %v380_v3  ;;  %6882 = vst [vmem:[#allocation6_spill] sm:$0xff] %v3886_v40  ;;  %v6634_v44 = vshra.s32 %v3886_v40, 4  ;;  %v6629_v45 = vshra.s32 %v3889_v41, 4  ;;  %v482_v50 = vshra.s32 %v6637_v42, 3  ;;  %v6631_v51 = vand.u32 15, %v3879_v37 }
  0x12   : > { %3303 = vmatmul.msk.f32.vlgmr.msra.gmra.mxu2 %vm1027_vm0, %v1016_v2  ;;  %1066 = vmatpush.msra.mxu1 %v381_v4  ;;  %6883 = vst [vmem:[#allocation7_spill] sm:$0xff] %v3889_v41  ;;  %v614_v52 = vshra.s32 %v6636_v43, 3  ;;  %v6628_v53 = vand.u32 15, %v3886_v40  ;;  %v6623_v55 = vand.u32 15, %v3889_v41  ;;  %v6630_v59 = vshra.s32 %v3896_v47, 4 }
  0x13   : > { %3301 = vmatmul.msk.f32.vlgmr.msra.gmra.mxu0 %vm1027_vm0, %v1014_v5  ;;  %3302 = vmatmul.msk.f32.vlgmr.msra.gmra.mxu1 %vm1027_vm0, %v1014_v5  ;;  %6884 = vst [vmem:[#allocation8_spill] sm:$0xff] %v3896_v47  ;;  %v615_v54 = vshra.s32 %v6634_v44, 3  ;;  %v484_v56 = vshra.s32 %v6629_v45, 3  ;;  %v6625_v60 = vshra.s32 %v3899_v48, 4  ;;  %v514_v61 = vmul.u32 2, %v482_v50 }
  0x14   : > { %1116 = vmatpush.msrb.mxu2 %v381_v4  ;;  %1146 = vmatpush.msrb.mxu0 %v380_v3  ;;  %6885 = vst [vmem:[#allocation9_spill] sm:$0xff] %v3899_v48  ;;  %v546_v62 = vshra.s32 %v6633_v49, 3  ;;  %v616_v63 = vmul.u32 2, %v614_v52  ;;  %v618_v0 = vshra.s32 %v6631_v51, 3  ;;  %v4422_v37 = vadd.s32 176, %v3881_v39 }
  0x15   : > { %1024 = vperm.xlu0 %3469, %v1015_v6   ;;  %1166 = vmatpush.msrb.mxu1 %v381_v4  ;;  %v617_v1 = vmul.u32 2, %v615_v54  ;;  %v516_v3 = vmul.u32 2, %v484_v56  ;;  %v548_v4 = vshra.s32 %v6623_v55, 3  ;;  %v6627_v6 = vand.u32 15, %v3896_v47 }
  0x16   : > { %v4115_v55 = vadd.s32 96, %v3881_v39  ;;  %6943 = vst [vmem:[#allocation61_spill] sm:$0xff] %v4422_v37 }
  0x18   : > { %6903 = vst [vmem:[#allocation27_spill] sm:$0xff] %v4115_v55 }
  0x1a   : > { %3304 = vmatmul.msk.f32.vlgmr.msrb.gmra.mxu2 %vm1027_vm0, %v1016_v2  ;;  %v619_v2 = vshra.s32 %v6628_v53, 3 }
  0x7f   : > { %v3839_v7 = vpop.permute.xlu0 %1075 }
  0x80   : > { %6878 = vst [vmem:[#allocation2_spill] sm:$0xff] %v3839_v7 }
  0x87   : > { %v3841_v8 = vpop.permute.xlu0 %1024 }
  0x88   : > { %6879 = vst [vmem:[#allocation3_spill] sm:$0xff] %v3841_v8 }
  0x90   : > { %v1048_v9 = vpop.f32.mrf.mxu0  ;;  %v1068_v10 = vpop.f32.mrf.mxu1 }
  0x91   : > { %v1049_v11 = vadd.f32 %v1048_v9, %v3841_v8  ;;  %v1069_v12 = vadd.f32 %v1068_v10, %v3841_v8  ;;  %v483_v9 = vshra.s32 %v6630_v59, 3  ;;  %v6622_v10 = vand.u32 15, %v3899_v48 }
  0x92   : > { %v6734_v8 = vshra.s32 %v4422_v37, 4 }
  0x93   : > { %v1071_v13 = vmax.f32 %v1049_v11, 0.0  ;;  %v1072_v14 = vmax.f32 %v1069_v12, 0.0  ;;  %v485_v11 = vshra.s32 %v6625_v60, 3  ;;  %v578_v12 = vadd.s32 %v546_v62, %v514_v61 }
  0x95   : > { %v1098_v15 = vpop.f32.mrf.mxu2  ;;  %3340 = vmatpush.msk.msra.mxu3 %vm1334_vm1, %v1072_v14  ;;  %3307 = vmatpush.msk.msra.mxu2 %vm1334_vm1, %v1071_v13  ;;  %v3933_v13 = vadd.s32 %v618_v0, %v616_v63  ;;  %v3935_v14 = vadd.s32 %v619_v2, %v617_v1 }
  0x96   : > { %v1099_v16 = vadd.f32 %v1098_v15, %v3839_v7  ;;  %v580_v15 = vadd.s32 %v548_v4, %v516_v3 }
  0x97   : > { %vm622_vm3 = vcmp.eq.s32.totalorder %v578_v12, %v3933_v13  ;;  %vm623_vm4 = vcmp.eq.s32.totalorder %v578_v12, %v3935_v14 }
  0x98   : > { %v1121_v17 = vmax.f32 %v1099_v16, 0.0  ;;  %v3938_v16 = vadd.s32 32, %v3881_v39  ;;  %vm626_vm5 = vcmp.eq.s32.totalorder %v580_v15, %v3933_v13  ;;  %vm627_vm6 = vcmp.eq.s32.totalorder %v580_v15, %v3935_v14 }
  0x9a   : > { %1173 = vxpose.xlu1.b32.start.end [1/1] (short) %v1121_v17, 128  ;;  %6886 = vst [vmem:[#allocation10_spill] sm:$0xff] %v3938_v16  ;;  %v515_v17 = vmul.u32 2, %v483_v9  ;;  %v3996_v9 = vadd.s32 48, %v3881_v39 }
  0x9c   : > { %6890 = vst [vmem:[#allocation14_spill] sm:$0xff] %v3996_v9 }
  0x9d   : > { %v1118_v18 = vpop.f32.mrf.mxu2 }
  0x9e   : > { %v1119_v19 = vadd.f32 %v1118_v18, %v3839_v7  ;;  %v547_v18 = vshra.s32 %v6627_v6, 3 }
  0xa0   : > { %v1122_v20 = vmax.f32 %v1119_v19, 0.0 }
 0x11a   : > { %1205 = vxpose.xlu1.b32.start.end [1/1] (short) %v1122_v20, 128 }
 0x13e   : > { %v1189_v21 = vpop.trf.xlu1 }
 0x13f   : > { %3308 = vmatmul.msk.f32.vlgmr.msra.gmra.mxu2 %vm1237_vm2, %v1189_v21  ;;  %3341 = vmatmul.msk.f32.vlgmr.msra.gmra.mxu3 %vm1237_vm2, %v1189_v21  ;;  %v517_v21 = vmul.u32 2, %v485_v11 }
 0x146   : > { %v1190_v22 = vpop.trf.xlu1 }
 0x147   : > { %3309 = vmatmul.msk.f32.gmra.mxu2 %vm1237_vm2, %v1190_v22  ;;  %3342 = vmatmul.msk.f32.gmra.mxu3 %vm1237_vm2, %v1190_v22  ;;  %v549_v22 = vshra.s32 %v6622_v10, 3 }
 0x14e   : > { %v1191_v23 = vpop.trf.xlu1 }
 0x14f   : > { %3310 = vmatmul.msk.f32.gmra.mxu2 %vm1237_vm2, %v1191_v23  ;;  %3343 = vmatmul.msk.f32.gmra.mxu3 %vm1237_vm2, %v1191_v23  ;;  %v6624_v23 = vshra.s32 %v3938_v16, 4 }
 0x156   : > { %v1192_v24 = vpop.trf.xlu1 }
 0x157   : > { %3311 = vmatmul.msk.f32.gmra.mxu2 %vm1237_vm2, %v1192_v24  ;;  %3344 = vmatmul.msk.f32.gmra.mxu3 %vm1237_vm2, %v1192_v24  ;;  %v579_v24 = vadd.s32 %v547_v18, %v515_v17 }
 0x159   : > { %vm624_vm7 = vcmp.eq.s32.totalorder %v579_v24, %v3933_v13  ;;  %vm625_vm8 = vcmp.eq.s32.totalorder %v579_v24, %v3935_v14 }
 0x15e   : > { %v1193_v25 = vpop.trf.xlu1 }
 0x15f   : > { %3312 = vmatmul.msk.f32.gmra.mxu2 %vm1237_vm2, %v1193_v25  ;;  %3345 = vmatmul.msk.f32.gmra.mxu3 %vm1237_vm2, %v1193_v25 }
 0x166   : > { %v1194_v26 = vpop.trf.xlu1 }
 0x167   : > { %3313 = vmatmul.msk.f32.gmra.mxu2 %vm1237_vm2, %v1194_v26  ;;  %3346 = vmatmul.msk.f32.gmra.mxu3 %vm1237_vm2, %v1194_v26  ;;  %v581_v26 = vadd.s32 %v549_v22, %v517_v21 }
 0x169   : > { %vm628_vm9 = vcmp.eq.s32.totalorder %v581_v26, %v3933_v13  ;;  %vm629_vm10 = vcmp.eq.s32.totalorder %v581_v26, %v3935_v14 }
 0x16e   : > { %v1195_v27 = vpop.trf.xlu1 }
 0x16f   : > { %3314 = vmatmul.msk.f32.gmra.mxu2 %vm1237_vm2, %v1195_v27  ;;  %3347 = vmatmul.msk.f32.gmra.mxu3 %vm1237_vm2, %v1195_v27  ;;  %v6659_v27 = vmov -1e+30  }
 0x170   : > { %v688_v63 = vsel %vm624_vm7, 0.0, %v6659_v27  ;;  %v689_v0 = vsel %vm625_vm8, 0.0, %v6659_v27  ;;  %v692_v1 = vsel %vm628_vm9, 0.0, %v6659_v27  ;;  %v693_v2 = vsel %vm629_vm10, 0.0, %v6659_v27 }
 0x176   : > { %v1196_v28 = vpop.trf.xlu1 }
 0x177   : > { %3315 = vmatmul.msk.f32.gmra.mxu2 %vm1237_vm2, %v1196_v28  ;;  %3348 = vmatmul.msk.f32.gmra.mxu3 %vm1237_vm2, %v1196_v28  ;;  %v686_v28 = vsel %vm622_vm3, 0.0, %v6659_v27 }
 0x17e   : > { %v1197_v29 = vpop.trf.xlu1 }
 0x17f   : > { %3316 = vmatmul.msk.f32.gmra.mxu2 %vm1237_vm2, %v1197_v29  ;;  %3349 = vmatmul.msk.f32.gmra.mxu3 %vm1237_vm2, %v1197_v29  ;;  %v687_v29 = vsel %vm623_vm4, 0.0, %v6659_v27 }
 0x186   : > { %v1198_v30 = vpop.trf.xlu1 }
 0x187   : > { %3317 = vmatmul.msk.f32.gmra.mxu2 %vm1237_vm2, %v1198_v30  ;;  %3350 = vmatmul.msk.f32.gmra.mxu3 %vm1237_vm2, %v1198_v30  ;;  %v690_v30 = vsel %vm626_vm5, 0.0, %v6659_v27 }
 0x18e   : > { %v1199_v31 = vpop.trf.xlu1 }
 0x18f   : > { %3318 = vmatmul.msk.f32.gmra.mxu2 %vm1237_vm2, %v1199_v31  ;;  %3351 = vmatmul.msk.f32.gmra.mxu3 %vm1237_vm2, %v1199_v31  ;;  %v691_v31 = vsel %vm627_vm6, 0.0, %v6659_v27 }
 0x196   : > { %v1200_v32 = vpop.trf.xlu1 }
 0x197   : > { %3319 = vmatmul.msk.f32.gmra.mxu2 %vm1237_vm2, %v1200_v32  ;;  %3352 = vmatmul.msk.f32.gmra.mxu3 %vm1237_vm2, %v1200_v32  ;;  %v6620_v32 = vand.u32 15, %v3938_v16 }
 0x199   : > { %v550_v56 = vshra.s32 %v6620_v32, 3 }
 0x19e   : > { %v1201_v33 = vpop.trf.xlu1 }
 0x19f   : > { %3320 = vmatmul.msk.f32.gmra.mxu2 %vm1237_vm2, %v1201_v33  ;;  %3353 = vmatmul.msk.f32.gmra.mxu3 %vm1237_vm2, %v1201_v33  ;;  %v486_v33 = vshra.s32 %v6624_v23, 3 }
 0x1a1   : > { %v518_v54 = vmul.u32 2, %v486_v33 }
 0x1a3   : > { %v582_v3 = vadd.s32 %v550_v56, %v518_v54 }
 0x1a5   : > { %vm630_vm11 = vcmp.eq.s32.totalorder %v582_v3, %v3933_v13  ;;  %vm631_vm12 = vcmp.eq.s32.totalorder %v582_v3, %v3935_v14 }
 0x1a6   : > { %v1202_v34 = vpop.trf.xlu1 }
 0x1a7   : > { %3321 = vmatmul.msk.f32.gmra.mxu2 %vm1237_vm2, %v1202_v34  ;;  %3354 = vmatmul.msk.f32.gmra.mxu3 %vm1237_vm2, %v1202_v34  ;;  %v3959_v34 = vadd.s32 40, %v3881_v39 }
 0x1a9   : > { %6887 = vst [vmem:[#allocation11_spill] sm:$0xff] %v3959_v34  ;;  %v6619_v61 = vshra.s32 %v3959_v34, 4  ;;  %v6617_v4 = vand.u32 15, %v3959_v34 }
 0x1ab   : > { %v551_v24 = vshra.s32 %v6617_v4, 3  ;;  %v4104_v4 = vadd.s32 80, %v3881_v39 }
 0x1ad   : > { %6902 = vst [vmem:[#allocation26_spill] sm:$0xff] %v4104_v4  ;;  %v6639_v10 = vshra.s32 %v4104_v4, 4  ;;  %v6642_v51 = vand.u32 15, %v4104_v4 }
 0x1ae   : > { %v1203_v35 = vpop.trf.xlu1 }
 0x1af   : > { %3322 = vmatmul.msk.f32.gmra.mxu2 %vm1237_vm2, %v1203_v35  ;;  %3355 = vmatmul.msk.f32.gmra.mxu3 %vm1237_vm2, %v1203_v35 }
 0x1b6   : > { %v1204_v38 = vpop.trf.xlu1 }
 0x1b7   : > { %3323 = vmatmul.msk.f32.gmra.mxu2 %vm1237_vm2, %v1204_v38  ;;  %3356 = vmatmul.msk.f32.gmra.mxu3 %vm1237_vm2, %v1204_v38 }
 0x1be   : > { %v1221_v46 = vpop.trf.xlu1 }
 0x1bf   : > { %3324 = vmatmul.msk.f32.gmra.mxu2 %vm1237_vm2, %v1221_v46  ;;  %3357 = vmatmul.msk.f32.gmra.mxu3 %vm1237_vm2, %v1221_v46 }
 0x1c2   : > { %v1358_v57 = vpop.f32.mrf.mxu2  ;;  %v1471_v58 = vpop.f32.mrf.mxu3 }
 0x1c3   : > { %v3964_v38 = vadd.f32 %v1358_v57, %v686_v28  ;;  %v3966_v46 = vadd.f32 %v1471_v58, %v687_v29  ;;  %v694_v28 = vsel %vm630_vm11, 0.0, %v6659_v27  ;;  %v695_v29 = vsel %vm631_vm12, 0.0, %v6659_v27 }
 0x1c5   : > { %6888 = vst [vmem:[#allocation12_spill] sm:$0xff] %v3966_v46 }
 0x1c6   : > { %v1222_v5 = vpop.trf.xlu1 }
 0x1c7   : > { %3325 = vmatmul.msk.f32.gmra.mxu2 %vm1237_vm2, %v1222_v5  ;;  %3358 = vmatmul.msk.f32.gmra.mxu3 %vm1237_vm2, %v1222_v5  ;;  %v487_v5 = vshra.s32 %v6619_v61, 3 }
 0x1c9   : > { %v519_v22 = vmul.u32 2, %v487_v5 }
 0x1ca   : > { %v1361_v19 = vpop.f32.mrf.mxu2  ;;  %v1474_v20 = vpop.f32.mrf.mxu3 }
 0x1cb   : > { %v3998_v15 = vadd.f32 %v1361_v19, %v688_v63  ;;  %v4000_v17 = vadd.f32 %v1474_v20, %v689_v0 }
 0x1cd   : > { %6891 = vst [vmem:[#allocation15_spill] sm:$0xff] %v4000_v17 }
 0x1ce   : > { %v1223_v25 = vpop.trf.xlu1 }
 0x1cf   : > { %3326 = vmatmul.msk.f32.gmra.mxu2 %vm1237_vm2, %v1223_v25  ;;  %3359 = vmatmul.msk.f32.gmra.mxu3 %vm1237_vm2, %v1223_v25  ;;  %v6621_v25 = vshra.s32 %v3996_v9, 4 }
 0x1d1   : > { %v488_v33 = vshra.s32 %v6621_v25, 3 }
 0x1d2   : > { %v1364_v35 = vpop.f32.mrf.mxu2  ;;  %v1477_v36 = vpop.f32.mrf.mxu3 }
 0x1d3   : > { %v3968_v50 = vadd.f32 %v1364_v35, %v690_v30  ;;  %v3970_v52 = vadd.f32 %v1477_v36, %v691_v31  ;;  %v583_v30 = vadd.s32 %v551_v24, %v519_v22  ;;  %v6618_v31 = vand.u32 15, %v3996_v9 }
 0x1d4   : > { %v4023_v35 = vadd.s32 56, %v3881_v39  ;;  %v520_v63 = vmul.u32 2, %v488_v33 }
 0x1d5   : > { %6889 = vst [vmem:[#allocation13_spill] sm:$0xff] %v3970_v52  ;;  %v1567_v62 = vmax.f32 %v3964_v38, %v3968_v50  ;;  %v1604_v57 = vmax.f32 %v3966_v46, %v3970_v52  ;;  %vm632_vm13 = vcmp.eq.s32.totalorder %v583_v30, %v3933_v13  ;;  %v552_v0 = vshra.s32 %v6618_v31, 3 }
 0x1d6   : > { %v1224_v58 = vpop.trf.xlu1  ;;  %6893 = vst [vmem:[#allocation17_spill] sm:$0xff] %v4023_v35  ;;  %vm633_vm14 = vcmp.eq.s32.totalorder %v583_v30, %v3935_v14  ;;  %v6616_v3 = vshra.s32 %v4023_v35, 4 }
 0x1d7   : > { %3327 = vmatmul.msk.f32.gmra.mxu2 %vm1237_vm2, %v1224_v58  ;;  %3360 = vmatmul.msk.f32.gmra.mxu3 %vm1237_vm2, %v1224_v58  ;;  %v584_v22 = vadd.s32 %v552_v0, %v520_v63 }
 0x1d9   : > { %vm634_vm15 = vcmp.eq.s32.totalorder %v584_v22, %v3933_v13  ;;  %vm635_vm3 = vcmp.eq.s32.totalorder %v584_v22, %v3935_v14 }
 0x1da   : > { %v1367_v11 = vpop.f32.mrf.mxu2  ;;  %v1480_v12 = vpop.f32.mrf.mxu3  ;;  %v698_v0 = vsel %vm634_vm15, 0.0, %v6659_v27 }
 0x1db   : > { %v4002_v18 = vadd.f32 %v1367_v11, %v692_v1  ;;  %v4004_v21 = vadd.f32 %v1480_v12, %v693_v2  ;;  %v696_v11 = vsel %vm632_vm13, 0.0, %v6659_v27  ;;  %v697_v12 = vsel %vm633_vm14, 0.0, %v6659_v27 }
 0x1dd   : > { %6892 = vst [vmem:[#allocation16_spill] sm:$0xff] %v4004_v21  ;;  %v1568_v26 = vmax.f32 %v3998_v15, %v4002_v18  ;;  %v1605_v19 = vmax.f32 %v4000_v17, %v4004_v21 }
 0x1de   : > { %v1225_v20 = vpop.trf.xlu1 }
 0x1df   : > { %3328 = vmatmul.msk.f32.gmra.mxu2 %vm1237_vm2, %v1225_v20  ;;  %3361 = vmatmul.msk.f32.gmra.mxu3 %vm1237_vm2, %v1225_v20 }
 0x1e2   : > { %v1370_v36 = vpop.f32.mrf.mxu2  ;;  %v1483_v54 = vpop.f32.mrf.mxu3 }
 0x1e3   : > { %v4025_v56 = vadd.f32 %v1370_v36, %v694_v28  ;;  %v4027_v58 = vadd.f32 %v1483_v54, %v695_v29 }
 0x1e5   : > { %6894 = vst [vmem:[#allocation18_spill] sm:$0xff] %v4027_v58  ;;  %v4033_v1 = vmax.f32 %v1567_v62, %v4025_v56  ;;  %v4036_v2 = vmax.f32 %v1604_v57, %v4027_v58  ;;  %v6615_v62 = vand.u32 15, %v4023_v35  ;;  %v489_v57 = vshra.s32 %v6616_v3, 3 }
 0x1e6   : > { %v1226_v5 = vpop.trf.xlu1 }
 0x1e7   : > { %3329 = vmatmul.msk.f32.gmra.mxu2 %vm1237_vm2, %v1226_v5  ;;  %3362 = vmatmul.msk.f32.gmra.mxu3 %vm1237_vm2, %v1226_v5  ;;  %v521_v36 = vmul.u32 2, %v489_v57  ;;  %v553_v54 = vshra.s32 %v6615_v62, 3  ;;  %v699_v5 = vsel %vm635_vm3, 0.0, %v6659_v27  ;;  %v4088_v62 = vadd.s32 72, %v3881_v39 }
 0x1e9   : > { %6899 = vst [vmem:[#allocation23_spill] sm:$0xff] %v4088_v62  ;;  %v6626_v3 = vshra.s32 %v4088_v62, 4  ;;  %v6632_v31 = vand.u32 15, %v4088_v62 }
 0x1ea   : > { %v1373_v24 = vpop.f32.mrf.mxu2  ;;  %v1486_v20 = vpop.f32.mrf.mxu3 }
 0x1eb   : > { %v4047_v28 = vadd.f32 %v1373_v24, %v696_v11  ;;  %v4049_v29 = vadd.f32 %v1486_v20, %v697_v12  ;;  %v585_v11 = vadd.s32 %v553_v54, %v521_v36  ;;  %v555_v60 = vshra.s32 %v6632_v31, 3 }
 0x1ec   : > { %v6643_v31 = vshra.s32 %v4115_v55, 4  ;;  %v6645_v24 = vand.u32 15, %v4115_v55 }
 0x1ed   : > { %6895 = vst [vmem:[#allocation19_spill] sm:$0xff] %v4049_v29  ;;  %v4054_v30 = vmax.f32 %v1568_v26, %v4047_v28  ;;  %v4057_v33 = vmax.f32 %v1605_v19, %v4049_v29  ;;  %vm636_vm4 = vcmp.eq.s32.totalorder %v585_v11, %v3933_v13  ;;  %vm637_vm5 = vcmp.eq.s32.totalorder %v585_v11, %v3935_v14 }
 0x1ee   : > { %v1227_v63 = vpop.trf.xlu1  ;;  %v700_v36 = vsel %vm636_vm4, 0.0, %v6659_v27  ;;  %v701_v54 = vsel %vm637_vm5, 0.0, %v6659_v27 }
 0x1ef   : > { %3330 = vmatmul.msk.f32.gmra.mxu2 %vm1237_vm2, %v1227_v63  ;;  %3363 = vmatmul.msk.f32.gmra.mxu3 %vm1237_vm2, %v1227_v63 }
 0x1f2   : > { %v1376_v12 = vpop.f32.mrf.mxu2  ;;  %v1489_v26 = vpop.f32.mrf.mxu3 }
 0x1f3   : > { %v4065_v22 = vadd.f32 %v1376_v12, %v698_v0  ;;  %v4067_v19 = vadd.f32 %v1489_v26, %v699_v5 }
 0x1f5   : > { %6896 = vst [vmem:[#allocation20_spill] sm:$0xff] %v4067_v19 }
 0x1f6   : > { %v1228_v20 = vpop.trf.xlu1 }
 0x1f7   : > { %3331 = vmatmul.msk.f32.gmra.mxu2 %vm1237_vm2, %v1228_v20  ;;  %3364 = vmatmul.msk.f32.gmra.mxu3 %vm1237_vm2, %v1228_v20 }
 0x1fa   : > { %v1379_v63 = vpop.f32.mrf.mxu2  ;;  %v1492_v0 = vpop.f32.mrf.mxu3 }
 0x1fb   : > { %v4079_v5 = vadd.f32 %v1379_v63, %v700_v36  ;;  %v4081_v12 = vadd.f32 %v1492_v0, %v701_v54  ;;  %v4094_v36 = vadd.s32 88, %v3881_v39  ;;  %v4097_v54 = vadd.s32 64, %v3881_v39 }
 0x1fd   : > { %6897 = vst [vmem:[#allocation21_spill] sm:$0xff] %v4079_v5  ;;  %v6635_v61 = vshra.s32 %v4094_v36, 4  ;;  %v6638_v32 = vshra.s32 %v4097_v54, 4  ;;  %v6641_v53 = vand.u32 15, %v4097_v54 }
 0x1fe   : > { %6898 = vst [vmem:[#allocation22_spill] sm:$0xff] %v4081_v12  ;;  %v1229_v20 = vpop.trf.xlu1 }
 0x1ff   : > { %3332 = vmatmul.msk.f32.gmra.mxu2 %vm1237_vm2, %v1229_v20  ;;  %3365 = vmatmul.msk.f32.gmra.mxu3 %vm1237_vm2, %v1229_v20  ;;  %6900 = vst [vmem:[#allocation24_spill] sm:$0xff] %v4094_v36  ;;  %v491_v20 = vshra.s32 %v6626_v3, 3  ;;  %v6640_v3 = vand.u32 15, %v4094_v36  ;;  %v493_v6 = vshra.s32 %v6635_v61, 3  ;;  %v490_v45 = vshra.s32 %v6638_v32, 3 }
 0x200   : > { %6901 = vst [vmem:[#allocation25_spill] sm:$0xff] %v4097_v54  ;;  %v554_v42 = vshra.s32 %v6641_v53, 3 }
 0x201   : > { %v523_v23 = vmul.u32 2, %v491_v20  ;;  %v492_v20 = vshra.s32 %v6639_v10, 3  ;;  %v525_v44 = vmul.u32 2, %v493_v6  ;;  %v557_v61 = vshra.s32 %v6640_v3, 3 }
 0x202   : > { %v4099_v63 = vpop.f32.mrf.mxu2  ;;  %v4101_v0 = vpop.f32.mrf.mxu3  ;;  %v522_v43 = vmul.u32 2, %v490_v45  ;;  %v556_v10 = vshra.s32 %v6642_v51, 3  ;;  %v4143_v6 = vadd.s32 104, %v3881_v39  ;;  %v558_v51 = vshra.s32 %v6645_v24, 3 }
 0x203   : > { %v587_v49 = vadd.s32 %v555_v60, %v523_v23  ;;  %v524_v26 = vmul.u32 2, %v492_v20  ;;  %v494_v60 = vshra.s32 %v6643_v31, 3  ;;  %v589_v45 = vadd.s32 %v557_v61, %v525_v44 }
 0x204   : > { %6904 = vst [vmem:[#allocation28_spill] sm:$0xff] %v4143_v6  ;;  %v586_v23 = vadd.s32 %v554_v42, %v522_v43  ;;  %v6644_v11 = vshra.s32 %v4143_v6, 4 }
 0x205   : > { %vm641_vm6 = vcmp.eq.s32.totalorder %v587_v49, %v3935_v14  ;;  %v588_v57 = vadd.s32 %v556_v10, %v524_v26  ;;  %v526_v20 = vmul.u32 2, %v494_v60  ;;  %vm645_vm7 = vcmp.eq.s32.totalorder %v589_v45, %v3935_v14 }
 0x206   : > { %v1230_v25 = vpop.trf.xlu1  ;;  %vm638_vm8 = vcmp.eq.s32.totalorder %v586_v23, %v3933_v13  ;;  %vm639_vm9 = vcmp.eq.s32.totalorder %v586_v23, %v3935_v14  ;;  %v709_v42 = vsel %vm645_vm7, 0.0, %v6659_v27  ;;  %v6652_v10 = vand.u32 15, %v4143_v6 }
 0x207   : > { %3333 = vmatmul.msk.f32.gmra.mxu2 %vm1237_vm2, %v1230_v25  ;;  %3366 = vmatmul.msk.f32.gmra.mxu3 %vm1237_vm2, %v1230_v25  ;;  %vm642_vm10 = vcmp.eq.s32.totalorder %v588_v57, %v3933_v13  ;;  %vm643_vm11 = vcmp.eq.s32.totalorder %v588_v57, %v3935_v14  ;;  %v590_v43 = vadd.s32 %v558_v51, %v526_v20  ;;  %v495_v61 = vshra.s32 %v6644_v11, 3 }
 0x208   : > { %v4164_v26 = vadd.s32 112, %v3881_v39  ;;  %v703_v60 = vsel %vm639_vm9, 0.0, %v6659_v27  ;;  %vm640_vm12 = vcmp.eq.s32.totalorder %v587_v49, %v3933_v13  ;;  %v6907_v51 = vmax.f32 %v4057_v33, %v4081_v12 }
 0x209   : > { %v707_v20 = vsel %vm643_vm11, 0.0, %v6659_v27  ;;  %vm646_vm13 = vcmp.eq.s32.totalorder %v590_v43, %v3933_v13  ;;  %vm647_vm14 = vcmp.eq.s32.totalorder %v590_v43, %v3935_v14  ;;  %v527_v24 = vmul.u32 2, %v495_v61 }
 0x20a   : > { %v4125_v25 = vpop.f32.mrf.mxu2  ;;  %v1498_v59 = vpop.f32.mrf.mxu3  ;;  %6906 = vst [vmem:[#allocation30_spill] sm:$0xff] %v4164_v26  ;;  %v559_v55 = vshra.s32 %v6652_v10, 3  ;;  %v4187_v33 = vadd.f32 %v4101_v0, %v703_v60  ;;  %v704_v43 = vsel %vm640_vm12, 0.0, %v6659_v27  ;;  %vm644_vm15 = vcmp.eq.s32.totalorder %v589_v45, %v3933_v13 }
 0x20b   : > { %v711_v0 = vsel %vm647_vm14, 0.0, %v6659_v27  ;;  %v4205_v60 = vadd.s32 120, %v3881_v39  ;;  %v6914_v49 = vmax.f32 %v4033_v1, %v4065_v22 }
 0x20c   : > { %6910 = vst [vmem:[#allocation33_spill] sm:$0xff] %v4187_v33 }
 0x20d   : > { %6913 = vst [vmem:[#allocation36_spill] sm:$0xff] %v4205_v60  ;;  %v6924_v35 = vand.u32 15, %v4205_v60 }
 0x20e   : > { %v1231_v32 = vpop.trf.xlu1 }
 0x20f   : > { %3334 = vmatmul.msk.f32.gmra.mxu2 %vm1237_vm2, %v1231_v32  ;;  %3367 = vmatmul.msk.f32.gmra.mxu3 %vm1237_vm2, %v1231_v32  ;;  %v705_v32 = vsel %vm641_vm6, 0.0, %v6659_v27 }
 0x210   : > { %v4153_v44 = vadd.f32 %v1498_v59, %v705_v32  ;;  %v702_v59 = vsel %vm638_vm8, 0.0, %v6659_v27  ;;  %v706_v32 = vsel %vm642_vm10, 0.0, %v6659_v27 }
 0x211   : > { %v4184_v36 = vadd.f32 %v4099_v63, %v702_v59  ;;  %v710_v63 = vsel %vm646_vm13, 0.0, %v6659_v27  ;;  %v591_v59 = vadd.s32 %v559_v55, %v527_v24  ;;  %v708_v55 = vsel %vm644_vm15, 0.0, %v6659_v27 }
 0x212   : > { %v1388_v3 = vpop.f32.mrf.mxu2  ;;  %v1501_v53 = vpop.f32.mrf.mxu3  ;;  %6905 = vst [vmem:[#allocation29_spill] sm:$0xff] %v4153_v44 }
 0x213   : > { %6909 = vst [vmem:[#allocation32_spill] sm:$0xff] %v4184_v36  ;;  %v4195_v61 = vadd.f32 %v1388_v3, %v706_v32  ;;  %v4197_v6 = vadd.f32 %v1501_v53, %v707_v20  ;;  %v1573_v53 = vmax.f32 %v6914_v49, %v4184_v36  ;;  %v6915_v3 = vmax.f32 %v4036_v2, %v4067_v19 }
 0x214   : > { %v4226_v2 = vadd.f32 %v4125_v25, %v704_v43  ;;  %vm648_vm3 = vcmp.eq.s32.totalorder %v591_v59, %v3933_v13  ;;  %vm649_vm4 = vcmp.eq.s32.totalorder %v591_v59, %v3935_v14  ;;  %v4244_v25 = vadd.s32 128, %v3881_v39 }
 0x215   : > { %6911 = vst [vmem:[#allocation34_spill] sm:$0xff] %v4195_v61  ;;  %v1610_v45 = vmax.f32 %v6915_v3, %v4187_v33  ;;  %v6663_v3 = vshra.s32 %v4205_v60, 4  ;;  %v712_v43 = vsel %vm648_vm3, 0.0, %v6659_v27  ;;  %v713_v59 = vsel %vm649_vm4, 0.0, %v6659_v27 }
 0x216   : > { %v1232_v31 = vpop.trf.xlu1  ;;  %6912 = vst [vmem:[#allocation35_spill] sm:$0xff] %v4197_v6  ;;  %v6666_v27 = vshra.s32 %v4244_v25, 4  ;;  %v4494_v36 = vadd.s32 248, %v3881_v39 }
 0x217   : > { %3335 = vmatmul.msk.f32.gmra.mxu2 %vm1237_vm2, %v1232_v31  ;;  %3368 = vmatmul.msk.f32.gmra.mxu3 %vm1237_vm2, %v1232_v31  ;;  %v4173_v31 = vmax.f32 %v6907_v51, %v4153_v44  ;;  %v1612_v10 = vmax.f32 %v1610_v45, %v4197_v6  ;;  %6918 = vst [vmem:[#allocation39_spill] sm:$0xff] %v4226_v2 }
 0x218   : > { %6920 = vst [vmem:[#allocation41_spill] sm:$0xff] %v4244_v25 }
 0x219   : > { %6955 = vst [vmem:[#allocation70_spill] sm:$0xff] %v4494_v36 }
 0x21a   : > { %v1391_v57 = vpop.f32.mrf.mxu2  ;;  %v1504_v23 = vpop.f32.mrf.mxu3 }
 0x21b   : > { %v4177_v11 = vadd.f32 %v1504_v23, %v709_v42  ;;  %v6653_v42 = vshra.s32 %v4164_v26, 4 }
 0x21d   : > { %6908 = vst [vmem:[#allocation31_spill] sm:$0xff] %v4177_v11  ;;  %v1613_v51 = vmax.f32 %v4173_v31, %v4177_v11  ;;  %v6654_v31 = vand.u32 15, %v4164_v26  ;;  %v496_v32 = vshra.s32 %v6653_v42, 3 }
 0x21e   : > { %v1233_v23 = vpop.trf.xlu1 }
 0x21f   : > { %3336 = vmatmul.msk.f32.gmra.mxu2 %vm1237_vm2, %v1233_v23  ;;  %3369 = vmatmul.msk.f32.gmra.mxu3 %vm1237_vm2, %v1233_v23  ;;  %v1575_v23 = vmax.f32 %v1573_v53, %v4195_v61  ;;  %v528_v45 = vmul.u32 2, %v496_v32  ;;  %v497_v32 = vshra.s32 %v6663_v3, 3  ;;  %v561_v3 = vshra.s32 %v6924_v35, 3 }
 0x220   : > { %v498_v35 = vshra.s32 %v6666_v27, 3 }
 0x222   : > { %v1394_v24 = vpop.f32.mrf.mxu2  ;;  %v1507_v20 = vpop.f32.mrf.mxu3 }
 0x223   : > { %v4221_v1 = vadd.f32 %v1394_v24, %v710_v63  ;;  %v4223_v49 = vadd.f32 %v1507_v20, %v711_v0  ;;  %v560_v63 = vshra.s32 %v6654_v31, 3  ;;  %v4239_v24 = vadd.f32 %v1391_v57, %v708_v55 }
 0x224   : > { %v6921_v57 = vmax.f32 %v4054_v30, %v4079_v5 }
 0x225   : > { %6916 = vst [vmem:[#allocation37_spill] sm:$0xff] %v4221_v1  ;;  %v4232_v42 = vmax.f32 %v1575_v23, %v4221_v1  ;;  %v4235_v53 = vmax.f32 %v1612_v10, %v4223_v49  ;;  %v592_v20 = vadd.s32 %v560_v63, %v528_v45  ;;  %v529_v10 = vmul.u32 2, %v497_v32 }
 0x226   : > { %6917 = vst [vmem:[#allocation38_spill] sm:$0xff] %v4223_v49  ;;  %v1234_v0 = vpop.trf.xlu1  ;;  %v1574_v55 = vmax.f32 %v6921_v57, %v4226_v2  ;;  %v6667_v63 = vand.u32 15, %v4244_v25  ;;  %v4279_v32 = vadd.s32 136, %v3881_v39 }
 0x227   : > { %6919 = vst [vmem:[#allocation40_spill] sm:$0xff] %v4239_v24  ;;  %3337 = vmatmul.msk.f32.gmra.mxu2 %vm1237_vm2, %v1234_v0  ;;  %3370 = vmatmul.msk.f32.gmra.mxu3 %vm1237_vm2, %v1234_v0  ;;  %vm650_vm5 = vcmp.eq.s32.totalorder %v592_v20, %v3933_v13  ;;  %vm651_vm6 = vcmp.eq.s32.totalorder %v592_v20, %v3935_v14 }
 0x228   : > { %v1576_v31 = vmax.f32 %v1574_v55, %v4239_v24  ;;  %6926 = vst [vmem:[#allocation44_spill] sm:$0xff] %v4279_v32  ;;  %v6672_v27 = vshra.s32 %v4279_v32, 4 }
 0x22a   : > { %v1397_v23 = vpop.f32.mrf.mxu2  ;;  %v1510_v0 = vpop.f32.mrf.mxu3 }
 0x22b   : > { %v4256_v26 = vadd.f32 %v1397_v23, %v712_v43  ;;  %v4258_v62 = vadd.f32 %v1510_v0, %v713_v59  ;;  %v6925_v43 = vmov -1e+30   ;;  %v530_v0 = vmul.u32 2, %v498_v35 }
 0x22c   : > { %v715_v59 = vsel %vm651_vm6, 0.0, %v6925_v43 }
 0x22d   : > { %6922 = vst [vmem:[#allocation42_spill] sm:$0xff] %v4256_v26  ;;  %v4264_v4 = vmax.f32 %v1576_v31, %v4256_v26  ;;  %v4267_v30 = vmax.f32 %v1613_v51, %v4258_v62  ;;  %v714_v31 = vsel %vm650_vm5, 0.0, %v6925_v43  ;;  %v593_v51 = vadd.s32 %v561_v3, %v529_v10 }
 0x22e   : > { %6923 = vst [vmem:[#allocation43_spill] sm:$0xff] %v4258_v62  ;;  %v1235_v45 = vpop.trf.xlu1  ;;  %v4442_v62 = vadd.s32 192, %v3881_v39 }
 0x22f   : > { %3338 = vmatmul.msk.f32.gmra.mxu2 %vm1237_vm2, %v1235_v45  ;;  %3371 = vmatmul.msk.f32.gmra.mxu3 %vm1237_vm2, %v1235_v45  ;;  %v562_v45 = vshra.s32 %v6667_v63, 3  ;;  %vm652_vm7 = vcmp.eq.s32.totalorder %v593_v51, %v3933_v13  ;;  %vm653_vm8 = vcmp.eq.s32.totalorder %v593_v51, %v3935_v14  ;;  %v4302_v63 = vadd.s32 144, %v3881_v39 }
 0x230   : > { %v716_v35 = vsel %vm652_vm7, 0.0, %v6925_v43  ;;  %6945 = vst [vmem:[#allocation63_spill] sm:$0xff] %v4442_v62 }
 0x231   : > { %6929 = vst [vmem:[#allocation47_spill] sm:$0xff] %v4302_v63 }
 0x232   : > { %v1400_v57 = vpop.f32.mrf.mxu2  ;;  %v1513_v55 = vpop.f32.mrf.mxu3 }
 0x233   : > { %v4281_v20 = vadd.f32 %v1400_v57, %v714_v31  ;;  %v4283_v23 = vadd.f32 %v1513_v55, %v715_v59  ;;  %v594_v59 = vadd.s32 %v562_v45, %v530_v0  ;;  %v717_v57 = vsel %vm653_vm8, 0.0, %v6925_v43 }
 0x234   : > { %v6675_v55 = vand.u32 15, %v4279_v32 }
 0x235   : > { %6927 = vst [vmem:[#allocation45_spill] sm:$0xff] %v4281_v20  ;;  %v1579_v3 = vmax.f32 %v4232_v42, %v4281_v20  ;;  %v1616_v10 = vmax.f32 %v4235_v53, %v4283_v23  ;;  %v499_v42 = vshra.s32 %v6672_v27, 3  ;;  %vm654_vm9 = vcmp.eq.s32.totalorder %v594_v59, %v3933_v13 }
 0x236   : > { %6928 = vst [vmem:[#allocation46_spill] sm:$0xff] %v4283_v23  ;;  %v1236_v31 = vpop.trf.xlu1  ;;  %vm655_vm10 = vcmp.eq.s32.totalorder %v594_v59, %v3935_v14  ;;  %v563_v45 = vshra.s32 %v6675_v55, 3  ;;  %v4439_v23 = vadd.s32 184, %v3881_v39 }
 0x237   : > { %3339 = vmatmul.msk.f32.gmra.mxu2 %vm1237_vm2, %v1236_v31  ;;  %3372 = vmatmul.msk.f32.gmra.mxu3 %vm1237_vm2, %v1236_v31  ;;  %v531_v0 = vmul.u32 2, %v499_v42  ;;  %v6682_v31 = vshra.s32 %v4302_v63, 4  ;;  %v4323_v42 = vadd.s32 152, %v3881_v39 }
 0x238   : > { %6944 = vst [vmem:[#allocation62_spill] sm:$0xff] %v4439_v23  ;;  %v6953_v46 = vand.u32 15, %v4439_v23 }
 0x239   : > { %v500_v59 = vshra.s32 %v6682_v31, 3  ;;  %6932 = vst [vmem:[#allocation50_spill] sm:$0xff] %v4323_v42 }
 0x23a   : > { %v1403_v53 = vpop.f32.mrf.mxu2  ;;  %v1516_v51 = vpop.f32.mrf.mxu3 }
 0x23b   : > { %v4304_v25 = vadd.f32 %v1403_v53, %v716_v35  ;;  %v4306_v60 = vadd.f32 %v1516_v51, %v717_v57  ;;  %v718_v35 = vsel %vm654_vm9, 0.0, %v6925_v43  ;;  %v719_v57 = vsel %vm655_vm10, 0.0, %v6925_v43 }
 0x23c   : > { %v595_v53 = vadd.s32 %v563_v45, %v531_v0  ;;  %v6685_v51 = vand.u32 15, %v4302_v63  ;;  %v6688_v45 = vshra.s32 %v4323_v42, 4 }
 0x23d   : > { %6930 = vst [vmem:[#allocation48_spill] sm:$0xff] %v4304_v25  ;;  %v1580_v27 = vmax.f32 %v4264_v4, %v4304_v25  ;;  %v1617_v54 = vmax.f32 %v4267_v30, %v4306_v60  ;;  %v532_v30 = vmul.u32 2, %v500_v59  ;;  %v4342_v59 = vadd.s32 160, %v3881_v39 }
 0x23e   : > { %6931 = vst [vmem:[#allocation49_spill] sm:$0xff] %v4306_v60  ;;  %vm656_vm11 = vcmp.eq.s32.totalorder %v595_v53, %v3933_v13  ;;  %v564_v0 = vshra.s32 %v6685_v51, 3  ;;  %vm657_vm12 = vcmp.eq.s32.totalorder %v595_v53, %v3935_v14 }
 0x23f   : > { %v720_v16 = vsel %vm656_vm11, 0.0, %v6925_v43  ;;  %6935 = vst [vmem:[#allocation53_spill] sm:$0xff] %v4342_v59  ;;  %v6696_v48 = vshra.s32 %v4342_v59, 4 }
 0x242   : > { %v1406_v55 = vpop.f32.mrf.mxu2  ;;  %v1519_v32 = vpop.f32.mrf.mxu3 }
 0x243   : > { %v4325_v34 = vadd.f32 %v1406_v55, %v718_v35  ;;  %v4327_v4 = vadd.f32 %v1519_v32, %v719_v57  ;;  %v721_v55 = vsel %vm657_vm12, 0.0, %v6925_v43  ;;  %v596_v32 = vadd.s32 %v564_v0, %v532_v30 }
 0x244   : > { %v6691_v35 = vand.u32 15, %v4323_v42  ;;  %v501_v57 = vshra.s32 %v6688_v45, 3 }
 0x245   : > { %6933 = vst [vmem:[#allocation51_spill] sm:$0xff] %v4325_v34  ;;  %v1581_v9 = vmax.f32 %v1579_v3, %v4325_v34  ;;  %v1618_v31 = vmax.f32 %v1616_v10, %v4327_v4  ;;  %vm658_vm13 = vcmp.eq.s32.totalorder %v596_v32, %v3933_v13  ;;  %vm659_vm14 = vcmp.eq.s32.totalorder %v596_v32, %v3935_v14 }
 0x246   : > { %6934 = vst [vmem:[#allocation52_spill] sm:$0xff] %v4327_v4  ;;  %v533_v53 = vmul.u32 2, %v501_v57  ;;  %v565_v30 = vshra.s32 %v6691_v35, 3  ;;  %v502_v57 = vshra.s32 %v6696_v48, 3 }
 0x24a   : > { %v1409_v51 = vpop.f32.mrf.mxu2  ;;  %v1522_v63 = vpop.f32.mrf.mxu3 }
 0x24b   : > { %v4344_v3 = vadd.f32 %v1409_v51, %v720_v16  ;;  %v4346_v10 = vadd.f32 %v1522_v63, %v721_v55  ;;  %v722_v16 = vsel %vm658_vm13, 0.0, %v6925_v43  ;;  %v723_v63 = vsel %vm659_vm14, 0.0, %v6925_v43 }
 0x24c   : > { %v597_v51 = vadd.s32 %v565_v30, %v533_v53  ;;  %v6701_v55 = vand.u32 15, %v4342_v59  ;;  %v534_v53 = vmul.u32 2, %v502_v57 }
 0x24d   : > { %6936 = vst [vmem:[#allocation54_spill] sm:$0xff] %v4344_v3  ;;  %v4352_v0 = vmax.f32 %v1580_v27, %v4344_v3  ;;  %v4355_v45 = vmax.f32 %v1617_v54, %v4346_v10 }
 0x24e   : > { %6937 = vst [vmem:[#allocation55_spill] sm:$0xff] %v4346_v10  ;;  %vm660_vm15 = vcmp.eq.s32.totalorder %v597_v51, %v3933_v13  ;;  %vm661_vm3 = vcmp.eq.s32.totalorder %v597_v51, %v3935_v14  ;;  %v566_v30 = vshra.s32 %v6701_v55, 3  ;;  %v504_v10 = vshra.s32 %v6734_v8, 3 }
 0x24f   : > { %v724_v48 = vsel %vm660_vm15, 0.0, %v6925_v43  ;;  %v725_v47 = vsel %vm661_vm3, 0.0, %v6925_v43  ;;  %v6748_v8 = vshra.s32 %v4439_v23, 4 }
 0x250   : > { %v536_v49 = vmul.u32 2, %v504_v10  ;;  %v4460_v10 = vadd.s32 216, %v3881_v39 }
 0x252   : > { %v1412_v35 = vpop.f32.mrf.mxu2  ;;  %v1525_v27 = vpop.f32.mrf.mxu3  ;;  %6948 = vst [vmem:[#allocation66_spill] sm:$0xff] %v4460_v10 }
 0x253   : > { %v4364_v42 = vadd.f32 %v1412_v35, %v722_v16  ;;  %v4366_v54 = vadd.f32 %v1525_v27, %v723_v63  ;;  %v598_v35 = vadd.s32 %v566_v30, %v534_v53 }
 0x255   : > { %6938 = vst [vmem:[#allocation56_spill] sm:$0xff] %v4364_v42  ;;  %v1583_v32 = vmax.f32 %v1581_v9, %v4364_v42  ;;  %v1620_v41 = vmax.f32 %v1618_v31, %v4366_v54  ;;  %vm662_vm4 = vcmp.eq.s32.totalorder %v598_v35, %v3933_v13  ;;  %vm663_vm5 = vcmp.eq.s32.totalorder %v598_v35, %v3935_v14 }
 0x256   : > { %6939 = vst [vmem:[#allocation57_spill] sm:$0xff] %v4366_v54  ;;  %v726_v51 = vsel %vm662_vm4, 0.0, %v6925_v43  ;;  %v727_v57 = vsel %vm663_vm5, 0.0, %v6925_v43  ;;  %v6744_v54 = vand.u32 15, %v4422_v37 }
 0x258   : > { %v568_v11 = vshra.s32 %v6744_v54, 3  ;;  %v4467_v54 = vadd.s32 224, %v3881_v39 }
 0x25a   : > { %v1415_v16 = vpop.f32.mrf.mxu2  ;;  %v1528_v63 = vpop.f32.mrf.mxu3  ;;  %v600_v58 = vadd.s32 %v568_v11, %v536_v49  ;;  %6949 = vst [vmem:[#allocation67_spill] sm:$0xff] %v4467_v54  ;;  %v4473_v11 = vadd.s32 232, %v3881_v39  ;;  %v569_v49 = vshra.s32 %v6953_v46, 3 }
 0x25b   : > { %v4376_v27 = vadd.f32 %v1415_v16, %v724_v48  ;;  %v4378_v40 = vadd.f32 %v1528_v63, %v725_v47 }
 0x25c   : > { %6950 = vst [vmem:[#allocation68_spill] sm:$0xff] %v4473_v11  ;;  %vm666_vm8 = vcmp.eq.s32.totalorder %v600_v58, %v3933_v13  ;;  %vm667_vm9 = vcmp.eq.s32.totalorder %v600_v58, %v3935_v14 }
 0x262   : > { %v1418_v53 = vpop.f32.mrf.mxu2  ;;  %v1531_v30 = vpop.f32.mrf.mxu3 }
 0x263   : > { %v4388_v48 = vadd.f32 %v1418_v53, %v726_v51  ;;  %v4390_v47 = vadd.f32 %v1531_v30, %v727_v57 }
 0x265   : > { %6940 = vst [vmem:[#allocation58_spill] sm:$0xff] %v4388_v48  ;;  %v4393_v16 = vmax.f32 %v1583_v32, %v4388_v48  ;;  %v4396_v63 = vmax.f32 %v1620_v41, %v4390_v47  ;;  %v4415_v32 = vadd.s32 168, %v3881_v39 }
 0x266   : > { %6941 = vst [vmem:[#allocation59_spill] sm:$0xff] %v4390_v47 }
 0x267   : > { %6942 = vst [vmem:[#allocation60_spill] sm:$0xff] %v4415_v32  ;;  %v6727_v7 = vshra.s32 %v4415_v32, 4  ;;  %v6735_v6 = vand.u32 15, %v4415_v32  ;;  %v4453_v32 = vadd.s32 208, %v3881_v39 }
 0x269   : > { %v503_v44 = vshra.s32 %v6727_v7, 3  ;;  %v567_v60 = vshra.s32 %v6735_v6, 3  ;;  %v4445_v7 = vadd.s32 200, %v3881_v39  ;;  %6947 = vst [vmem:[#allocation65_spill] sm:$0xff] %v4453_v32  ;;  %v6957_v23 = vshra.s32 %v4453_v32, 4 }
 0x26a   : > { %v4398_v55 = vpop.f32.mrf.mxu2  ;;  %v4400_v31 = vpop.f32.mrf.mxu3 }
 0x26b   : > { %v535_v4 = vmul.u32 2, %v503_v44  ;;  %6946 = vst [vmem:[#allocation64_spill] sm:$0xff] %v4445_v7  ;;  %v6750_v44 = vshra.s32 %v4442_v62, 4  ;;  %v6956_v48 = vand.u32 15, %v4445_v7  ;;  %v508_v46 = vshra.s32 %v6957_v23, 3 }
 0x26d   : > { %v599_v12 = vadd.s32 %v567_v60, %v535_v4  ;;  %v505_v4 = vshra.s32 %v6748_v8, 3  ;;  %v506_v37 = vshra.s32 %v6750_v44, 3  ;;  %v6951_v60 = vshra.s32 %v4445_v7, 4 }
 0x26e   : > { %v4484_v44 = vadd.s32 240, %v3881_v39  ;;  %v6954_v8 = vand.u32 15, %v4442_v62  ;;  %v571_v42 = vshra.s32 %v6956_v48, 3  ;;  %v6959_v62 = vshra.s32 %v4467_v54, 4 }
 0x26f   : > { %vm664_vm6 = vcmp.eq.s32.totalorder %v599_v12, %v3933_v13  ;;  %vm665_vm7 = vcmp.eq.s32.totalorder %v599_v12, %v3935_v14  ;;  %v507_v21 = vshra.s32 %v6951_v60, 3  ;;  %v537_v17 = vmul.u32 2, %v505_v4 }
 0x270   : > { %v728_v52 = vsel %vm664_vm6, 0.0, %v6925_v43  ;;  %6952 = vst [vmem:[#allocation69_spill] sm:$0xff] %v4484_v44  ;;  %v538_v60 = vmul.u32 2, %v506_v37  ;;  %v570_v61 = vshra.s32 %v6954_v8, 3  ;;  %v729_v8 = vsel %vm665_vm7, 0.0, %v6925_v43 }
 0x271   : > { %v539_v6 = vmul.u32 2, %v507_v21  ;;  %v6958_v21 = vshra.s32 %v4460_v10, 4  ;;  %v730_v4 = vsel %vm666_vm8, 0.0, %v6925_v43  ;;  %v601_v23 = vadd.s32 %v569_v49, %v537_v17 }
 0x272   : > { %v4402_v35 = vpop.f32.mrf.mxu2  ;;  %v4404_v9 = vpop.f32.mrf.mxu3  ;;  %v510_v39 = vshra.s32 %v6959_v62, 3  ;;  %v731_v12 = vsel %vm667_vm9, 0.0, %v6925_v43  ;;  %v6782_v48 = vshra.s32 %v4494_v36, 4  ;;  %v602_v25 = vadd.s32 %v570_v61, %v538_v60 }
 0x273   : > { %v509_v24 = vshra.s32 %v6958_v21, 3  ;;  %v6960_v21 = vshra.s32 %v4473_v11, 4  ;;  %v603_v20 = vadd.s32 %v571_v42, %v539_v6  ;;  %v540_v26 = vmul.u32 2, %v508_v46 }
 0x274   : > { %v6961_v17 = vand.u32 15, %v4453_v32  ;;  %v6962_v62 = vand.u32 15, %v4460_v10  ;;  %v6785_v58 = vand.u32 15, %v4484_v44  ;;  %v6963_v5 = vshra.s32 %v4484_v44, 4  ;;  %v7004_v10 = vld [vmem:[#allocation52_spill] sm:$0xff] }
 0x275   : > { %v511_v34 = vshra.s32 %v6960_v21, 3  ;;  %v541_v7 = vmul.u32 2, %v509_v24  ;;  %vm668_vm10 = vcmp.eq.s32.totalorder %v601_v23, %v3933_v13  ;;  %vm669_vm11 = vcmp.eq.s32.totalorder %v601_v23, %v3935_v14 }
 0x276   : > { %v572_v49 = vshra.s32 %v6961_v17, 3  ;;  %v573_v1 = vshra.s32 %v6962_v62, 3  ;;  %v512_v2 = vshra.s32 %v6963_v5, 3  ;;  %v542_v21 = vmul.u32 2, %v510_v39 }
 0x277   : > { %v6964_v6 = vand.u32 15, %v4467_v54  ;;  %v543_v42 = vmul.u32 2, %v511_v34  ;;  %v6965_v60 = vand.u32 15, %v4473_v11  ;;  %v513_v17 = vshra.s32 %v6782_v48, 3 }
 0x278   : > { %vm670_vm12 = vcmp.eq.s32.totalorder %v602_v25, %v3933_v13  ;;  %vm671_vm13 = vcmp.eq.s32.totalorder %v602_v25, %v3935_v14  ;;  %vm672_vm14 = vcmp.eq.s32.totalorder %v603_v20, %v3933_v13  ;;  %vm673_vm15 = vcmp.eq.s32.totalorder %v603_v20, %v3935_v14 }
 0x279   : > { %v574_v61 = vshra.s32 %v6964_v6, 3  ;;  %v575_v24 = vshra.s32 %v6965_v60, 3  ;;  %v604_v5 = vadd.s32 %v572_v49, %v540_v26  ;;  %v605_v62 = vadd.s32 %v573_v1, %v541_v7 }
 0x27a   : > { %v4406_v59 = vpop.f32.mrf.mxu2  ;;  %v4408_v51 = vpop.f32.mrf.mxu3  ;;  %v544_v6 = vmul.u32 2, %v512_v2  ;;  %v576_v60 = vshra.s32 %v6785_v58, 3  ;;  %v4550_v46 = vadd.f32 %v4398_v55, %v728_v52  ;;  %v4553_v48 = vadd.f32 %v4400_v31, %v729_v8 }
 0x27b   : > { %v732_v11 = vsel %vm668_vm10, 0.0, %v6925_v43  ;;  %v733_v7 = vsel %vm669_vm11, 0.0, %v6925_v43  ;;  %v606_v26 = vadd.s32 %v574_v61, %v542_v21  ;;  %v607_v1 = vadd.s32 %v575_v24, %v543_v42 }
 0x27c   : > { %v545_v2 = vmul.u32 2, %v513_v17  ;;  %v6966_v49 = vand.u32 15, %v4494_v36  ;;  %v734_v52 = vsel %vm670_vm12, 0.0, %v6925_v43  ;;  %v735_v55 = vsel %vm671_vm13, 0.0, %v6925_v43 }
 0x27d   : > { %v736_v31 = vsel %vm672_vm14, 0.0, %v6925_v43  ;;  %v737_v8 = vsel %vm673_vm15, 0.0, %v6925_v43  ;;  %vm674_vm3 = vcmp.eq.s32.totalorder %v604_v5, %v3933_v13  ;;  %vm675_vm4 = vcmp.eq.s32.totalorder %v604_v5, %v3935_v14 }
 0x27e   : > { %v577_v58 = vshra.s32 %v6966_v49, 3  ;;  %vm676_vm5 = vcmp.eq.s32.totalorder %v605_v62, %v3933_v13  ;;  %v608_v23 = vadd.s32 %v576_v60, %v544_v6  ;;  %v6967_v25 = vmax.f32 %v4352_v0, %v4376_v27 }
 0x27f   : > { %v6968_v61 = vmax.f32 %v4355_v45, %v4378_v40  ;;  %v4587_v20 = vadd.f32 %v4402_v35, %v730_v4  ;;  %vm677_vm6 = vcmp.eq.s32.totalorder %v605_v62, %v3935_v14  ;;  %v4591_v24 = vadd.f32 %v4406_v59, %v732_v11 }
 0x280   : > { %v1586_v21 = vmax.f32 %v6967_v25, %v4550_v46  ;;  %vm678_vm7 = vcmp.eq.s32.totalorder %v606_v26, %v3933_v13  ;;  %vm680_vm8 = vcmp.eq.s32.totalorder %v607_v1, %v3933_v13  ;;  %v609_v17 = vadd.s32 %v577_v58, %v545_v2 }
 0x281   : > { %v1623_v42 = vmax.f32 %v6968_v61, %v4553_v48  ;;  %v4596_v0 = vadd.f32 %v4404_v9, %v731_v12  ;;  %v738_v5 = vsel %vm674_vm3, 0.0, %v6925_v43  ;;  %v739_v45 = vsel %vm675_vm4, 0.0, %v6925_v43 }
 0x282   : > { %v4410_v57 = vpop.f32.mrf.mxu2  ;;  %v4412_v53 = vpop.f32.mrf.mxu3  ;;  %v740_v35 = vsel %vm676_vm5, 0.0, %v6925_v43  ;;  %vm679_vm9 = vcmp.eq.s32.totalorder %v606_v26, %v3935_v14  ;;  %vm682_vm10 = vcmp.eq.s32.totalorder %v608_v23, %v3933_v13  ;;  %v1587_v9 = vmax.f32 %v4393_v16, %v4587_v20 }
 0x283   : > { %v4602_v62 = vadd.f32 %v4410_v57, %v734_v52  ;;  %v741_v11 = vsel %vm677_vm6, 0.0, %v6925_v43  ;;  %v742_v12 = vsel %vm678_vm7, 0.0, %v6925_v43  ;;  %v744_v58 = vsel %vm680_vm8, 0.0, %v6925_v43 }
 0x284   : > { %v1588_v6 = vmax.f32 %v1586_v21, %v4591_v24  ;;  %vm684_vm11 = vcmp.eq.s32.totalorder %v609_v17, %v3933_v13  ;;  %v4623_v26 = vadd.f32 %v4408_v51, %v733_v7  ;;  %v743_v16 = vsel %vm679_vm9, 0.0, %v6925_v43 }
 0x285   : > { %vm681_vm12 = vcmp.eq.s32.totalorder %v607_v1, %v3935_v14  ;;  %v746_v2 = vsel %vm682_vm10, 0.0, %v6925_v43  ;;  %v1589_v49 = vmax.f32 %v1587_v9, %v4602_v62  ;;  %v4636_v13 = vadd.f32 %v4412_v53, %v735_v55 }
 0x286   : > { %vm683_vm13 = vcmp.eq.s32.totalorder %v608_v23, %v3935_v14  ;;  %v748_v7 = vsel %vm684_vm11, 0.0, %v6925_v43  ;;  %v745_v25 = vsel %vm681_vm12, 0.0, %v6925_v43  ;;  %v1625_v53 = vmax.f32 %v1623_v42, %v4623_v26 }
 0x287   : > { %v747_v61 = vsel %vm683_vm13, 0.0, %v6925_v43  ;;  %vm685_vm14 = vcmp.eq.s32.totalorder %v609_v17, %v3935_v14 }
 0x28a   : > { %v4417_v41 = vpop.f32.mrf.mxu2  ;;  %v4419_v30 = vpop.f32.mrf.mxu3 }
 0x28b   : > { %v4605_v59 = vadd.f32 %v4417_v41, %v736_v31  ;;  %v4639_v51 = vadd.f32 %v4419_v30, %v737_v8 }
 0x292   : > { %v4429_v33 = vpop.f32.mrf.mxu2  ;;  %v4431_v47 = vpop.f32.mrf.mxu3 }
 0x293   : > { %v4616_v57 = vadd.f32 %v4429_v33, %v738_v5  ;;  %v1590_v33 = vmax.f32 %v1588_v6, %v4605_v59  ;;  %v4652_v30 = vadd.f32 %v4431_v47, %v739_v45 }
 0x295   : > { %v1591_v1 = vmax.f32 %v1589_v49, %v4616_v57 }
 0x29a   : > { %v4455_v19 = vpop.f32.mrf.mxu2  ;;  %v4457_v29 = vpop.f32.mrf.mxu3 }
 0x29b   : > { %v4619_v41 = vadd.f32 %v4455_v19, %v740_v35  ;;  %v4655_v55 = vadd.f32 %v4457_v29, %v741_v11 }
 0x29d   : > { %v1592_v31 = vmax.f32 %v1590_v33, %v4619_v41 }
 0x2a2   : > { %v4501_v3 = vpop.f32.mrf.mxu2  ;;  %v4503_v37 = vpop.f32.mrf.mxu3 }
 0x2a3   : > { %v4631_v52 = vadd.f32 %v4501_v3, %v742_v12  ;;  %v4665_v42 = vadd.f32 %v4503_v37, %v743_v16 }
 0x2a5   : > { %v1593_v23 = vmax.f32 %v1591_v1, %v4631_v52 }
 0x2aa   : > { %v1445_v39 = vpop.f32.mrf.mxu2  ;;  %v4545_v34 = vpop.f32.mrf.mxu3 }
 0x2ab   : > { %v4633_v19 = vadd.f32 %v1445_v39, %v744_v58  ;;  %v1624_v39 = vmax.f32 %v4396_v63, %v4596_v0  ;;  %v1627_v63 = vmax.f32 %v1625_v53, %v4639_v51  ;;  %v4668_v47 = vadd.f32 %v4545_v34, %v745_v25 }
 0x2ac   : > { %v749_v58 = vsel %vm685_vm14, 0.0, %v6925_v43 }
 0x2ad   : > { %v1594_v21 = vmax.f32 %v1592_v31, %v4633_v19  ;;  %v1626_v35 = vmax.f32 %v1624_v39, %v4636_v13  ;;  %v1629_v9 = vmax.f32 %v1627_v63, %v4655_v55 }
 0x2af   : > { %v1631_v34 = vmax.f32 %v1629_v9, %v4668_v47 }
 0x2b2   : > { %v1448_v4 = vpop.f32.mrf.mxu2  ;;  %v1561_v60 = vpop.f32.mrf.mxu3 }
 0x2b3   : > { %v4646_v3 = vadd.f32 %v1448_v4, %v746_v2  ;;  %v1628_v4 = vmax.f32 %v1626_v35, %v4652_v30  ;;  %v4674_v11 = vadd.f32 %v1561_v60, %v747_v61 }
 0x2b5   : > { %v1595_v29 = vmax.f32 %v1593_v23, %v4646_v3  ;;  %v1630_v6 = vmax.f32 %v1628_v4, %v4665_v42 }
 0x2b7   : > { %v1632_v49 = vmax.f32 %v1630_v6, %v4674_v11 }
 0x2ba   : > { %v1451_v8 = vpop.f32.mrf.mxu2  ;;  %v1564_v37 = vpop.f32.mrf.mxu3 }
 0x2bb   : > { %v4660_v5 = vadd.f32 %v1451_v8, %v748_v7  ;;  %v4680_v16 = vadd.f32 %v1564_v37, %v749_v58  ;;  %v6976_v37 = vld [vmem:[#allocation56_spill] sm:$0xff] }
 0x2bd   : > { %v1596_v45 = vmax.f32 %v1594_v21, %v4660_v5  ;;  %v1633_v33 = vmax.f32 %v1631_v34, %v4680_v16 }
 0x2bf   : > { %v1597_v12 = vmax.f32 %v1595_v29, %v1596_v45  ;;  %v1634_v60 = vmax.f32 %v1632_v49, %v1633_v33  ;;  %v6997_v45 = vld [vmem:[#allocation31_spill] sm:$0xff] }
 0x2c1   : > { %v1598_v2 = vrot.slane %v1597_v12, 4  ;;  %v1635_v63 = vrot.slane %v1634_v60, 4 }
 0x2c3   : > { %v1599_v7 = vmax.f32 %v1597_v12, %v1598_v2  ;;  %v6977_v2 = vld [vmem:[#allocation58_spill] sm:$0xff] }
 0x2c5   : > { %v1600_v1 = vrot.slane %v1599_v7, 2 }
 0x2c7   : > { %v1601_v31 = vmax.f32 %v1599_v7, %v1600_v1  ;;  %v1636_v1 = vmax.f32 %v1634_v60, %v1635_v63 }
 0x2c9   : > { %v1602_v14 = vrot.slane %v1601_v31, 1  ;;  %v1637_v7 = vrot.slane %v1636_v1, 2 }
 0x2cb   : > { %v4684_v17 = vmax.f32 %v1601_v31, %v1602_v14  ;;  %v1638_v31 = vmax.f32 %v1636_v1, %v1637_v7 }
 0x2cd   : > { %v1641_v25 = vsub.f32 %v3964_v38, %v4684_v17  ;;  %v1643_v39 = vsub.f32 %v3998_v15, %v4684_v17  ;;  %v1645_v53 = vsub.f32 %v3968_v50, %v4684_v17  ;;  %v1647_v8 = vsub.f32 %v4002_v18, %v4684_v17  ;;  %v6969_v38 = vld [vmem:[#allocation21_spill] sm:$0xff]  ;;  %v6971_v50 = vld [vmem:[#allocation42_spill] sm:$0xff] }
 0x2ce   : > { %v1649_v23 = vsub.f32 %v4025_v56, %v4684_v17  ;;  %v1651_v21 = vsub.f32 %v4047_v28, %v4684_v17  ;;  %v1653_v61 = vsub.f32 %v4065_v22, %v4684_v17  ;;  %v1655_v35 = vsub.f32 %v6969_v38, %v4684_v17  ;;  %v6970_v15 = vld [vmem:[#allocation37_spill] sm:$0xff]  ;;  %v6973_v56 = vld [vmem:[#allocation48_spill] sm:$0xff]  ;;  %v6974_v28 = vld [vmem:[#allocation51_spill] sm:$0xff] }
 0x2cf   : > { %v6972_v18 = vld [vmem:[#allocation45_spill] sm:$0xff]  ;;  %v6975_v22 = vld [vmem:[#allocation54_spill] sm:$0xff]  ;;  %v1705_v49 = vmul.f32 1.442695, %v1641_v25  ;;  %v1709_v6 = vmul.f32 1.442695, %v1643_v39 }
 0x2d0   : > { %v1713_v58 = vmul.f32 1.442695, %v1645_v53  ;;  %v1717_v33 = vmul.f32 1.442695, %v1647_v8  ;;  %v1721_v60 = vmul.f32 1.442695, %v1649_v23 }
 0x2d1   : > { %3471 = vpow2.f32 %v1705_v49  ;;  %v1725_v63 = vmul.f32 1.442695, %v1651_v21  ;;  %v6980_v38 = vld [vmem:[#allocation32_spill] sm:$0xff]  ;;  %v1729_v25 = vmul.f32 1.442695, %v1653_v61  ;;  %v6981_v39 = vld [vmem:[#allocation39_spill] sm:$0xff] }
 0x2d2   : > { %3473 = vpow2.f32 %v1709_v6  ;;  %v1657_v9 = vsub.f32 %v6980_v38, %v4684_v17  ;;  %v1659_v53 = vsub.f32 %v6981_v39, %v4684_v17  ;;  %v1733_v23 = vmul.f32 1.442695, %v1655_v35  ;;  %v6983_v6 = vld [vmem:[#allocation34_spill] sm:$0xff]  ;;  %v6985_v38 = vld [vmem:[#allocation40_spill] sm:$0xff] }
 0x2d3   : > { %3475 = vpow2.f32 %v1713_v58  ;;  %v1639_v21 = vrot.slane %v1638_v31, 1  ;;  %v1661_v49 = vsub.f32 %v6983_v6, %v4684_v17  ;;  %v6987_v35 = vld [vmem:[#allocation12_spill] sm:$0xff] }
 0x2d4   : > { %3477 = vpow2.f32 %v1717_v33  ;;  %v1737_v61 = vmul.f32 1.442695, %v1657_v9  ;;  %v1741_v39 = vmul.f32 1.442695, %v1659_v53 }
 0x2d5   : > { %3479 = vpow2.f32 %v1721_v60  ;;  %v4749_v1 = vmax.f32 %v1638_v31, %v1639_v21  ;;  %v1663_v60 = vsub.f32 %v6985_v38, %v4684_v17  ;;  %v1745_v31 = vmul.f32 1.442695, %v1661_v49  ;;  %v6990_v38 = vld [vmem:[#allocation16_spill] sm:$0xff]  ;;  %v7000_v49 = vld [vmem:[#allocation43_spill] sm:$0xff] }
 0x2d6   : > { %3481 = vpow2.f32 %v1725_v63 }
 0x2d7   : > { %v4732_v12 = vpop.eup %3471  ;;  %3483 = vpow2.f32 %v1729_v25  ;;  %v1642_v6 = vsub.f32 %v6987_v35, %v4749_v1  ;;  %v6989_v25 = vld [vmem:[#allocation13_spill] sm:$0xff]  ;;  %v1648_v53 = vsub.f32 %v6990_v38, %v4749_v1  ;;  %v1749_v38 = vmul.f32 1.442695, %v1663_v60 }
 0x2d8   : > { %6978 = vst [vmem:[#allocation21_spill] sm:$0xff] %v4732_v12  ;;  %v4734_v14 = vpop.eup %3473  ;;  %3485 = vpow2.f32 %v1733_v23  ;;  %v1646_v9 = vsub.f32 %v6989_v25, %v4749_v1  ;;  %v6993_v23 = vld [vmem:[#allocation19_spill] sm:$0xff]  ;;  %v6995_v25 = vld [vmem:[#allocation22_spill] sm:$0xff]  ;;  %v6999_v35 = vsub.f32 %v6970_v15, %v4684_v17  ;;  %v7003_v60 = vld [vmem:[#allocation49_spill] sm:$0xff] }
 0x2d9   : > { %6979 = vst [vmem:[#allocation37_spill] sm:$0xff] %v4734_v14  ;;  %v1833_v8 = vadd.f32 %v4734_v14, %v4732_v12  ;;  %v4742_v58 = vpop.eup %3475  ;;  %3487 = vpow2.f32 %v1737_v61  ;;  %v6998_v61 = vld [vmem:[#allocation38_spill] sm:$0xff]  ;;  %v7005_v15 = vld [vmem:[#allocation55_spill] sm:$0xff] }
 0x2da   : > { %6982 = vst [vmem:[#allocation42_spill] sm:$0xff] %v4742_v58  ;;  %v4747_v7 = vpop.eup %3477  ;;  %3489 = vpow2.f32 %v1741_v39  ;;  %v1753_v32 = vmul.f32 1.442695, %v6999_v35  ;;  %v7008_v14 = vld [vmem:[#allocation59_spill] sm:$0xff] }
 0x2db   : > { %v1834_v33 = vadd.f32 %v4742_v58, %v1833_v8  ;;  %6984 = vst [vmem:[#allocation45_spill] sm:$0xff] %v4747_v7  ;;  %v4754_v63 = vpop.eup %3479  ;;  %v6988_v8 = vld [vmem:[#allocation15_spill] sm:$0xff]  ;;  %3491 = vpow2.f32 %v1745_v31  ;;  %v7006_v58 = vld [vmem:[#allocation57_spill] sm:$0xff]  ;;  %v7007_v31 = vsub.f32 %v6971_v50, %v4684_v17  ;;  %v7010_v50 = vsub.f32 %v6973_v56, %v4684_v17 }
 0x2dc   : > { %6986 = vst [vmem:[#allocation48_spill] sm:$0xff] %v4754_v63  ;;  %v1644_v4 = vsub.f32 %v6988_v8, %v4749_v1  ;;  %v4767_v29 = vpop.eup %3481  ;;  %v6994_v8 = vld [vmem:[#allocation20_spill] sm:$0xff]  ;;  %3493 = vpow2.f32 %v1749_v38 }
 0x2dd   : > { %v1835_v34 = vadd.f32 %v4747_v7, %v1834_v33  ;;  %v6991_v33 = vld [vmem:[#allocation18_spill] sm:$0xff]  ;;  %6992 = vst [vmem:[#allocation51_spill] sm:$0xff] %v4767_v29  ;;  %v4776_v44 = vpop.eup %3483  ;;  %v1757_v54 = vmul.f32 1.442695, %v7007_v31  ;;  %3495 = vpow2.f32 %v1753_v32  ;;  %v1765_v38 = vmul.f32 1.442695, %v7010_v50 }
 0x2de   : > { %6996 = vst [vmem:[#allocation54_spill] sm:$0xff] %v4776_v44  ;;  %v4790_v39 = vpop.eup %3485  ;;  %v7011_v32 = vsub.f32 %v6974_v28, %v4684_v17  ;;  %v7013_v28 = vsub.f32 %v6976_v37, %v4684_v17  ;;  %v1719_v37 = vmul.f32 1.442695, %v1648_v53  ;;  %v1687_v53 = vsub.f32 %v4591_v24, %v4684_v17 }
 0x2df   : > { %v1836_v21 = vadd.f32 %v4754_v63, %v1835_v34  ;;  %7002 = vst [vmem:[#allocation56_spill] sm:$0xff] %v4790_v39  ;;  %v4803_v7 = vpop.eup %3487  ;;  %3497 = vpow2.f32 %v1757_v54  ;;  %v7012_v54 = vsub.f32 %v6975_v22, %v4684_v17  ;;  %v1707_v63 = vmul.f32 1.442695, %v1642_v6 }
 0x2e0   : > { %v1683_v22 = vsub.f32 %v4550_v46, %v4684_v17  ;;  %v7014_v6 = vsub.f32 %v4376_v27, %v4684_v17  ;;  %v7016_v27 = vsub.f32 %v6991_v33, %v4749_v1  ;;  %v1689_v33 = vsub.f32 %v4602_v62, %v4684_v17 }
 0x2e1   : > { %v1837_v34 = vadd.f32 %v4767_v29, %v1836_v21  ;;  %v7001_v21 = vld [vmem:[#allocation46_spill] sm:$0xff]  ;;  %v4811_v29 = vpop.eup %3489  ;;  %v1773_v56 = vmul.f32 1.442695, %v7012_v54  ;;  %v1797_v62 = vmul.f32 1.442695, %v1687_v53 }
 0x2e3   : > { %v1838_v36 = vadd.f32 %v4776_v44, %v1837_v34  ;;  %v4817_v44 = vpop.eup %3491 }
 0x2e5   : > { %v1839_v34 = vadd.f32 %v4790_v39, %v1838_v36  ;;  %v7009_v36 = vsub.f32 %v6972_v18, %v4684_v17  ;;  %v1769_v18 = vmul.f32 1.442695, %v7011_v32  ;;  %v1777_v32 = vmul.f32 1.442695, %v7013_v28 }
 0x2e6   : > { %v7017_v28 = vsub.f32 %v6993_v23, %v4749_v1  ;;  %v7021_v23 = vsub.f32 %v6994_v8, %v4749_v1 }
 0x2e7   : > { %v1840_v35 = vadd.f32 %v4803_v7, %v1839_v34  ;;  %v1761_v43 = vmul.f32 1.442695, %v7009_v36  ;;  %v1711_v34 = vmul.f32 1.442695, %v1644_v4 }
 0x2e9   : > { %v1841_v12 = vadd.f32 %v4811_v29, %v1840_v35  ;;  %v4830_v35 = vpop.eup %3493  ;;  %3499 = vpow2.f32 %v1761_v43  ;;  %v1715_v43 = vmul.f32 1.442695, %v1646_v9  ;;  %v7015_v9 = vsub.f32 %v6977_v2, %v4684_v17 }
 0x2ea   : > { %v4836_v31 = vpop.eup %3495  ;;  %3501 = vpow2.f32 %v1765_v38 }
 0x2eb   : > { %v1842_v36 = vadd.f32 %v4817_v44, %v1841_v12  ;;  %3503 = vpow2.f32 %v1769_v18  ;;  %v4842_v39 = vpop.eup %3497  ;;  %v1685_v18 = vsub.f32 %v4587_v20, %v4684_v17  ;;  %v1785_v54 = vmul.f32 1.442695, %v7015_v9 }
 0x2ec   : > { %3505 = vpow2.f32 %v1773_v56  ;;  %v1789_v20 = vmul.f32 1.442695, %v1683_v22  ;;  %v1691_v22 = vsub.f32 %v4605_v59, %v4684_v17  ;;  %v7023_v59 = vld [vmem:[#allocation29_spill] sm:$0xff] }
 0x2ed   : > { %v1843_v50 = vadd.f32 %v4830_v35, %v1842_v36  ;;  %v1781_v36 = vmul.f32 1.442695, %v7014_v6  ;;  %3507 = vpow2.f32 %v1707_v63  ;;  %v1723_v63 = vmul.f32 1.442695, %v7016_v27 }
 0x2ee   : > { %3509 = vpow2.f32 %v1711_v34  ;;  %v1660_v27 = vsub.f32 %v7023_v59, %v4749_v1 }
 0x2ef   : > { %v1844_v12 = vadd.f32 %v4836_v31, %v1843_v50  ;;  %v4850_v38 = vpop.eup %3499  ;;  %3511 = vpow2.f32 %v1777_v32  ;;  %v1727_v32 = vmul.f32 1.442695, %v7017_v28 }
 0x2f0   : > { %v4858_v56 = vpop.eup %3501  ;;  %3513 = vpow2.f32 %v1715_v43  ;;  %v1793_v43 = vmul.f32 1.442695, %v1685_v18 }
 0x2f1   : > { %v1845_v4 = vadd.f32 %v4842_v39, %v1844_v12  ;;  %v4863_v50 = vpop.eup %3503  ;;  %3515 = vpow2.f32 %v1781_v36  ;;  %v7020_v36 = vld [vmem:[#allocation33_spill] sm:$0xff] }
 0x2f2   : > { %v4868_v2 = vpop.eup %3505  ;;  %3517 = vpow2.f32 %v1719_v37  ;;  %v1731_v37 = vmul.f32 1.442695, %v7021_v23 }
 0x2f3   : > { %v1846_v46 = vadd.f32 %v4850_v38, %v1845_v4  ;;  %v4873_v12 = vpop.eup %3507  ;;  %3519 = vpow2.f32 %v1785_v54  ;;  %v1658_v4 = vsub.f32 %v7020_v36, %v4749_v1  ;;  %v7025_v36 = vld [vmem:[#allocation35_spill] sm:$0xff] }
 0x2f4   : > { %7018 = vst [vmem:[#allocation58_spill] sm:$0xff] %v4873_v12  ;;  %v4878_v6 = vpop.eup %3509  ;;  %3521 = vpow2.f32 %v1723_v63  ;;  %v7024_v63 = vsub.f32 %v6995_v25, %v4749_v1  ;;  %v1662_v23 = vsub.f32 %v7025_v36, %v4749_v1  ;;  %v1805_v25 = vmul.f32 1.442695, %v1691_v22 }
 0x2f5   : > { %v1847_v34 = vadd.f32 %v4858_v56, %v1846_v46  ;;  %7019 = vst [vmem:[#allocation32_spill] sm:$0xff] %v4878_v6  ;;  %v4887_v9 = vpop.eup %3511  ;;  %3523 = vpow2.f32 %v1789_v20  ;;  %v1870_v54 = vadd.f32 %v4878_v6, %v4873_v12  ;;  %v1801_v20 = vmul.f32 1.442695, %v1689_v33 }
 0x2f6   : > { %v4892_v46 = vpop.eup %3513  ;;  %3525 = vpow2.f32 %v1727_v32  ;;  %v1735_v8 = vmul.f32 1.442695, %v7024_v63  ;;  %v1739_v59 = vmul.f32 1.442695, %v1658_v4  ;;  %v7026_v36 = vsub.f32 %v4616_v57, %v4684_v17 }
 0x2f7   : > { %v1848_v24 = vadd.f32 %v4863_v50, %v1847_v34  ;;  %7022 = vst [vmem:[#allocation39_spill] sm:$0xff] %v4892_v46  ;;  %v4899_v34 = vpop.eup %3515  ;;  %3527 = vpow2.f32 %v1793_v43  ;;  %v1871_v28 = vadd.f32 %v4892_v46, %v1870_v54 }
 0x2f8   : > { %3529 = vpow2.f32 %v1731_v37  ;;  %v1809_v37 = vmul.f32 1.442695, %v7026_v36 }
 0x2f9   : > { %v1849_v18 = vadd.f32 %v4868_v2, %v1848_v24  ;;  %v4903_v24 = vpop.eup %3517  ;;  %3531 = vpow2.f32 %v1797_v62 }
 0x2fa   : > { %v4907_v32 = vpop.eup %3519  ;;  %v1872_v43 = vadd.f32 %v4903_v24, %v1871_v28  ;;  %3533 = vpow2.f32 %v1735_v8 }
 0x2fb   : > { %v1850_v53 = vadd.f32 %v4887_v9, %v1849_v18  ;;  %v4911_v33 = vpop.eup %3521  ;;  %v1743_v18 = vmul.f32 1.442695, %v1660_v27  ;;  %3535 = vpow2.f32 %v1801_v20  ;;  %v7027_v27 = vsub.f32 %v4619_v41, %v4684_v17 }
 0x2fc   : > { %v4913_v54 = vpop.eup %3523  ;;  %v1873_v62 = vadd.f32 %v4911_v33, %v1872_v43  ;;  %3537 = vpow2.f32 %v1739_v59 }
 0x2fd   : > { %v1851_v63 = vadd.f32 %v4899_v34, %v1850_v53  ;;  %v4920_v22 = vpop.eup %3525  ;;  %v1747_v53 = vmul.f32 1.442695, %v1662_v23  ;;  %3539 = vpow2.f32 %v1805_v25  ;;  %v1813_v8 = vmul.f32 1.442695, %v7027_v27 }
 0x2fe   : > { %v4922_v28 = vpop.eup %3527  ;;  %v1874_v57 = vadd.f32 %v4920_v22, %v1873_v62  ;;  %3541 = vpow2.f32 %v1743_v18  ;;  %v7029_v23 = vsub.f32 %v4631_v52, %v4684_v17  ;;  %v7030_v18 = vsub.f32 %v6998_v61, %v4749_v1 }
 0x2ff   : > { %v1852_v4 = vadd.f32 %v4907_v32, %v1851_v63  ;;  %v4929_v36 = vpop.eup %3529  ;;  %v7028_v63 = vsub.f32 %v6997_v45, %v4749_v1  ;;  %3543 = vpow2.f32 %v1809_v37  ;;  %v7031_v37 = vsub.f32 %v4633_v19, %v4684_v17 }
 0x300   : > { %v4934_v59 = vpop.eup %3531  ;;  %v1817_v25 = vmul.f32 1.442695, %v7029_v23  ;;  %3545 = vpow2.f32 %v1747_v53  ;;  %v1755_v62 = vmul.f32 1.442695, %v7030_v18  ;;  %v7032_v53 = vsub.f32 %v7000_v49, %v4749_v1 }
 0x301   : > { %v1853_v20 = vadd.f32 %v4913_v54, %v1852_v4  ;;  %v1751_v43 = vmul.f32 1.442695, %v7028_v63  ;;  %v1875_v4 = vadd.f32 %v4929_v36, %v1874_v57  ;;  %v4941_v27 = vpop.eup %3533  ;;  %3547 = vpow2.f32 %v1813_v8 }
 0x302   : > { %v4946_v45 = vpop.eup %3535  ;;  %v1821_v63 = vmul.f32 1.442695, %v7031_v37  ;;  %v1759_v57 = vmul.f32 1.442695, %v7032_v53  ;;  %v7033_v8 = vsub.f32 %v4646_v3, %v4684_v17 }
 0x303   : > { %v1854_v41 = vadd.f32 %v4922_v28, %v1853_v20  ;;  %v1876_v20 = vadd.f32 %v4941_v27, %v1875_v4  ;;  %v4953_v23 = vpop.eup %3537  ;;  %3549 = vpow2.f32 %v1751_v43  ;;  %v7034_v43 = vsub.f32 %v7001_v21, %v4749_v1 }
 0x304   : > { %v4958_v61 = vpop.eup %3539  ;;  %3551 = vpow2.f32 %v1817_v25  ;;  %v1825_v18 = vmul.f32 1.442695, %v7033_v8  ;;  %v7035_v25 = vsub.f32 %v4660_v5, %v4684_v17  ;;  %v7037_v17 = vsub.f32 %v7004_v10, %v4749_v1 }
 0x305   : > { %v1855_v52 = vadd.f32 %v4934_v59, %v1854_v41  ;;  %v1877_v41 = vadd.f32 %v4953_v23, %v1876_v20  ;;  %v4965_v37 = vpop.eup %3541  ;;  %3553 = vpow2.f32 %v1755_v62  ;;  %v1763_v4 = vmul.f32 1.442695, %v7034_v43 }
 0x306   : > { %v4970_v49 = vpop.eup %3543  ;;  %3555 = vpow2.f32 %v1821_v63  ;;  %v1829_v53 = vmul.f32 1.442695, %v7035_v25  ;;  %v7036_v62 = vsub.f32 %v7003_v60, %v4749_v1 }
 0x307   : > { %v1856_v19 = vadd.f32 %v4946_v45, %v1855_v52  ;;  %v1878_v52 = vadd.f32 %v4965_v37, %v1877_v41  ;;  %v4977_v8 = vpop.eup %3545  ;;  %3557 = vpow2.f32 %v1759_v57 }
 0x308   : > { %v1767_v20 = vmul.f32 1.442695, %v7036_v62  ;;  %v4982_v21 = vpop.eup %3547  ;;  %3559 = vpow2.f32 %v1825_v18  ;;  %v7038_v18 = vsub.f32 %v7005_v15, %v4749_v1 }
 0x309   : > { %v1857_v3 = vadd.f32 %v4958_v61, %v1856_v19  ;;  %v1879_v43 = vadd.f32 %v4977_v8, %v1878_v52  ;;  %v4986_v5 = vpop.eup %3549  ;;  %3561 = vpow2.f32 %v1763_v4  ;;  %v1771_v19 = vmul.f32 1.442695, %v7037_v17 }
 0x30a   : > { %v4991_v41 = vpop.eup %3551  ;;  %3563 = vpow2.f32 %v1829_v53  ;;  %v7039_v53 = vsub.f32 %v7006_v58, %v4749_v1  ;;  %v1684_v58 = vsub.f32 %v4553_v48, %v4749_v1 }
 0x30b   : > { %v1858_v63 = vadd.f32 %v4970_v49, %v1857_v3  ;;  %v1880_v57 = vadd.f32 %v4986_v5, %v1879_v43  ;;  %v4995_v25 = vpop.eup %3553  ;;  %3565 = vpow2.f32 %v1767_v20  ;;  %v1775_v3 = vmul.f32 1.442695, %v7038_v18  ;;  %v5012_v20 = vld [vmem:[%s6610_s6] sm:$0xf] }
 0x30c   : > { %v5000_v52 = vpop.eup %3555  ;;  %3567 = vpow2.f32 %v1771_v19  ;;  %7040 = vst [vmem:[#allocation34_spill] sm:$0xff] %v5012_v20  ;;  %3305 = vmatmul.msk.f32.vlgmr.msrb.gmra.mxu0 %vm1027_vm0, %v5012_v20  ;;  %3306 = vmatmul.msk.f32.vlgmr.msrb.gmra.mxu1 %vm1027_vm0, %v5012_v20  ;;  %v7042_v20 = vsub.f32 %v7008_v14, %v4749_v1 }
 0x30d   : > { %v1859_v60 = vadd.f32 %v4982_v21, %v1858_v63  ;;  %v1881_v10 = vadd.f32 %v4995_v25, %v1880_v57  ;;  %v5004_v62 = vpop.eup %3557  ;;  %v1779_v63 = vmul.f32 1.442695, %v7039_v53  ;;  %3569 = vpow2.f32 %v1775_v3 }
 0x30e   : > { %v5014_v15 = vpop.eup %3559  ;;  %v1787_v12 = vmul.f32 1.442695, %v7042_v20  ;;  %v1686_v3 = vsub.f32 %v4596_v0, %v4749_v1  ;;  %v1690_v20 = vsub.f32 %v4636_v13, %v4749_v1 }
 0x30f   : > { %v1860_v4 = vadd.f32 %v4991_v41, %v1859_v60  ;;  %v1882_v17 = vadd.f32 %v5004_v62, %v1881_v10  ;;  %v5022_v19 = vpop.eup %3561  ;;  %v7041_v60 = vsub.f32 %v4378_v40, %v4749_v1  ;;  %3571 = vpow2.f32 %v1779_v63 }
 0x310   : > { %v5029_v18 = vpop.eup %3563  ;;  %v1795_v0 = vmul.f32 1.442695, %v1686_v3  ;;  %v1803_v13 = vmul.f32 1.442695, %v1690_v20 }
 0x311   : > { %v1861_v43 = vadd.f32 %v5000_v52, %v1860_v4  ;;  %v1783_v57 = vmul.f32 1.442695, %v7041_v60  ;;  %v1883_v10 = vadd.f32 %v5022_v19, %v1882_v17  ;;  %v5033_v53 = vpop.eup %3565  ;;  %v1688_v17 = vsub.f32 %v4623_v26, %v4749_v1 }
 0x312   : > { %v5042_v60 = vpop.eup %3567 }
 0x313   : > { %v1862_v4 = vadd.f32 %v5014_v15, %v1861_v43  ;;  %v1884_v40 = vadd.f32 %v5033_v53, %v1883_v10  ;;  %7043 = vst [vmem:[#allocation40_spill] sm:$0xff] %v5042_v60  ;;  %3573 = vpow2.f32 %v1783_v57  ;;  %v1791_v43 = vmul.f32 1.442695, %v1684_v58  ;;  %v5047_v46 = vpop.eup %3569 }
 0x314   : > { %7044 = vst [vmem:[#allocation12_spill] sm:$0xff] %v5047_v46  ;;  %3575 = vpow2.f32 %v1787_v12  ;;  %v1692_v58 = vsub.f32 %v4639_v51, %v4749_v1  ;;  %v1799_v26 = vmul.f32 1.442695, %v1688_v17  ;;  %v1694_v12 = vsub.f32 %v4652_v30, %v4749_v1 }
 0x315   : > { %v1863_v48 = vadd.f32 %v5029_v18, %v1862_v4  ;;  %v1885_v63 = vadd.f32 %v5042_v60, %v1884_v40  ;;  %v5052_v10 = vpop.eup %3571  ;;  %3577 = vpow2.f32 %v1791_v43  ;;  %v1696_v51 = vsub.f32 %v4655_v55, %v4749_v1 }
 0x316   : > { %3579 = vpow2.f32 %v1795_v0  ;;  %v1698_v30 = vsub.f32 %v4665_v42, %v4749_v1  ;;  %v1811_v20 = vmul.f32 1.442695, %v1694_v12  ;;  %v1700_v55 = vsub.f32 %v4668_v47, %v4749_v1 }
 0x317   : > { %v1864_v6 = vrot.slane %v1863_v48, 4  ;;  %v1886_v4 = vadd.f32 %v5047_v46, %v1885_v63  ;;  %v1807_v63 = vmul.f32 1.442695, %v1692_v58  ;;  %3581 = vpow2.f32 %v1799_v26 }
 0x318   : > { %3583 = vpow2.f32 %v1803_v13  ;;  %v1815_v58 = vmul.f32 1.442695, %v1696_v51  ;;  %v1823_v12 = vmul.f32 1.442695, %v1700_v55  ;;  %v7045_v47 = vsub.f32 %v4674_v11, %v4749_v1  ;;  %v1019_v55 = vld [vmem:[%s6611_s7] sm:$0xf] }
 0x319   : > { %v1865_v14 = vadd.f32 %v1864_v6, %v1863_v48  ;;  %v1887_v40 = vadd.f32 %v5052_v10, %v1886_v4  ;;  %v5057_v60 = vpop.eup %3573  ;;  %3585 = vpow2.f32 %v1807_v63  ;;  %1125 = vperm.xlu2 %3470, %v1019_v55  }
 0x31a   : > { %v5062_v3 = vpop.eup %3575  ;;  %v1827_v63 = vmul.f32 1.442695, %v7045_v47 }
 0x31b   : > { %v1866_v57 = vrot.slane %v1865_v14, 2  ;;  %v1888_v48 = vadd.f32 %v5057_v60, %v1887_v40  ;;  %v5067_v17 = vpop.eup %3577  ;;  %v1819_v40 = vmul.f32 1.442695, %v1698_v30 }
 0x31c   : > { %v5072_v4 = vpop.eup %3579 }
 0x31d   : > { %v1867_v6 = vadd.f32 %v1866_v57, %v1865_v14  ;;  %v1889_v43 = vadd.f32 %v5062_v3, %v1888_v48  ;;  %v5077_v26 = vpop.eup %3581 }
 0x31f   : > { %v1868_v46 = vrot.slane %v1867_v6, 1  ;;  %v1890_v0 = vadd.f32 %v5067_v17, %v1889_v43 }
 0x321   : > { %v1869_v14 = vadd.f32 %v1868_v46, %v1867_v6  ;;  %v1891_v57 = vadd.f32 %v5072_v4, %v1890_v0  ;;  %v5080_v46 = vpop.eup %3583 }
 0x322   : > { %v5082_v6 = vpop.eup %3585 }
 0x323   : > { %3587 = vrcp.f32 %v1869_v14  ;;  %v1892_v42 = vadd.f32 %v5077_v26, %v1891_v57  ;;  %vm1912_vm3 = vweird.f32 %v1869_v14 }
 0x324   : > { %3589 = vpow2.f32 %v1811_v20  ;;  %v7046_v20 = vsub.f32 %v4680_v16, %v4749_v1 }
 0x325   : > { %3591 = vpow2.f32 %v1815_v58  ;;  %v1893_v13 = vadd.f32 %v5080_v46, %v1892_v42 }
 0x326   : > { %3593 = vpow2.f32 %v1819_v40  ;;  %v1831_v0 = vmul.f32 1.442695, %v7046_v20  ;;  %v1918_v40 = vand.u32 2147483648, %v1869_v14 }
 0x327   : > { %v1894_v43 = vadd.f32 %v5082_v6, %v1893_v13  ;;  %3595 = vpow2.f32 %v1823_v12  ;;  %v1916_v13 = vand.u32 2147483647, %v1869_v14 }
 0x328   : > { %3597 = vpow2.f32 %v1827_v63 }
 0x329   : > { %v3588_v48 = vpop.eup %3587  ;;  %3599 = vpow2.f32 %v1831_v0  ;;  %vm1917_vm5 = vcmp.eq.f32.partialorder %v1916_v13, 8.507059e+37 }
 0x32a   : > { %v1908_v51 = vmul.f32 %v3588_v48, %v1869_v14  ;;  %v5089_v30 = vpop.eup %3589  ;;  %vm1913_vm15 = vweird.f32 %v3588_v48 }
 0x32b   : > { %v1895_v57 = vadd.f32 %v5089_v30, %v1894_v43  ;;  %v5098_v11 = vpop.eup %3591  ;;  %vm1914_vm4 = vmor %vm1912_vm3, %vm1913_vm15  ;;  %v1919_v43 = vor.u32 1.1754944e-38, %v1918_v40 }
 0x32c   : > { %v1909_v58 = vsub.f32 1.0, %v1908_v51  ;;  %v5101_v47 = vpop.eup %3593 }
 0x32d   : > { %v1896_v12 = vadd.f32 %v5098_v11, %v1895_v57  ;;  %v5104_v51 = vpop.eup %3595  ;;  %v1021_v57 = vld [vmem:[%s6613_s9] sm:$0xff] }
 0x32e   : > { %v1910_v42 = vmul.f32 %v3588_v48, %v1909_v58  ;;  %v3598_v55 = vpop.eup %3597  ;;  %2081 = vperm.xlu2 %3470, %v1021_v57  }
 0x32f   : > { %v1897_v1 = vadd.f32 %v5101_v47, %v1896_v12 }
 0x330   : > { %v1911_v16 = vadd.f32 %v3588_v48, %v1910_v42  ;;  %v3600_v42 = vpop.eup %3599 }
 0x331   : > { %v1898_v63 = vadd.f32 %v5104_v51, %v1897_v1 }
 0x332   : > { %v1915_v20 = vsel %vm1914_vm4, %v3588_v48, %v1911_v16 }
 0x333   : > { %v5107_v58 = vsel %vm1917_vm5, %v1919_v43, %v1915_v20  ;;  %v1899_v0 = vadd.f32 %v3598_v55, %v1898_v63 }
 0x334   : > { %v1965_v14 = vmul.f32 %v4858_v56, %v5107_v58  ;;  %v1997_v48 = vmul.f32 %v5029_v18, %v5107_v58  ;;  %v1963_v13 = vmul.f32 %v4850_v38, %v5107_v58  ;;  %v1995_v1 = vmul.f32 %v5014_v15, %v5107_v58 }
 0x335   : > { %v1900_v12 = vadd.f32 %v3600_v42, %v1899_v0  ;;  %v1961_v56 = vmul.f32 %v4842_v39, %v5107_v58  ;;  %v1993_v18 = vmul.f32 %v5000_v52, %v5107_v58  ;;  %v1959_v38 = vmul.f32 %v4836_v31, %v5107_v58 }
 0x336   : > { %1999 = vmatpush.xpose.msrb.mxu2 %v1965_v14  ;;  %2039 = vmatpush.xpose.msra.mxu0 %v1997_v48  ;;  %v1991_v15 = vmul.f32 %v4991_v41, %v5107_v58  ;;  %v1957_v39 = vmul.f32 %v4830_v35, %v5107_v58  ;;  %v1989_v0 = vmul.f32 %v4982_v21, %v5107_v58 }
 0x337   : > { %v1901_v40 = vrot.slane %v1900_v12, 4  ;;  %v1955_v52 = vmul.f32 %v4817_v44, %v5107_v58  ;;  %v1953_v41 = vmul.f32 %v4811_v29, %v5107_v58  ;;  %v1985_v44 = vmul.f32 %v4958_v61, %v5107_v58 }
 0x339   : > { %v1902_v16 = vadd.f32 %v1901_v40, %v1900_v12  ;;  %v1987_v12 = vmul.f32 %v4970_v49, %v5107_v58 }
 0x33a   : > { %2000 = vmatpush.xpose.msrb.mxu2 %v1963_v13  ;;  %2040 = vmatpush.xpose.msra.mxu0 %v1995_v1  ;;  %v1951_v13 = vmul.f32 %v4803_v7, %v5107_v58  ;;  %v1983_v1 = vmul.f32 %v4946_v45, %v5107_v58 }
 0x33b   : > { %v1903_v43 = vrot.slane %v1902_v16, 2 }
 0x33d   : > { %v1904_v20 = vadd.f32 %v1903_v43, %v1902_v16 }
 0x33e   : > { %2001 = vmatpush.xpose.msrb.mxu2 %v1961_v56  ;;  %2041 = vmatpush.xpose.msra.mxu0 %v1993_v18  ;;  %v7047_v56 = vld [vmem:[#allocation56_spill] sm:$0xff] }
 0x33f   : > { %v1905_v63 = vrot.slane %v1904_v20, 1 }
 0x341   : > { %v1906_v57 = vadd.f32 %v1905_v63, %v1904_v20  ;;  %v1949_v20 = vmul.f32 %v7047_v56, %v5107_v58 }
 0x342   : > { %2002 = vmatpush.xpose.msrb.mxu2 %v1959_v38  ;;  %2042 = vmatpush.xpose.msra.mxu0 %v1991_v15 }
 0x343   : > { %3601 = vrcp.f32 %v1906_v57  ;;  %v1932_v35 = vand.u32 2147483648, %v1906_v57  ;;  %v1930_v21 = vand.u32 2147483647, %v1906_v57  ;;  %vm1926_vm7 = vweird.f32 %v1906_v57 }
 0x345   : > { %v1933_v49 = vor.u32 1.1754944e-38, %v1932_v35  ;;  %vm1931_vm9 = vcmp.eq.f32.partialorder %v1930_v21, 8.507059e+37 }
 0x346   : > { %2003 = vmatpush.xpose.msrb.mxu2 %v1957_v39  ;;  %2043 = vmatpush.xpose.msra.mxu0 %v1989_v0 }
 0x349   : > { %v3602_v31 = vpop.eup %3601 }
 0x34a   : > { %2004 = vmatpush.xpose.msrb.mxu2 %v1955_v52  ;;  %v1922_v14 = vmul.f32 %v3602_v31, %v1906_v57  ;;  %2044 = vmatpush.xpose.msra.mxu0 %v1987_v12  ;;  %vm1927_vm6 = vweird.f32 %v3602_v31 }
 0x34b   : > { %vm1928_vm8 = vmor %vm1926_vm7, %vm1927_vm6 }
 0x34c   : > { %v1923_v48 = vsub.f32 1.0, %v1922_v14 }
 0x34e   : > { %2005 = vmatpush.xpose.msrb.mxu2 %v1953_v41  ;;  %v1924_v40 = vmul.f32 %v3602_v31, %v1923_v48  ;;  %2045 = vmatpush.xpose.msra.mxu0 %v1985_v44  ;;  %v7057_v44 = vld [vmem:[#allocation32_spill] sm:$0xff] }
 0x350   : > { %v1925_v16 = vadd.f32 %v3602_v31, %v1924_v40 }
 0x352   : > { %2006 = vmatpush.xpose.msrb.mxu2 %v1951_v13  ;;  %v1929_v29 = vsel %vm1928_vm8, %v3602_v31, %v1925_v16  ;;  %2046 = vmatpush.xpose.msra.mxu0 %v1983_v1  ;;  %v7058_v13 = vld [vmem:[#allocation12_spill] sm:$0xff] }
 0x353   : > { %v5144_v43 = vsel %vm1931_vm9, %v1933_v49, %v1929_v29 }
 0x354   : > { %v1966_v61 = vmul.f32 %v5033_v53, %v5144_v43  ;;  %v1998_v7 = vmul.f32 %v3600_v42, %v5144_v43  ;;  %v1996_v18 = vmul.f32 %v3598_v55, %v5144_v43  ;;  %v1994_v63 = vmul.f32 %v5104_v51, %v5144_v43  ;;  %v7048_v51 = vld [vmem:[#allocation54_spill] sm:$0xff] }
 0x355   : > { %v1992_v38 = vmul.f32 %v5101_v47, %v5144_v43  ;;  %v1990_v45 = vmul.f32 %v5098_v11, %v5144_v43  ;;  %v1981_v53 = vmul.f32 %v4934_v59, %v5107_v58  ;;  %v1988_v42 = vmul.f32 %v5089_v30, %v5144_v43 }
 0x356   : > { %2007 = vmatpush.xpose.msrb.mxu2 %v1949_v20  ;;  %2019 = vmatpush.xpose.msrb.mxu3 %v1966_v61  ;;  %v1986_v55 = vmul.f32 %v5082_v6, %v5144_v43  ;;  %v1947_v57 = vmul.f32 %v7048_v51, %v5107_v58  ;;  %v1964_v47 = vmul.f32 %v5022_v19, %v5144_v43  ;;  %v7060_v61 = vld [vmem:[#allocation40_spill] sm:$0xff] }
 0x357   : > { %2059 = vmatpush.xpose.msra.mxu1 %v1998_v7  ;;  %v1984_v15 = vmul.f32 %v5080_v46, %v5144_v43  ;;  %2047 = vmatpush.xpose.msra.mxu0 %v1981_v53  ;;  %v1982_v11 = vmul.f32 %v5077_v26, %v5144_v43  ;;  %v1980_v59 = vmul.f32 %v5072_v4, %v5144_v43  ;;  %v7049_v46 = vld [vmem:[#allocation51_spill] sm:$0xff]  ;;  %v1020_v53 = vld [vmem:[%s6612_s8] sm:$0xff] }
 0x358   : > { %v1978_v6 = vmul.f32 %v5067_v17, %v5144_v43  ;;  %v1979_v30 = vmul.f32 %v4922_v28, %v5107_v58  ;;  %v1976_v19 = vmul.f32 %v5062_v3, %v5144_v43  ;;  %v1945_v39 = vmul.f32 %v7049_v46, %v5107_v58  ;;  %v7050_v28 = vld [vmem:[#allocation48_spill] sm:$0xff] }
 0x359   : > { %v1974_v26 = vmul.f32 %v5057_v60, %v5144_v43  ;;  %v1962_v4 = vmul.f32 %v5004_v62, %v5144_v43  ;;  %v1977_v17 = vmul.f32 %v4913_v54, %v5107_v58  ;;  %v1943_v0 = vmul.f32 %v7050_v28, %v5107_v58  ;;  %v7051_v60 = vld [vmem:[#allocation45_spill] sm:$0xff] }
 0x35a   : > { %2008 = vmatpush.xpose.msrb.mxu2 %v1947_v57  ;;  %2020 = vmatpush.xpose.msrb.mxu3 %v1964_v47  ;;  %v1960_v3 = vmul.f32 %v4995_v25, %v5144_v43  ;;  %v1975_v62 = vmul.f32 %v4907_v32, %v5107_v58  ;;  %v1941_v52 = vmul.f32 %v7051_v60, %v5107_v58  ;;  %v7052_v25 = vld [vmem:[#allocation42_spill] sm:$0xff] }
 0x35b   : > { %2060 = vmatpush.xpose.msra.mxu1 %v1996_v18  ;;  %2048 = vmatpush.xpose.msra.mxu0 %v1979_v30  ;;  %v1958_v31 = vmul.f32 %v4986_v5, %v5144_v43  ;;  %v1973_v54 = vmul.f32 %v4899_v34, %v5107_v58  ;;  %v1939_v14 = vmul.f32 %v7052_v25, %v5107_v58  ;;  %v7053_v5 = vld [vmem:[#allocation37_spill] sm:$0xff]  ;;  %v7066_v25 = vld [vmem:[#allocation2_spill] sm:$0xff] }
 0x35c   : > { %v1956_v12 = vmul.f32 %v4977_v8, %v5144_v43  ;;  %v1971_v32 = vmul.f32 %v4887_v9, %v5107_v58  ;;  %v1937_v41 = vmul.f32 %v7053_v5, %v5107_v58  ;;  %v1954_v48 = vmul.f32 %v4965_v37, %v5144_v43  ;;  %v7054_v8 = vld [vmem:[#allocation21_spill] sm:$0xff] }
 0x35d   : > { %v1969_v34 = vmul.f32 %v4868_v2, %v5107_v58  ;;  %v1935_v35 = vmul.f32 %v7054_v8, %v5107_v58  ;;  %v1952_v40 = vmul.f32 %v4953_v23, %v5144_v43  ;;  %v1967_v9 = vmul.f32 %v4863_v50, %v5107_v58 }
 0x35e   : > { %2009 = vmatpush.xpose.msrb.mxu2 %v1945_v39  ;;  %2021 = vmatpush.xpose.msrb.mxu3 %v1962_v4  ;;  %v1950_v37 = vmul.f32 %v4941_v27, %v5144_v43  ;;  %v1948_v2 = vmul.f32 %v4929_v36, %v5144_v43  ;;  %v1946_v23 = vmul.f32 %v4920_v22, %v5144_v43  ;;  %v7055_v27 = vld [vmem:[#allocation39_spill] sm:$0xff]  ;;  %v3737_v39 = vld [vmem:[%s3822_s20] sm:$0xff] }
 0x35f   : > { %2061 = vmatpush.xpose.msra.mxu1 %v1994_v63  ;;  %2049 = vmatpush.xpose.msra.mxu0 %v1977_v17  ;;  %v1944_v21 = vmul.f32 %v4911_v33, %v5144_v43  ;;  %v1942_v50 = vmul.f32 %v4903_v24, %v5144_v43  ;;  %v1940_v36 = vmul.f32 %v7055_v27, %v5144_v43  ;;  %v3738_v4 = vld [vmem:[%s6608_s4] sm:$0xf] }
 0x360   : > { %v1972_v58 = vmul.f32 %v5052_v10, %v5144_v43  ;;  %v1938_v33 = vmul.f32 %v7057_v44, %v5144_v43  ;;  %v1970_v16 = vmul.f32 %v7058_v13, %v5144_v43  ;;  %v7059_v10 = vld [vmem:[#allocation58_spill] sm:$0xff]  ;;  %v1968_v7 = vmul.f32 %v7060_v61, %v5144_v43 }
 0x361   : > { %v1936_v20 = vmul.f32 %v7059_v10, %v5144_v43  ;;  %v7064_v17 = vld [vmem:[#allocation34_spill] sm:$0xff] }
 0x362   : > { %2010 = vmatpush.xpose.msrb.mxu2 %v1943_v0  ;;  %2022 = vmatpush.xpose.msrb.mxu3 %v1960_v3  ;;  %v7065_v0 = vld [vmem:[#allocation3_spill] sm:$0xff] }
 0x363   : > { %2062 = vmatpush.xpose.msra.mxu1 %v1992_v38  ;;  %2050 = vmatpush.xpose.msra.mxu0 %v1975_v62 }
 0x366   : > { %2011 = vmatpush.xpose.msrb.mxu2 %v1941_v52  ;;  %2023 = vmatpush.xpose.msrb.mxu3 %v1958_v31 }
 0x367   : > { %2063 = vmatpush.xpose.msra.mxu1 %v1990_v45  ;;  %2051 = vmatpush.xpose.msra.mxu0 %v1973_v54 }
 0x36a   : > { %2012 = vmatpush.xpose.msrb.mxu2 %v1939_v14  ;;  %2024 = vmatpush.xpose.msrb.mxu3 %v1956_v12 }
 0x36b   : > { %2064 = vmatpush.xpose.msra.mxu1 %v1988_v42  ;;  %2052 = vmatpush.xpose.msra.mxu0 %v1971_v32 }
 0x36e   : > { %2013 = vmatpush.xpose.msrb.mxu2 %v1937_v41  ;;  %2025 = vmatpush.xpose.msrb.mxu3 %v1954_v48 }
 0x36f   : > { %2065 = vmatpush.xpose.msra.mxu1 %v1986_v55  ;;  %2053 = vmatpush.xpose.msra.mxu0 %v1969_v34 }
 0x372   : > { %2014 = vmatpush.xpose.msrb.mxu2 %v1935_v35  ;;  %2026 = vmatpush.xpose.msrb.mxu3 %v1952_v40 }
 0x373   : > { %2066 = vmatpush.xpose.msra.mxu1 %v1984_v15  ;;  %2054 = vmatpush.xpose.msra.mxu0 %v1967_v9  ;;  %v5232_v22 = vpop.permute.xlu2 %1125 }
 0x374   : > { %7056 = vst [vmem:[#allocation15_spill] sm:$0xff] %v5232_v22 }
 0x376   : > { %2027 = vmatpush.xpose.msrb.mxu3 %v1950_v37 }
 0x377   : > { %2067 = vmatpush.xpose.msra.mxu1 %v1982_v11  ;;  %v3735_v11 = vld [vmem:[%s3822_s20 + $0x8] sm:$0xff] }
 0x37a   : > { %2028 = vmatpush.xpose.msrb.mxu3 %v1948_v2 }
 0x37b   : > { %2068 = vmatpush.xpose.msra.mxu1 %v1980_v59 }
 0x37e   : > { %2029 = vmatpush.xpose.msrb.mxu3 %v1946_v23 }
 0x37f   : > { %2069 = vmatpush.xpose.msra.mxu1 %v1978_v6 }
 0x382   : > { %2030 = vmatpush.xpose.msrb.mxu3 %v1944_v21 }
 0x383   : > { %2070 = vmatpush.xpose.msra.mxu1 %v1976_v19  ;;  %v3736_v19 = vld [vmem:[%s6606_s2] sm:$0xf] }
 0x386   : > { %2031 = vmatpush.xpose.msrb.mxu3 %v1942_v50 }
 0x387   : > { %2071 = vmatpush.xpose.msra.mxu1 %v1974_v26 }
 0x388   : > { %v5251_v51 = vpop.permute.xlu2 %2081 }
 0x389   : > { %v1148_v49 = vpop.f32.mrf.mxu0  ;;  %v1168_v24 = vpop.f32.mrf.mxu1  ;;  %7061 = vst [vmem:[#allocation13_spill] sm:$0xff] %v5251_v51 }
 0x38a   : > { %2032 = vmatpush.xpose.msrb.mxu3 %v1940_v36  ;;  %v1149_v29 = vadd.f32 %v1148_v49, %v5232_v22  ;;  %v1169_v1 = vadd.f32 %v1168_v24, %v5232_v22 }
 0x38b   : > { %2072 = vmatpush.xpose.msra.mxu1 %v1972_v58 }
 0x38c   : > { %v1171_v56 = vmax.f32 %v1149_v29, 0.0  ;;  %v1172_v18 = vmax.f32 %v1169_v1, 0.0 }
 0x38e   : > { %2033 = vmatpush.xpose.msrb.mxu3 %v1938_v33  ;;  %2015 = vmatmul.f32.vlgmr.msrb.gmra.mxu2 %v1171_v56 }
 0x38f   : > { %2073 = vmatpush.xpose.msra.mxu1 %v1970_v16  ;;  %2055 = vmatmul.f32.vlgmr.msra.gmra.mxu0 %v1171_v56 }
 0x392   : > { %2034 = vmatpush.xpose.msrb.mxu3 %v1936_v20 }
 0x393   : > { %2074 = vmatpush.xpose.msra.mxu1 %v1968_v7 }
 0x395   : > { %2035 = vmatmul.f32.vlgmr.msrb.gmra.mxu3 %v1172_v18 }
 0x396   : > { %2075 = vmatmul.f32.vlgmr.msra.gmra.mxu1 %v1172_v18 }
 0x40c   : > { %v2056_v63 = vpop.f32.mrf.mxu0 }
 0x411   : > { %v2016_v43 = vpop.f32.mrf.mxu2 }
 0x413   : > { %v2076_v38 = vpop.f32.mrf.mxu1 }
 0x414   : > { %v2077_v45 = vadd.f32 %v2076_v38, %v2056_v63 }
 0x416   : > { %3375 = vmatpush.msk.msrb.mxu1 %vm1334_vm1, %v2077_v45 }
 0x417   : > { %3376 = vmatmul.msk.f32.vlgmr.msrb.gmra.mxu1 %vm1237_vm2, %v1020_v53 }
 0x418   : > { %v2036_v42 = vpop.f32.mrf.mxu3 }
 0x419   : > { %v2037_v55 = vadd.f32 %v2036_v42, %v2016_v43 }
 0x41b   : > { %3373 = vmatpush.msk.msrb.mxu0 %vm1334_vm1, %v2037_v55 }
 0x41c   : > { %3374 = vmatmul.msk.f32.vlgmr.msrb.gmra.mxu0 %vm1237_vm2, %v1020_v53 }
 0x494   : > { %v2130_v57 = vpop.f32.mrf.mxu1 }
 0x495   : > { %v2131_v47 = vadd.f32 %v2130_v57, %v5251_v51 }
 0x497   : > { %v2134_v15 = vmax.f32 %v2131_v47, 0.0 }
 0x499   : > { %v5255_v59 = vadd.f32 %v3735_v11, %v2134_v15  ;;  %v2110_v6 = vpop.f32.mrf.mxu0  ;;  %v7069_v11 = vld [vmem:[#allocation5_spill] sm:$0xff] }
 0x49a   : > { %v2111_v30 = vadd.f32 %v2110_v6, %v5251_v51  ;;  %v7070_v6 = vshra.s32 %v7069_v11, 4 }
 0x49b   : > { %7062 = vst [vmem:[#allocation16_spill] sm:$0xff] %v5255_v59  ;;  %2172 = vmatpush.msra.mxu1 %v5255_v59 }
 0x49c   : > { %3378 = vmatmul.msk.f32.vlgmr.msra.gmra.mxu1 %vm1027_vm0, %v3736_v19  ;;  %v2133_v46 = vmax.f32 %v2111_v30, 0.0  ;;  %v750_v30 = vand.u32 7, %v7070_v6 }
 0x49d   : > { %2214 = vmatpush.msrb.mxu1 %v5255_v59 }
 0x49e   : > { %v5266_v26 = vadd.f32 %v3737_v39, %v2133_v46 }
 0x49f   : > { %2256 = vmatpush.msra.mxu1 %v5255_v59 }
 0x4a0   : > { %7063 = vst [vmem:[#allocation18_spill] sm:$0xff] %v5266_v26  ;;  %2152 = vmatpush.msra.mxu0 %v5266_v26 }
 0x4a1   : > { %3377 = vmatmul.msk.f32.vlgmr.msra.gmra.mxu0 %vm1027_vm0, %v3736_v19  ;;  %v7071_v19 = vld [vmem:[#allocation4_spill] sm:$0xff] }
 0x4a2   : > { %2194 = vmatpush.msrb.mxu0 %v5266_v26  ;;  %v7072_v46 = vshra.s32 %v7071_v19, 4 }
 0x4a4   : > { %2236 = vmatpush.msra.mxu0 %v5266_v26  ;;  %3380 = vmatmul.msk.f32.vlgmr.msrb.gmra.mxu1 %vm1027_vm0, %v3738_v4  ;;  %v878_v39 = vand.u32 7, %v7072_v46 }
 0x4a9   : > { %3379 = vmatmul.msk.f32.vlgmr.msrb.gmra.mxu0 %vm1027_vm0, %v3738_v4  ;;  %v7073_v4 = vld [vmem:[#allocation6_spill] sm:$0xff] }
 0x4ac   : > { %3382 = vmatmul.msk.f32.vlgmr.msra.gmra.mxu1 %vm1027_vm0, %v7064_v17 }
 0x4b1   : > { %3381 = vmatmul.msk.f32.vlgmr.msra.gmra.mxu0 %vm1027_vm0, %v7064_v17  ;;  %v7074_v17 = vshra.s32 %v7073_v4, 4 }
 0x519   : > { %v2174_v28 = vpop.f32.mrf.mxu1 }
 0x51a   : > { %v2175_v3 = vadd.f32 %v2174_v28, %v7065_v0  ;;  %v879_v28 = vand.u32 7, %v7074_v17 }
 0x51c   : > { %v2178_v62 = vmax.f32 %v2175_v3, 0.0  ;;  %v7075_v3 = vand.u32 15, %v7069_v11 }
 0x51e   : > { %3416 = vmatpush.msk.msrb.mxu1 %vm1334_vm1, %v2178_v62  ;;  %v2154_v60 = vpop.f32.mrf.mxu0  ;;  %v814_v62 = vand.u32 7, %v7075_v3 }
 0x51f   : > { %v2155_v52 = vadd.f32 %v2154_v60, %v7065_v0  ;;  %v782_v0 = vmul.u32 8, %v750_v30  ;;  %v880_v60 = vmul.u32 8, %v878_v39 }
 0x521   : > { %v2216_v31 = vpop.f32.mrf.mxu1  ;;  %v2177_v54 = vmax.f32 %v2155_v52, 0.0  ;;  %v7076_v52 = vand.u32 15, %v7071_v19  ;;  %v7089_v19 = vld [vmem:[#allocation14_spill] sm:$0xff] }
 0x522   : > { %v2217_v14 = vadd.f32 %v2216_v31, %v7066_v25  ;;  %v7090_v46 = vshra.s32 %v7089_v19, 4 }
 0x523   : > { %3383 = vmatpush.msk.msrb.mxu0 %vm1334_vm1, %v2177_v54  ;;  %v882_v31 = vand.u32 7, %v7076_v52  ;;  %v7094_v52 = vld [vmem:[#allocation25_spill] sm:$0xff] }
 0x524   : > { %v2220_v12 = vmax.f32 %v2217_v14, 0.0  ;;  %v7077_v14 = vld [vmem:[#allocation8_spill] sm:$0xff]  ;;  %v756_v39 = vand.u32 7, %v7090_v46 }
 0x526   : > { %2295 = vxpose.xlu2.b32.start.end [1/1] (short) %v2220_v12, 128  ;;  %v2196_v32 = vpop.f32.mrf.mxu0  ;;  %v7078_v12 = vshra.s32 %v7077_v14, 4 }
 0x527   : > { %v2197_v5 = vadd.f32 %v2196_v32, %v7066_v25 }
 0x528   : > { %v751_v32 = vand.u32 7, %v7078_v12 }
 0x529   : > { %v2219_v41 = vmax.f32 %v2197_v5, 0.0  ;;  %v5317_v49 = vpop.f32.mrf.mxu1 }
 0x52a   : > { %7067 = vst [vmem:[#allocation19_spill] sm:$0xff] %v5317_v49  ;;  %v7170_v49 = vld [vmem:[#allocation60_spill] sm:$0xff] }
 0x52b   : > { %2263 = vxpose.xlu0.b32.start.end [1/1] (short) %v2219_v41, 128  ;;  %v7079_v41 = vld [vmem:[#allocation7_spill] sm:$0xff] }
 0x52e   : > { %v5319_v24 = vpop.f32.mrf.mxu0 }
 0x52f   : > { %7068 = vst [vmem:[#allocation20_spill] sm:$0xff] %v5319_v24  ;;  %v7171_v24 = vshra.s32 %v7170_v49, 4 }
 0x531   : > { %v771_v22 = vand.u32 7, %v7171_v24 }
 0x5bf   : > { %v2311_v36 = vpop.trf.xlu2 }
 0x5c7   : > { %v2312_v33 = vpop.trf.xlu2 }
 0x5cf   : > { %v2279_v48 = vpop.trf.xlu0  ;;  %v2313_v16 = vpop.trf.xlu2 }
 0x5d0   : > { %3384 = vmatmul.msk.f32.vlgmr.msrb.gmra.mxu0 %vm1237_vm2, %v2279_v48  ;;  %3417 = vmatmul.msk.f32.vlgmr.msrb.gmra.mxu1 %vm1237_vm2, %v2279_v48  ;;  %v7080_v48 = vshra.s32 %v7079_v41, 4 }
 0x5d7   : > { %v2280_v34 = vpop.trf.xlu0  ;;  %v2314_v1 = vpop.trf.xlu2 }
 0x5d8   : > { %3385 = vmatmul.msk.f32.gmra.mxu0 %vm1237_vm2, %v2280_v34  ;;  %3418 = vmatmul.msk.f32.gmra.mxu1 %vm1237_vm2, %v2280_v34  ;;  %v752_v34 = vand.u32 7, %v7080_v48 }
 0x5df   : > { %v2281_v8 = vpop.trf.xlu0  ;;  %v2315_v7 = vpop.trf.xlu2 }
 0x5e0   : > { %3386 = vmatmul.msk.f32.gmra.mxu0 %vm1237_vm2, %v2281_v8  ;;  %3419 = vmatmul.msk.f32.gmra.mxu1 %vm1237_vm2, %v2281_v8  ;;  %v881_v8 = vmul.u32 8, %v879_v28 }
 0x5e7   : > { %v2282_v35 = vpop.trf.xlu0  ;;  %v2316_v38 = vpop.trf.xlu2 }
 0x5e8   : > { %3387 = vmatmul.msk.f32.gmra.mxu0 %vm1237_vm2, %v2282_v35  ;;  %3420 = vmatmul.msk.f32.gmra.mxu1 %vm1237_vm2, %v2282_v35  ;;  %v7081_v35 = vand.u32 15, %v7073_v4 }
 0x5ef   : > { %v2283_v40 = vpop.trf.xlu0  ;;  %v2317_v43 = vpop.trf.xlu2 }
 0x5f0   : > { %3388 = vmatmul.msk.f32.gmra.mxu0 %vm1237_vm2, %v2283_v40  ;;  %3421 = vmatmul.msk.f32.gmra.mxu1 %vm1237_vm2, %v2283_v40  ;;  %v883_v40 = vand.u32 7, %v7081_v35 }
 0x5f7   : > { %v2284_v9 = vpop.trf.xlu0  ;;  %v2318_v57 = vpop.trf.xlu2 }
 0x5f8   : > { %3389 = vmatmul.msk.f32.gmra.mxu0 %vm1237_vm2, %v2284_v9  ;;  %3422 = vmatmul.msk.f32.gmra.mxu1 %vm1237_vm2, %v2284_v9  ;;  %v846_v9 = vadd.s32 %v814_v62, %v782_v0  ;;  %v7092_v0 = vld [vmem:[#allocation11_spill] sm:$0xff] }
 0x5f9   : > { %v7093_v3 = vshra.s32 %v7092_v0, 4 }
 0x5fb   : > { %v755_v62 = vand.u32 7, %v7093_v3 }
 0x5ff   : > { %v2285_v37 = vpop.trf.xlu0  ;;  %v2319_v5 = vpop.trf.xlu2 }
 0x600   : > { %3390 = vmatmul.msk.f32.gmra.mxu0 %vm1237_vm2, %v2285_v37  ;;  %3423 = vmatmul.msk.f32.gmra.mxu1 %vm1237_vm2, %v2285_v37  ;;  %v5381_v37 = vadd.s32 %v882_v31, %v880_v60  ;;  %v7095_v31 = vshra.s32 %v7094_v52, 4 }
 0x602   : > { %vm886_vm0 = vcmp.eq.s32.totalorder %v846_v9, %v5381_v37 }
 0x607   : > { %v2286_v2 = vpop.trf.xlu0  ;;  %v5410_v12 = vpop.trf.xlu2 }
 0x608   : > { %3391 = vmatmul.msk.f32.gmra.mxu0 %vm1237_vm2, %v2286_v2  ;;  %3424 = vmatmul.msk.f32.gmra.mxu1 %vm1237_vm2, %v2286_v2  ;;  %v783_v2 = vmul.u32 8, %v751_v32  ;;  %v7096_v32 = vmov -1e+30  }
 0x60f   : > { %v2287_v23 = vpop.trf.xlu0 }
 0x610   : > { %3392 = vmatmul.msk.f32.gmra.mxu0 %vm1237_vm2, %v2287_v23  ;;  %3425 = vmatmul.msk.f32.gmra.mxu1 %vm1237_vm2, %v2287_v23  ;;  %v7082_v23 = vand.u32 15, %v7077_v14  ;;  %v758_v14 = vand.u32 7, %v7095_v31 }
 0x617   : > { %v2288_v21 = vpop.trf.xlu0 }
 0x618   : > { %3393 = vmatmul.msk.f32.gmra.mxu0 %vm1237_vm2, %v2288_v21  ;;  %3426 = vmatmul.msk.f32.gmra.mxu1 %vm1237_vm2, %v2288_v21  ;;  %v815_v21 = vand.u32 7, %v7082_v23 }
 0x61f   : > { %v2289_v50 = vpop.trf.xlu0 }
 0x620   : > { %3394 = vmatmul.msk.f32.gmra.mxu0 %vm1237_vm2, %v2289_v50  ;;  %3427 = vmatmul.msk.f32.gmra.mxu1 %vm1237_vm2, %v2289_v50  ;;  %v7083_v50 = vld [vmem:[#allocation9_spill] sm:$0xff] }
 0x621   : > { %v7088_v6 = vand.u32 15, %v7083_v50 }
 0x623   : > { %v817_v30 = vand.u32 7, %v7088_v6 }
 0x627   : > { %v2290_v27 = vpop.trf.xlu0 }
 0x628   : > { %3395 = vmatmul.msk.f32.gmra.mxu0 %vm1237_vm2, %v2290_v27  ;;  %3428 = vmatmul.msk.f32.gmra.mxu1 %vm1237_vm2, %v2290_v27  ;;  %v7084_v27 = vshra.s32 %v7083_v50, 4  ;;  %v7099_v50 = vand.u32 15, %v7094_v52 }
 0x62f   : > { %v2291_v58 = vpop.trf.xlu0 }
 0x630   : > { %3396 = vmatmul.msk.f32.gmra.mxu0 %vm1237_vm2, %v2291_v58  ;;  %3429 = vmatmul.msk.f32.gmra.mxu1 %vm1237_vm2, %v2291_v58  ;;  %v7085_v58 = vld [vmem:[#allocation10_spill] sm:$0xff] }
 0x631   : > { %v7091_v17 = vand.u32 15, %v7085_v58 }
 0x633   : > { %v818_v28 = vand.u32 7, %v7091_v17 }
 0x637   : > { %v2292_v44 = vpop.trf.xlu0 }
 0x638   : > { %3397 = vmatmul.msk.f32.gmra.mxu0 %vm1237_vm2, %v2292_v44  ;;  %3430 = vmatmul.msk.f32.gmra.mxu1 %vm1237_vm2, %v2292_v44  ;;  %v7086_v44 = vshra.s32 %v7085_v58, 4 }
 0x63f   : > { %v2293_v13 = vpop.trf.xlu0 }
 0x640   : > { %3398 = vmatmul.msk.f32.gmra.mxu0 %vm1237_vm2, %v2293_v13  ;;  %3431 = vmatmul.msk.f32.gmra.mxu1 %vm1237_vm2, %v2293_v13  ;;  %v784_v13 = vmul.u32 8, %v752_v34  ;;  %v788_v34 = vmul.u32 8, %v756_v39  ;;  %v7104_v39 = vld [vmem:[#allocation23_spill] sm:$0xff] }
 0x647   : > { %v2294_v29 = vpop.trf.xlu0 }
 0x648   : > { %3399 = vmatmul.msk.f32.gmra.mxu0 %vm1237_vm2, %v2294_v29  ;;  %3432 = vmatmul.msk.f32.gmra.mxu1 %vm1237_vm2, %v2294_v29 }
 0x64d   : > { %v5323_v56 = vpop.f32.mrf.mxu0  ;;  %v5325_v10 = vpop.f32.mrf.mxu1 }
 0x650   : > { %3400 = vmatmul.msk.f32.gmra.mxu0 %vm1237_vm2, %v2311_v36  ;;  %3433 = vmatmul.msk.f32.gmra.mxu1 %vm1237_vm2, %v2311_v36  ;;  %v753_v36 = vand.u32 7, %v7084_v27  ;;  %v7100_v27 = vld [vmem:[#allocation26_spill] sm:$0xff] }
 0x652   : > { %v785_v11 = vmul.u32 8, %v753_v36  ;;  %v7101_v36 = vshra.s32 %v7100_v27, 4 }
 0x654   : > { %v849_v48 = vadd.s32 %v817_v30, %v785_v11  ;;  %v760_v58 = vand.u32 7, %v7101_v36 }
 0x655   : > { %v5329_v20 = vpop.f32.mrf.mxu0  ;;  %v5331_v61 = vpop.f32.mrf.mxu1 }
 0x656   : > { %vm892_vm15 = vcmp.eq.s32.totalorder %v849_v48, %v5381_v37  ;;  %v792_v3 = vmul.u32 8, %v760_v58 }
 0x657   : > { %v956_v52 = vsel %vm892_vm15, 0.0, %v7096_v32 }
 0x658   : > { %3401 = vmatmul.msk.f32.gmra.mxu0 %vm1237_vm2, %v2312_v33  ;;  %3434 = vmatmul.msk.f32.gmra.mxu1 %vm1237_vm2, %v2312_v33  ;;  %v754_v33 = vand.u32 7, %v7086_v44 }
 0x65a   : > { %v786_v4 = vmul.u32 8, %v754_v33 }
 0x65d   : > { %v5335_v18 = vpop.f32.mrf.mxu0  ;;  %v5337_v63 = vpop.f32.mrf.mxu1 }
 0x660   : > { %3402 = vmatmul.msk.f32.gmra.mxu0 %vm1237_vm2, %v2313_v16  ;;  %3435 = vmatmul.msk.f32.gmra.mxu1 %vm1237_vm2, %v2313_v16  ;;  %v7087_v16 = vand.u32 15, %v7079_v41  ;;  %v950_v41 = vsel %vm886_vm0, 0.0, %v7096_v32 }
 0x662   : > { %v816_v29 = vand.u32 7, %v7087_v16 }
 0x664   : > { %v848_v60 = vadd.s32 %v816_v29, %v784_v13  ;;  %v7102_v13 = vld [vmem:[#allocation17_spill] sm:$0xff] }
 0x665   : > { %v5341_v45 = vpop.f32.mrf.mxu0  ;;  %v5343_v53 = vpop.f32.mrf.mxu1  ;;  %v7103_v16 = vshra.s32 %v7102_v13, 4 }
 0x666   : > { %vm890_vm13 = vcmp.eq.s32.totalorder %v848_v60, %v5381_v37 }
 0x667   : > { %v757_v29 = vand.u32 7, %v7103_v16 }
 0x668   : > { %3403 = vmatmul.msk.f32.gmra.mxu0 %vm1237_vm2, %v2314_v1  ;;  %3436 = vmatmul.msk.f32.gmra.mxu1 %vm1237_vm2, %v2314_v1  ;;  %v5392_v1 = vadd.s32 %v883_v40, %v881_v8  ;;  %v7097_v8 = vand.u32 15, %v7089_v19  ;;  %v787_v40 = vmul.u32 8, %v755_v62  ;;  %v954_v19 = vsel %vm890_vm13, 0.0, %v7096_v32 }
 0x669   : > { %v7106_v62 = vand.u32 15, %v7100_v27 }
 0x66a   : > { %vm887_vm10 = vcmp.eq.s32.totalorder %v846_v9, %v5392_v1  ;;  %v820_v35 = vand.u32 7, %v7097_v8  ;;  %v822_v9 = vand.u32 7, %v7099_v50  ;;  %vm891_vm14 = vcmp.eq.s32.totalorder %v848_v60, %v5392_v1 }
 0x66b   : > { %v951_v44 = vsel %vm887_vm10, 0.0, %v7096_v32  ;;  %vm893_vm3 = vcmp.eq.s32.totalorder %v849_v48, %v5392_v1  ;;  %v824_v60 = vand.u32 7, %v7106_v62  ;;  %v7107_v48 = vand.u32 15, %v7102_v13 }
 0x66c   : > { %v5437_v30 = vadd.s32 %v820_v35, %v788_v34  ;;  %v957_v31 = vsel %vm893_vm3, 0.0, %v7096_v32  ;;  %v5455_v8 = vadd.f32 %v5323_v56, %v950_v41  ;;  %v7110_v41 = vld [vmem:[#allocation24_spill] sm:$0xff] }
 0x66d   : > { %v5347_v42 = vpop.f32.mrf.mxu0  ;;  %v5349_v55 = vpop.f32.mrf.mxu1  ;;  %v821_v34 = vand.u32 7, %v7107_v48  ;;  %v5472_v56 = vadd.s32 %v824_v60, %v792_v3 }
 0x66e   : > { %vm899_vm6 = vcmp.eq.s32.totalorder %v5437_v30, %v5392_v1 }
 0x66f   : > { %v963_v27 = vsel %vm899_vm6, 0.0, %v7096_v32  ;;  %vm907_vm0 = vcmp.eq.s32.totalorder %v5472_v56, %v5392_v1 }
 0x670   : > { %3404 = vmatmul.msk.f32.gmra.mxu0 %vm1237_vm2, %v2315_v7  ;;  %3437 = vmatmul.msk.f32.gmra.mxu1 %vm1237_vm2, %v2315_v7 }
 0x675   : > { %v5353_v47 = vpop.f32.mrf.mxu0  ;;  %v5355_v15 = vpop.f32.mrf.mxu1 }
 0x678   : > { %3405 = vmatmul.msk.f32.gmra.mxu0 %vm1237_vm2, %v2316_v38  ;;  %3438 = vmatmul.msk.f32.gmra.mxu1 %vm1237_vm2, %v2316_v38 }
 0x67d   : > { %v5369_v54 = vpop.f32.mrf.mxu0  ;;  %v5371_v25 = vpop.f32.mrf.mxu1 }
 0x680   : > { %3406 = vmatmul.msk.f32.gmra.mxu0 %vm1237_vm2, %v2317_v43  ;;  %3439 = vmatmul.msk.f32.gmra.mxu1 %vm1237_vm2, %v2317_v43  ;;  %v847_v43 = vadd.s32 %v815_v21, %v783_v2  ;;  %v7098_v2 = vand.u32 15, %v7092_v0  ;;  %v790_v21 = vmul.u32 8, %v758_v14  ;;  %v789_v14 = vmul.u32 8, %v757_v29 }
 0x682   : > { %vm888_vm11 = vcmp.eq.s32.totalorder %v847_v43, %v5381_v37  ;;  %vm889_vm12 = vcmp.eq.s32.totalorder %v847_v43, %v5392_v1  ;;  %v819_v23 = vand.u32 7, %v7098_v2  ;;  %v5444_v0 = vadd.s32 %v822_v9, %v790_v21 }
 0x683   : > { %v952_v33 = vsel %vm888_vm11, 0.0, %v7096_v32  ;;  %v953_v6 = vsel %vm889_vm12, 0.0, %v7096_v32  ;;  %v5477_v9 = vadd.f32 %v5325_v10, %v951_v44  ;;  %v853_v36 = vadd.s32 %v821_v34, %v789_v14 }
 0x684   : > { %v851_v46 = vadd.s32 %v819_v23, %v787_v40  ;;  %v7109_v23 = vand.u32 15, %v7104_v39  ;;  %vm903_vm9 = vcmp.eq.s32.totalorder %v5444_v0, %v5392_v1  ;;  %v5482_v16 = vadd.f32 %v5329_v20, %v952_v33 }
 0x685   : > { %v5394_v7 = vpop.f32.mrf.mxu0  ;;  %v5396_v38 = vpop.f32.mrf.mxu1  ;;  %7112 = vst [vmem:[#allocation31_spill] sm:$0xff] %v5477_v9  ;;  %v5485_v29 = vadd.f32 %v5331_v61, %v953_v6  ;;  %v5498_v20 = vadd.f32 %v5371_v25, %v963_v27  ;;  %v5509_v6 = vadd.f32 %v5341_v45, %v956_v52  ;;  %vm900_vm10 = vcmp.eq.s32.totalorder %v853_v36, %v5381_v37 }
 0x686   : > { %vm896_vm7 = vcmp.eq.s32.totalorder %v851_v46, %v5381_v37  ;;  %v823_v21 = vand.u32 7, %v7109_v23  ;;  %vm897_vm8 = vcmp.eq.s32.totalorder %v851_v46, %v5392_v1  ;;  %v5512_v46 = vadd.f32 %v5343_v53, %v957_v31  ;;  %v7121_v53 = vld [vmem:[#allocation27_spill] sm:$0xff] }
 0x687   : > { %7113 = vst [vmem:[#allocation38_spill] sm:$0xff] %v5485_v29  ;;  %v960_v10 = vsel %vm896_vm7, 0.0, %v7096_v32  ;;  %vm901_vm11 = vcmp.eq.s32.totalorder %v853_v36, %v5392_v1  ;;  %v5517_v25 = vadd.f32 %v5335_v18, %v954_v19  ;;  %vm898_vm12 = vcmp.eq.s32.totalorder %v5437_v30, %v5381_v37 }
 0x688   : > { %3407 = vmatmul.msk.f32.gmra.mxu0 %vm1237_vm2, %v2318_v57  ;;  %3440 = vmatmul.msk.f32.gmra.mxu1 %vm1237_vm2, %v2318_v57  ;;  %v850_v57 = vadd.s32 %v818_v28, %v786_v4  ;;  %v7105_v4 = vshra.s32 %v7104_v39, 4  ;;  %v955_v28 = vsel %vm891_vm14, 0.0, %v7096_v32  ;;  %7115 = vst [vmem:[#allocation46_spill] sm:$0xff] %v5498_v20  ;;  %v971_v45 = vsel %vm907_vm0, 0.0, %v7096_v32 }
 0x689   : > { %v5464_v40 = vadd.f32 %v5337_v63, %v955_v28  ;;  %7117 = vst [vmem:[#allocation49_spill] sm:$0xff] %v5509_v6  ;;  %v7122_v62 = vshra.s32 %v7121_v53, 4  ;;  %v964_v18 = vsel %vm900_vm10, 0.0, %v7096_v32  ;;  %v965_v19 = vsel %vm901_vm11, 0.0, %v7096_v32 }
 0x68a   : > { %vm895_vm4 = vcmp.eq.s32.totalorder %v850_v57, %v5392_v1  ;;  %v759_v17 = vand.u32 7, %v7105_v4  ;;  %vm894_vm5 = vcmp.eq.s32.totalorder %v850_v57, %v5381_v37  ;;  %v7111_v57 = vshra.s32 %v7110_v41, 4  ;;  %7118 = vst [vmem:[#allocation52_spill] sm:$0xff] %v5512_v46 }
 0x68b   : > { %v959_v35 = vsel %vm895_vm4, 0.0, %v7096_v32  ;;  %7108 = vst [vmem:[#allocation22_spill] sm:$0xff] %v5464_v40  ;;  %v958_v63 = vsel %vm894_vm5, 0.0, %v7096_v32  ;;  %v2692_v44 = vmax.f32 %v5477_v9, %v5464_v40  ;;  %v961_v4 = vsel %vm897_vm8, 0.0, %v7096_v32 }
 0x68c   : > { %v791_v2 = vmul.u32 8, %v759_v17  ;;  %v761_v50 = vand.u32 7, %v7111_v57  ;;  %v5488_v39 = vadd.f32 %v5349_v55, %v959_v35  ;;  %v967_v17 = vsel %vm903_vm9, 0.0, %v7096_v32  ;;  %7119 = vst [vmem:[#allocation55_spill] sm:$0xff] %v5517_v25 }
 0x68d   : > { %v5432_v43 = vpop.f32.mrf.mxu0  ;;  %v2583_v11 = vpop.f32.mrf.mxu1  ;;  %v7116_v55 = vand.u32 15, %v7110_v41  ;;  %v762_v60 = vand.u32 7, %v7122_v62  ;;  %v2693_v48 = vmax.f32 %v5485_v29, %v5512_v46  ;;  %v5537_v34 = vadd.f32 %v5353_v47, %v960_v10  ;;  %v7175_v29 = vld [vmem:[#allocation62_spill] sm:$0xff] }
 0x68e   : > { %7114 = vst [vmem:[#allocation43_spill] sm:$0xff] %v5488_v39  ;;  %v855_v28 = vadd.s32 %v823_v21, %v791_v2  ;;  %v793_v61 = vmul.u32 8, %v761_v50  ;;  %v5522_v3 = vadd.f32 %v2583_v11, %v967_v17  ;;  %v2656_v11 = vmax.f32 %v5482_v16, %v5509_v6 }
 0x68f   : > { %v825_v33 = vand.u32 7, %v7116_v55  ;;  %7123 = vst [vmem:[#allocation59_spill] sm:$0xff] %v5537_v34  ;;  %v5540_v35 = vadd.f32 %v5355_v15, %v961_v4  ;;  %v5554_v47 = vadd.f32 %v5394_v7, %v964_v18  ;;  %v5557_v15 = vadd.f32 %v5396_v38, %v965_v19 }
 0x690   : > { %3408 = vmatmul.msk.f32.gmra.mxu0 %vm1237_vm2, %v2319_v5  ;;  %3441 = vmatmul.msk.f32.gmra.mxu1 %vm1237_vm2, %v2319_v5  ;;  %v5461_v5 = vpop.trf.xlu2  ;;  %7120 = vst [vmem:[#allocation57_spill] sm:$0xff] %v5522_v3  ;;  %vm904_vm13 = vcmp.eq.s32.totalorder %v855_v28, %v5381_v37  ;;  %vm905_vm14 = vcmp.eq.s32.totalorder %v855_v28, %v5392_v1  ;;  %v794_v27 = vmul.u32 8, %v762_v60  ;;  %v7128_v36 = vand.u32 15, %v7121_v53 }
 0x691   : > { %v857_v31 = vadd.s32 %v825_v33, %v793_v61  ;;  %7124 = vst [vmem:[#allocation33_spill] sm:$0xff] %v5540_v35  ;;  %v968_v41 = vsel %vm904_vm13, 0.0, %v7096_v32  ;;  %v969_v57 = vsel %vm905_vm14, 0.0, %v7096_v32  ;;  %v2655_v7 = vmax.f32 %v5455_v8, %v5517_v25  ;;  %v7195_v25 = vld [vmem:[#allocation69_spill] sm:$0xff] }
 0x692   : > { %7126 = vst [vmem:[#allocation35_spill] sm:$0xff] %v5554_v47  ;;  %v826_v10 = vand.u32 7, %v7128_v36  ;;  %v5576_v38 = vadd.f32 %v5347_v42, %v958_v63  ;;  %v2658_v30 = vmax.f32 %v2656_v11, %v5537_v34  ;;  %vm902_vm4 = vcmp.eq.s32.totalorder %v5444_v0, %v5381_v37  ;;  %v7131_v63 = vld [vmem:[#allocation28_spill] sm:$0xff] }
 0x693   : > { %7127 = vst [vmem:[#allocation56_spill] sm:$0xff] %v5557_v15  ;;  %vm908_vm15 = vcmp.eq.s32.totalorder %v857_v31, %v5381_v37  ;;  %vm909_vm3 = vcmp.eq.s32.totalorder %v857_v31, %v5392_v1  ;;  %v2695_v17 = vmax.f32 %v2693_v48, %v5540_v35  ;;  %vm906_vm5 = vcmp.eq.s32.totalorder %v5472_v56, %v5381_v37 }
 0x694   : > { %7129 = vst [vmem:[#allocation54_spill] sm:$0xff] %v5576_v38  ;;  %v972_v61 = vsel %vm908_vm15, 0.0, %v7096_v32  ;;  %v973_v55 = vsel %vm909_vm3, 0.0, %v7096_v32  ;;  %v858_v42 = vadd.s32 %v826_v10, %v794_v27  ;;  %v7132_v33 = vshra.s32 %v7131_v63, 4 }
 0x695   : > { %v2473_v58 = vpop.f32.mrf.mxu0  ;;  %v2586_v13 = vpop.f32.mrf.mxu1  ;;  %v2697_v0 = vmax.f32 %v2695_v17, %v5557_v15  ;;  %v970_v56 = vsel %vm906_vm5, 0.0, %v7096_v32  ;;  %v803_v15 = vmul.u32 8, %v771_v22  ;;  %v7176_v9 = vshra.s32 %v7175_v29, 4 }
 0x696   : > { %v5582_v28 = vadd.f32 %v2473_v58, %v968_v41  ;;  %v966_v58 = vsel %vm902_vm4, 0.0, %v7096_v32  ;;  %vm910_vm6 = vcmp.eq.s32.totalorder %v858_v42, %v5381_v37  ;;  %vm911_vm7 = vcmp.eq.s32.totalorder %v858_v42, %v5392_v1 }
 0x697   : > { %v5607_v48 = vadd.f32 %v5432_v43, %v966_v58  ;;  %v974_v36 = vsel %vm910_vm6, 0.0, %v7096_v32  ;;  %v975_v10 = vsel %vm911_vm7, 0.0, %v7096_v32  ;;  %v7178_v22 = vand.u32 15, %v7175_v29 }
 0x698   : > { %3409 = vmatmul.msk.f32.gmra.mxu0 %vm1237_vm2, %v5410_v12  ;;  %3442 = vmatmul.msk.f32.gmra.mxu1 %vm1237_vm2, %v5410_v12  ;;  %v2694_v12 = vmax.f32 %v2692_v44, %v5488_v39  ;;  %v2322_v14 = vpop.trf.xlu2  ;;  %v962_v44 = vsel %vm898_vm12, 0.0, %v7096_v32  ;;  %v7173_v39 = vld [vmem:[#allocation61_spill] sm:$0xff] }
 0x699   : > { %v5597_v53 = vadd.f32 %v5369_v54, %v962_v44  ;;  %7135 = vst [vmem:[#allocation42_spill] sm:$0xff] %v5607_v48  ;;  %v7174_v46 = vshra.s32 %v7173_v39, 4 }
 0x69a   : > { %v2696_v52 = vmax.f32 %v2694_v12, %v5498_v20  ;;  %v763_v12 = vand.u32 7, %v7132_v33  ;;  %v7172_v20 = vand.u32 15, %v7170_v49  ;;  %v837_v49 = vand.u32 7, %v7178_v22 }
 0x69b   : > { %7133 = vst [vmem:[#allocation48_spill] sm:$0xff] %v5597_v53  ;;  %v772_v40 = vand.u32 7, %v7174_v46  ;;  %v7181_v46 = vld [vmem:[#allocation64_spill] sm:$0xff] }
 0x69c   : > { %v5543_v21 = vmax.f32 %v2696_v52, %v5522_v3  ;;  %v795_v54 = vmul.u32 8, %v763_v12  ;;  %v835_v35 = vand.u32 7, %v7172_v20  ;;  %v7179_v20 = vld [vmem:[#allocation63_spill] sm:$0xff]  ;;  %v7184_v29 = vand.u32 15, %v7181_v46  ;;  %v7185_v3 = vld [vmem:[#allocation65_spill] sm:$0xff] }
 0x69d   : > { %v2476_v2 = vpop.f32.mrf.mxu0  ;;  %v2589_v23 = vpop.f32.mrf.mxu1 }
 0x69e   : > { %v5551_v50 = vadd.f32 %v2589_v23, %v971_v45  ;;  %v2660_v45 = vmax.f32 %v2658_v30, %v5554_v47  ;;  %v7136_v23 = vand.u32 15, %v7131_v63  ;;  %v5618_v43 = vadd.f32 %v2476_v2, %v970_v56  ;;  %v7187_v47 = vld [vmem:[#allocation66_spill] sm:$0xff] }
 0x69f   : > { %v7194_v6 = vand.u32 15, %v7187_v47 }
 0x6a0   : > { %7125 = vst [vmem:[#allocation29_spill] sm:$0xff] %v5551_v50  ;;  %v2700_v4 = vmax.f32 %v5543_v21, %v5551_v50  ;;  %3410 = vmatmul.msk.f32.gmra.mxu0 %vm1237_vm2, %v5461_v5  ;;  %3443 = vmatmul.msk.f32.gmra.mxu1 %vm1237_vm2, %v5461_v5  ;;  %v5584_v5 = vadd.f32 %v2586_v13, %v969_v57  ;;  %v2323_v11 = vpop.trf.xlu2  ;;  %v827_v21 = vand.u32 7, %v7136_v23  ;;  %v7182_v50 = vshra.s32 %v7181_v46, 4 }
 0x6a1   : > { %v2657_v13 = vmax.f32 %v2655_v7, %v5576_v38  ;;  %v2662_v52 = vmax.f32 %v2660_v45, %v5582_v28  ;;  %v7137_v7 = vld [vmem:[#allocation30_spill] sm:$0xff] }
 0x6a2   : > { %7130 = vst [vmem:[#allocation51_spill] sm:$0xff] %v5584_v5  ;;  %v2699_v18 = vmax.f32 %v2697_v0, %v5584_v5  ;;  %v859_v44 = vadd.s32 %v827_v21, %v795_v54  ;;  %v7138_v30 = vshra.s32 %v7137_v7, 4  ;;  %v7140_v12 = vand.u32 15, %v7137_v7 }
 0x6a3   : > { %v2659_v27 = vmax.f32 %v2657_v13, %v5597_v53  ;;  %v775_v5 = vand.u32 7, %v7182_v50  ;;  %v7186_v50 = vshra.s32 %v7185_v3, 4  ;;  %v7188_v53 = vshra.s32 %v7187_v47, 4 }
 0x6a4   : > { %v764_v17 = vand.u32 7, %v7138_v30  ;;  %vm912_vm8 = vcmp.eq.s32.totalorder %v859_v44, %v5381_v37  ;;  %v828_v45 = vand.u32 7, %v7140_v12  ;;  %vm913_vm9 = vcmp.eq.s32.totalorder %v859_v44, %v5392_v1 }
 0x6a5   : > { %v2479_v62 = vpop.f32.mrf.mxu0  ;;  %v2592_v60 = vpop.f32.mrf.mxu1  ;;  %v976_v56 = vsel %vm912_vm8, 0.0, %v7096_v32 }
 0x6a6   : > { %v5602_v19 = vadd.f32 %v2479_v62, %v972_v61  ;;  %v5604_v31 = vadd.f32 %v2592_v60, %v973_v55  ;;  %v2661_v61 = vmax.f32 %v2659_v27, %v5607_v48  ;;  %v796_v2 = vmul.u32 8, %v764_v17 }
 0x6a7   : > { %v977_v62 = vsel %vm913_vm9, 0.0, %v7096_v32  ;;  %v776_v48 = vand.u32 7, %v7186_v50 }
 0x6a8   : > { %7134 = vst [vmem:[#allocation45_spill] sm:$0xff] %v5604_v31  ;;  %v2664_v41 = vmax.f32 %v2662_v52, %v5602_v19  ;;  %v2701_v57 = vmax.f32 %v2699_v18, %v5604_v31  ;;  %3411 = vmatmul.msk.f32.gmra.mxu0 %vm1237_vm2, %v2322_v14  ;;  %3444 = vmatmul.msk.f32.gmra.mxu1 %vm1237_vm2, %v2322_v14  ;;  %v2324_v13 = vpop.trf.xlu2  ;;  %v7141_v52 = vld [vmem:[#allocation36_spill] sm:$0xff] }
 0x6a9   : > { %v2663_v14 = vmax.f32 %v2661_v61, %v5618_v43  ;;  %v860_v60 = vadd.s32 %v828_v45, %v796_v2  ;;  %v7142_v18 = vshra.s32 %v7141_v52, 4  ;;  %v808_v34 = vmul.u32 8, %v776_v48 }
 0x6ab   : > { %v765_v54 = vand.u32 7, %v7142_v18  ;;  %vm914_vm0 = vcmp.eq.s32.totalorder %v860_v60, %v5381_v37  ;;  %vm915_vm10 = vcmp.eq.s32.totalorder %v860_v60, %v5392_v1 }
 0x6ac   : > { %v978_v17 = vsel %vm914_vm0, 0.0, %v7096_v32  ;;  %v979_v61 = vsel %vm915_vm10, 0.0, %v7096_v32 }
 0x6ad   : > { %v2482_v55 = vpop.f32.mrf.mxu0  ;;  %v2595_v63 = vpop.f32.mrf.mxu1 }
 0x6ae   : > { %v5626_v33 = vadd.f32 %v2482_v55, %v974_v36  ;;  %v5628_v42 = vadd.f32 %v2595_v63, %v975_v10  ;;  %v7144_v36 = vand.u32 15, %v7141_v52  ;;  %v7145_v63 = vld [vmem:[#allocation41_spill] sm:$0xff] }
 0x6b0   : > { %7139 = vst [vmem:[#allocation37_spill] sm:$0xff] %v5628_v42  ;;  %v5634_v0 = vmax.f32 %v2663_v14, %v5626_v33  ;;  %v5637_v58 = vmax.f32 %v2700_v4, %v5628_v42  ;;  %3412 = vmatmul.msk.f32.gmra.mxu0 %vm1237_vm2, %v2323_v11  ;;  %3445 = vmatmul.msk.f32.gmra.mxu1 %vm1237_vm2, %v2323_v11  ;;  %v797_v11 = vmul.u32 8, %v765_v54  ;;  %v829_v10 = vand.u32 7, %v7144_v36  ;;  %v2325_v30 = vpop.trf.xlu2 }
 0x6b1   : > { %v7146_v14 = vshra.s32 %v7145_v63, 4  ;;  %v7180_v42 = vshra.s32 %v7179_v20, 4 }
 0x6b2   : > { %v861_v55 = vadd.s32 %v829_v10, %v797_v11 }
 0x6b3   : > { %v766_v2 = vand.u32 7, %v7146_v14  ;;  %v774_v31 = vand.u32 7, %v7180_v42 }
 0x6b4   : > { %vm916_vm11 = vcmp.eq.s32.totalorder %v861_v55, %v5381_v37  ;;  %vm917_vm12 = vcmp.eq.s32.totalorder %v861_v55, %v5392_v1 }
 0x6b5   : > { %v2485_v23 = vpop.f32.mrf.mxu0  ;;  %v2598_v21 = vpop.f32.mrf.mxu1  ;;  %v980_v18 = vsel %vm916_vm11, 0.0, %v7096_v32  ;;  %v981_v54 = vsel %vm917_vm12, 0.0, %v7096_v32 }
 0x6b6   : > { %v5646_v27 = vadd.f32 %v2485_v23, %v976_v56  ;;  %v5648_v4 = vadd.f32 %v2598_v21, %v977_v62  ;;  %v7148_v56 = vand.u32 15, %v7145_v63  ;;  %v7149_v21 = vld [vmem:[#allocation44_spill] sm:$0xff] }
 0x6b7   : > { %v7150_v11 = vshra.s32 %v7149_v21, 4  ;;  %v7152_v55 = vand.u32 15, %v7149_v21 }
 0x6b8   : > { %7143 = vst [vmem:[#allocation21_spill] sm:$0xff] %v5648_v4  ;;  %v5654_v44 = vmax.f32 %v2664_v41, %v5646_v27  ;;  %v5657_v7 = vmax.f32 %v2701_v57, %v5648_v4  ;;  %3413 = vmatmul.msk.f32.gmra.mxu0 %vm1237_vm2, %v2324_v13  ;;  %3446 = vmatmul.msk.f32.gmra.mxu1 %vm1237_vm2, %v2324_v13  ;;  %v798_v13 = vmul.u32 8, %v766_v2  ;;  %v830_v62 = vand.u32 7, %v7148_v56  ;;  %v2326_v10 = vpop.trf.xlu2  ;;  %v7153_v56 = vld [vmem:[#allocation47_spill] sm:$0xff] }
 0x6b9   : > { %v767_v36 = vand.u32 7, %v7150_v11  ;;  %v831_v63 = vand.u32 7, %v7152_v55  ;;  %v7158_v55 = vld [vmem:[#allocation50_spill] sm:$0xff] }
 0x6ba   : > { %v862_v23 = vadd.s32 %v830_v62, %v798_v13  ;;  %v7154_v62 = vshra.s32 %v7153_v56, 4 }
 0x6bc   : > { %vm918_vm13 = vcmp.eq.s32.totalorder %v862_v23, %v5381_v37  ;;  %vm919_vm14 = vcmp.eq.s32.totalorder %v862_v23, %v5392_v1 }
 0x6bd   : > { %v2488_v41 = vpop.f32.mrf.mxu0  ;;  %v2601_v12 = vpop.f32.mrf.mxu1 }
 0x6be   : > { %v5666_v45 = vadd.f32 %v2488_v41, %v978_v17  ;;  %v5668_v57 = vadd.f32 %v2601_v12, %v979_v61  ;;  %v982_v41 = vsel %vm918_vm13, 0.0, %v7096_v32  ;;  %v983_v12 = vsel %vm919_vm14, 0.0, %v7096_v32 }
 0x6c0   : > { %7147 = vst [vmem:[#allocation39_spill] sm:$0xff] %v5668_v57  ;;  %v2667_v60 = vmax.f32 %v5634_v0, %v5666_v45  ;;  %v2704_v52 = vmax.f32 %v5637_v58, %v5668_v57  ;;  %3414 = vmatmul.msk.f32.gmra.mxu0 %vm1237_vm2, %v2325_v30  ;;  %3447 = vmatmul.msk.f32.gmra.mxu1 %vm1237_vm2, %v2325_v30  ;;  %v799_v30 = vmul.u32 8, %v767_v36  ;;  %v7177_v57 = vand.u32 15, %v7173_v39 }
 0x6c1   : > { %v7183_v39 = vand.u32 15, %v7179_v20 }
 0x6c2   : > { %v863_v13 = vadd.s32 %v831_v63, %v799_v30  ;;  %v7159_v63 = vshra.s32 %v7158_v55, 4  ;;  %v836_v4 = vand.u32 7, %v7177_v57  ;;  %v807_v57 = vmul.u32 8, %v775_v5  ;;  %v7189_v5 = vld [vmem:[#allocation67_spill] sm:$0xff] }
 0x6c4   : > { %vm920_vm15 = vcmp.eq.s32.totalorder %v863_v13, %v5381_v37  ;;  %vm921_vm3 = vcmp.eq.s32.totalorder %v863_v13, %v5392_v1 }
 0x6c5   : > { %v2491_v17 = vpop.f32.mrf.mxu0  ;;  %v2604_v0 = vpop.f32.mrf.mxu1  ;;  %v985_v30 = vsel %vm921_vm3, 0.0, %v7096_v32 }
 0x6c6   : > { %v5684_v61 = vadd.f32 %v2491_v17, %v980_v18  ;;  %v5686_v58 = vadd.f32 %v2604_v0, %v981_v54  ;;  %v768_v18 = vand.u32 7, %v7154_v62  ;;  %v984_v0 = vsel %vm920_vm15, 0.0, %v7096_v32 }
 0x6c8   : > { %7151 = vst [vmem:[#allocation32_spill] sm:$0xff] %v5686_v58  ;;  %v2668_v14 = vmax.f32 %v5654_v44, %v5684_v61  ;;  %v2705_v2 = vmax.f32 %v5657_v7, %v5686_v58  ;;  %3415 = vmatmul.msk.f32.gmra.mxu0 %vm1237_vm2, %v2326_v10  ;;  %3448 = vmatmul.msk.f32.gmra.mxu1 %vm1237_vm2, %v2326_v10  ;;  %v800_v36 = vmul.u32 8, %v768_v18  ;;  %v7157_v10 = vand.u32 15, %v7153_v56 }
 0x6c9   : > { %v804_v58 = vmul.u32 8, %v772_v40  ;;  %v806_v40 = vmul.u32 8, %v774_v31 }
 0x6ca   : > { %v832_v17 = vand.u32 7, %v7157_v10 }
 0x6cd   : > { %v2494_v54 = vpop.f32.mrf.mxu0  ;;  %v2607_v21 = vpop.f32.mrf.mxu1 }
 0x6ce   : > { %v5702_v44 = vadd.f32 %v2494_v54, %v982_v41  ;;  %v5704_v11 = vadd.f32 %v2607_v21, %v983_v12  ;;  %v769_v41 = vand.u32 7, %v7159_v63  ;;  %v864_v12 = vadd.s32 %v832_v17, %v800_v36 }
 0x6d0   : > { %7155 = vst [vmem:[#allocation12_spill] sm:$0xff] %v5702_v44  ;;  %v2669_v7 = vmax.f32 %v2667_v60, %v5702_v44  ;;  %v2706_v23 = vmax.f32 %v2704_v52, %v5704_v11  ;;  %v801_v60 = vmul.u32 8, %v769_v41  ;;  %v7162_v52 = vand.u32 15, %v7158_v55 }
 0x6d1   : > { %7156 = vst [vmem:[#allocation58_spill] sm:$0xff] %v5704_v11  ;;  %vm922_vm4 = vcmp.eq.s32.totalorder %v864_v12, %v5381_v37  ;;  %vm923_vm5 = vcmp.eq.s32.totalorder %v864_v12, %v5392_v1  ;;  %v867_v11 = vadd.s32 %v835_v35, %v803_v15  ;;  %v838_v15 = vand.u32 7, %v7183_v39 }
 0x6d2   : > { %v833_v18 = vand.u32 7, %v7162_v52  ;;  %v986_v36 = vsel %vm922_vm4, 0.0, %v7096_v32  ;;  %v987_v17 = vsel %vm923_vm5, 0.0, %v7096_v32 }
 0x6d3   : > { %vm928_vm0 = vcmp.eq.s32.totalorder %v867_v11, %v5381_v37  ;;  %vm929_vm10 = vcmp.eq.s32.totalorder %v867_v11, %v5392_v1  ;;  %v777_v11 = vand.u32 7, %v7188_v53  ;;  %v870_v39 = vadd.s32 %v838_v15, %v806_v40 }
 0x6d4   : > { %v993_v31 = vsel %vm929_vm10, 0.0, %v7096_v32  ;;  %v7193_v53 = vand.u32 15, %v7185_v3  ;;  %v7197_v40 = vand.u32 15, %v7189_v5 }
 0x6d5   : > { %v2497_v62 = vpop.f32.mrf.mxu0  ;;  %v2610_v54 = vpop.f32.mrf.mxu1  ;;  %v809_v38 = vmul.u32 8, %v777_v11  ;;  %v7199_v11 = vld [vmem:[#allocation70_spill] sm:$0xff]  ;;  %vm934_vm15 = vcmp.eq.s32.totalorder %v870_v39, %v5381_v37  ;;  %vm935_vm3 = vcmp.eq.s32.totalorder %v870_v39, %v5392_v1 }
 0x6d6   : > { %v5716_v21 = vadd.f32 %v2497_v62, %v984_v0  ;;  %v5718_v13 = vadd.f32 %v2610_v54, %v985_v30  ;;  %v865_v0 = vadd.s32 %v833_v18, %v801_v60  ;;  %v7163_v30 = vld [vmem:[#allocation53_spill] sm:$0xff]  ;;  %v840_v50 = vand.u32 7, %v7193_v53 }
 0x6d7   : > { %v7164_v63 = vshra.s32 %v7163_v30, 4  ;;  %v7167_v60 = vand.u32 15, %v7163_v30  ;;  %v842_v15 = vand.u32 7, %v7197_v40  ;;  %v7200_v47 = vshra.s32 %v7199_v11, 4 }
 0x6d8   : > { %7160 = vst [vmem:[#allocation40_spill] sm:$0xff] %v5716_v21  ;;  %v5723_v56 = vmax.f32 %v2668_v14, %v5716_v21  ;;  %v5726_v10 = vmax.f32 %v2705_v2, %v5718_v13  ;;  %vm924_vm6 = vcmp.eq.s32.totalorder %v865_v0, %v5381_v37  ;;  %vm925_vm7 = vcmp.eq.s32.totalorder %v865_v0, %v5392_v1 }
 0x6d9   : > { %7161 = vst [vmem:[#allocation34_spill] sm:$0xff] %v5718_v13  ;;  %v770_v41 = vand.u32 7, %v7164_v63  ;;  %v834_v18 = vand.u32 7, %v7167_v60  ;;  %v988_v63 = vsel %vm924_vm6, 0.0, %v7096_v32  ;;  %v989_v59 = vsel %vm925_vm7, 0.0, %v7096_v32 }
 0x6da   : > { %v872_v53 = vadd.s32 %v840_v50, %v808_v34 }
 0x6db   : > { %v802_v52 = vmul.u32 8, %v770_v41 }
 0x6dc   : > { %vm938_vm6 = vcmp.eq.s32.totalorder %v872_v53, %v5381_v37  ;;  %vm939_vm7 = vcmp.eq.s32.totalorder %v872_v53, %v5392_v1 }
 0x6dd   : > { %v2500_v55 = vpop.f32.mrf.mxu0  ;;  %v2613_v62 = vpop.f32.mrf.mxu1 }
 0x6de   : > { %v5734_v54 = vadd.f32 %v2500_v55, %v986_v36  ;;  %v5736_v14 = vadd.f32 %v2613_v62, %v987_v17  ;;  %v866_v36 = vadd.s32 %v834_v18, %v802_v52 }
 0x6e0   : > { %7165 = vst [vmem:[#allocation3_spill] sm:$0xff] %v5734_v54  ;;  %v2671_v2 = vmax.f32 %v2669_v7, %v5734_v54  ;;  %v2708_v12 = vmax.f32 %v2706_v23, %v5736_v14  ;;  %vm926_vm8 = vcmp.eq.s32.totalorder %v866_v36, %v5381_v37  ;;  %vm927_vm9 = vcmp.eq.s32.totalorder %v866_v36, %v5392_v1 }
 0x6e1   : > { %7166 = vst [vmem:[#allocation2_spill] sm:$0xff] %v5736_v14  ;;  %v990_v0 = vsel %vm926_vm8, 0.0, %v7096_v32  ;;  %v991_v30 = vsel %vm927_vm9, 0.0, %v7096_v32 }
 0x6e5   : > { %v2503_v55 = vpop.f32.mrf.mxu0  ;;  %v2616_v17 = vpop.f32.mrf.mxu1 }
 0x6e6   : > { %v5746_v62 = vadd.f32 %v2503_v55, %v988_v63  ;;  %v5748_v26 = vadd.f32 %v2616_v17, %v989_v59 }
 0x6e8   : > { %v7204_v39 = vmax.f32 %v5726_v10, %v5748_v26  ;;  %v1002_v10 = vsel %vm938_vm6, 0.0, %v7096_v32 }
 0x6ed   : > { %v2506_v41 = vpop.f32.mrf.mxu0  ;;  %v2619_v52 = vpop.f32.mrf.mxu1 }
 0x6ee   : > { %v5758_v60 = vadd.f32 %v2506_v41, %v990_v0  ;;  %v5760_v59 = vadd.f32 %v2619_v52, %v991_v30 }
 0x6f0   : > { %7168 = vst [vmem:[#allocation5_spill] sm:$0xff] %v5758_v60  ;;  %v5763_v18 = vmax.f32 %v2671_v2, %v5758_v60  ;;  %v5766_v63 = vmax.f32 %v2708_v12, %v5760_v59  ;;  %v841_v60 = vand.u32 7, %v7194_v6  ;;  %v781_v6 = vand.u32 7, %v7200_v47 }
 0x6f1   : > { %7169 = vst [vmem:[#allocation4_spill] sm:$0xff] %v5760_v59  ;;  %v773_v59 = vand.u32 7, %v7176_v9  ;;  %v868_v9 = vadd.s32 %v836_v4, %v804_v58  ;;  %v992_v4 = vsel %vm928_vm0, 0.0, %v7096_v32  ;;  %v7190_v58 = vshra.s32 %v7189_v5, 4 }
 0x6f3   : > { %v805_v24 = vmul.u32 8, %v773_v59  ;;  %v839_v59 = vand.u32 7, %v7184_v29  ;;  %vm930_vm11 = vcmp.eq.s32.totalorder %v868_v9, %v5381_v37  ;;  %vm931_vm12 = vcmp.eq.s32.totalorder %v868_v9, %v5392_v1 }
 0x6f4   : > { %v7196_v9 = vshra.s32 %v7195_v25, 4  ;;  %v995_v21 = vsel %vm931_vm12, 0.0, %v7096_v32 }
 0x6f5   : > { %v5768_v55 = vpop.f32.mrf.mxu0  ;;  %v5770_v17 = vpop.f32.mrf.mxu1  ;;  %v869_v35 = vadd.s32 %v837_v49, %v805_v24  ;;  %v778_v24 = vand.u32 7, %v7190_v58  ;;  %v7191_v49 = vld [vmem:[#allocation68_spill] sm:$0xff]  ;;  %v871_v29 = vadd.s32 %v839_v59, %v807_v57  ;;  %v994_v58 = vsel %vm930_vm11, 0.0, %v7096_v32 }
 0x6f6   : > { %v7192_v20 = vshra.s32 %v7191_v49, 4  ;;  %v780_v54 = vand.u32 7, %v7196_v9  ;;  %v7198_v48 = vand.u32 15, %v7191_v49  ;;  %v7201_v9 = vand.u32 15, %v7195_v25 }
 0x6f7   : > { %vm932_vm13 = vcmp.eq.s32.totalorder %v869_v35, %v5381_v37  ;;  %vm933_vm14 = vcmp.eq.s32.totalorder %v869_v35, %v5392_v1  ;;  %v810_v57 = vmul.u32 8, %v778_v24  ;;  %vm936_vm4 = vcmp.eq.s32.totalorder %v871_v29, %v5381_v37 }
 0x6f8   : > { %v779_v46 = vand.u32 7, %v7192_v20  ;;  %v843_v59 = vand.u32 7, %v7198_v48  ;;  %v996_v20 = vsel %vm932_vm13, 0.0, %v7096_v32  ;;  %v873_v24 = vadd.s32 %v841_v60, %v809_v38 }
 0x6f9   : > { %v812_v49 = vmul.u32 8, %v780_v54  ;;  %v844_v40 = vand.u32 7, %v7201_v9  ;;  %v5861_v48 = vadd.f32 %v5768_v55, %v992_v4  ;;  %v5864_v47 = vadd.f32 %v5770_v17, %v993_v31 }
 0x6fa   : > { %v811_v3 = vmul.u32 8, %v779_v46  ;;  %v997_v44 = vsel %vm933_vm14, 0.0, %v7096_v32  ;;  %vm937_vm5 = vcmp.eq.s32.totalorder %v871_v29, %v5392_v1  ;;  %v874_v34 = vadd.s32 %v842_v15, %v810_v57 }
 0x6fb   : > { %v813_v60 = vmul.u32 8, %v781_v6  ;;  %v7202_v54 = vand.u32 15, %v7199_v11  ;;  %v998_v55 = vsel %vm934_vm15, 0.0, %v7096_v32  ;;  %v999_v17 = vsel %vm935_vm3, 0.0, %v7096_v32 }
 0x6fc   : > { %v875_v38 = vadd.s32 %v843_v59, %v811_v3  ;;  %v1000_v35 = vsel %vm936_vm4, 0.0, %v7096_v32  ;;  %vm940_vm8 = vcmp.eq.s32.totalorder %v873_v24, %v5381_v37  ;;  %v7203_v4 = vmax.f32 %v5723_v56, %v5746_v62 }
 0x6fd   : > { %v5772_v36 = vpop.f32.mrf.mxu0  ;;  %v5774_v23 = vpop.f32.mrf.mxu1  ;;  %v845_v50 = vand.u32 7, %v7202_v54  ;;  %v1001_v57 = vsel %vm937_vm5, 0.0, %v7096_v32  ;;  %vm942_vm9 = vcmp.eq.s32.totalorder %v874_v34, %v5381_v37  ;;  %v1004_v11 = vsel %vm940_vm8, 0.0, %v7096_v32 }
 0x6fe   : > { %v5873_v25 = vadd.f32 %v5772_v36, %v994_v58  ;;  %v876_v36 = vadd.s32 %v844_v40, %v812_v49  ;;  %v2674_v31 = vmax.f32 %v7203_v4, %v5861_v48  ;;  %v2711_v58 = vmax.f32 %v7204_v39, %v5864_v47 }
 0x6ff   : > { %v5902_v3 = vadd.f32 %v5774_v23, %v995_v21  ;;  %vm944_vm0 = vcmp.eq.s32.totalorder %v875_v38, %v5381_v37  ;;  %v877_v56 = vadd.s32 %v845_v50, %v813_v60  ;;  %vm941_vm10 = vcmp.eq.s32.totalorder %v873_v24, %v5392_v1 }
 0x700   : > { %v2675_v59 = vmax.f32 %v5763_v18, %v5873_v25  ;;  %vm946_vm11 = vcmp.eq.s32.totalorder %v876_v36, %v5381_v37  ;;  %v1008_v53 = vsel %vm944_vm0, 0.0, %v7096_v32  ;;  %vm943_vm12 = vcmp.eq.s32.totalorder %v874_v34, %v5392_v1 }
 0x701   : > { %vm948_vm13 = vcmp.eq.s32.totalorder %v877_v56, %v5381_v37  ;;  %vm945_vm14 = vcmp.eq.s32.totalorder %v875_v38, %v5392_v1  ;;  %vm947_vm15 = vcmp.eq.s32.totalorder %v876_v36, %v5392_v1  ;;  %vm949_vm3 = vcmp.eq.s32.totalorder %v877_v56, %v5392_v1 }
 0x702   : > { %v1012_v34 = vsel %vm948_vm13, 0.0, %v7096_v32  ;;  %v1009_v54 = vsel %vm945_vm14, 0.0, %v7096_v32  ;;  %v1011_v4 = vsel %vm947_vm15, 0.0, %v7096_v32 }
 0x705   : > { %v5776_v7 = vpop.f32.mrf.mxu0  ;;  %v5778_v0 = vpop.f32.mrf.mxu1 }
 0x706   : > { %v5896_v15 = vadd.f32 %v5776_v7, %v996_v20  ;;  %v1003_v7 = vsel %vm939_vm7, 0.0, %v7096_v32  ;;  %v5921_v18 = vadd.f32 %v5778_v0, %v997_v44  ;;  %v1006_v20 = vsel %vm942_vm9, 0.0, %v7096_v32 }
 0x707   : > { %v1005_v44 = vsel %vm941_vm10, 0.0, %v7096_v32  ;;  %v1010_v0 = vsel %vm946_vm11, 0.0, %v7096_v32 }
 0x708   : > { %v2676_v23 = vmax.f32 %v2674_v31, %v5896_v15 }
 0x70d   : > { %v5780_v30 = vpop.f32.mrf.mxu0  ;;  %v5782_v41 = vpop.f32.mrf.mxu1 }
 0x70e   : > { %v5912_v29 = vadd.f32 %v5780_v30, %v998_v55  ;;  %v5934_v24 = vadd.f32 %v5782_v41, %v999_v17  ;;  %v1007_v41 = vsel %vm943_vm12, 0.0, %v7096_v32 }
 0x715   : > { %v5784_v2 = vpop.f32.mrf.mxu0  ;;  %v5786_v12 = vpop.f32.mrf.mxu1 }
 0x716   : > { %v5915_v21 = vadd.f32 %v5784_v2, %v1000_v35  ;;  %v5947_v37 = vadd.f32 %v5786_v12, %v1001_v57  ;;  %v2713_v12 = vmax.f32 %v2711_v58, %v5921_v18 }
 0x718   : > { %v2678_v9 = vmax.f32 %v2676_v23, %v5915_v21 }
 0x71d   : > { %v5788_v52 = vpop.f32.mrf.mxu0  ;;  %v5790_v51 = vpop.f32.mrf.mxu1 }
 0x71e   : > { %v5926_v49 = vadd.f32 %v5788_v52, %v1002_v10  ;;  %v2677_v52 = vmax.f32 %v2675_v59, %v5912_v29 }
 0x720   : > { %v2679_v38 = vmax.f32 %v2677_v52, %v5926_v49 }
 0x725   : > { %v5800_v14 = vpop.f32.mrf.mxu0  ;;  %v5802_v13 = vpop.f32.mrf.mxu1 }
 0x726   : > { %v5929_v30 = vadd.f32 %v5800_v14, %v1004_v11  ;;  %v5964_v55 = vadd.f32 %v5802_v13, %v1005_v44 }
 0x728   : > { %v2680_v60 = vmax.f32 %v2678_v9, %v5929_v30 }
 0x72d   : > { %v5818_v22 = vpop.f32.mrf.mxu0  ;;  %v5820_v42 = vpop.f32.mrf.mxu1 }
 0x72e   : > { %v5942_v14 = vadd.f32 %v5818_v22, %v1006_v20  ;;  %v2712_v22 = vmax.f32 %v5766_v63, %v5902_v3  ;;  %v2715_v63 = vmax.f32 %v2713_v12, %v5947_v37  ;;  %v5974_v58 = vadd.f32 %v5820_v42, %v1007_v41 }
 0x730   : > { %v2681_v35 = vmax.f32 %v2679_v38, %v5942_v14  ;;  %v2714_v39 = vmax.f32 %v2712_v22, %v5934_v24  ;;  %v2717_v10 = vmax.f32 %v2715_v63, %v5964_v55  ;;  %v7208_v63 = vld [vmem:[#allocation55_spill] sm:$0xff] }
 0x735   : > { %v2533_v5 = vpop.f32.mrf.mxu0  ;;  %v5856_v46 = vpop.f32.mrf.mxu1 }
 0x736   : > { %v5944_v40 = vadd.f32 %v2533_v5, %v1008_v53  ;;  %v5961_v5 = vadd.f32 %v5790_v51, %v1003_v7  ;;  %v5977_v51 = vadd.f32 %v5856_v46, %v1009_v54 }
 0x738   : > { %v2682_v36 = vmax.f32 %v2680_v60, %v5944_v40  ;;  %v2716_v59 = vmax.f32 %v2714_v39, %v5961_v5  ;;  %v2719_v46 = vmax.f32 %v2717_v10, %v5977_v51  ;;  %v7210_v10 = vld [vmem:[#allocation49_spill] sm:$0xff]  ;;  %v7231_v39 = vld [vmem:[#allocation32_spill] sm:$0xff] }
 0x73a   : > { %v2718_v23 = vmax.f32 %v2716_v59, %v5974_v58 }
 0x73d   : > { %v2536_v6 = vpop.f32.mrf.mxu0  ;;  %v2649_v2 = vpop.f32.mrf.mxu1 }
 0x73e   : > { %v5955_v50 = vadd.f32 %v2536_v6, %v1010_v0  ;;  %v5983_v7 = vadd.f32 %v2649_v2, %v1011_v4  ;;  %v1013_v6 = vsel %vm949_vm3, 0.0, %v7096_v32 }
 0x740   : > { %v2683_v13 = vmax.f32 %v2681_v35, %v5955_v50  ;;  %v2720_v44 = vmax.f32 %v2718_v23, %v5983_v7  ;;  %v7235_v35 = vld [vmem:[#allocation4_spill] sm:$0xff] }
 0x745   : > { %v2539_v17 = vpop.f32.mrf.mxu0  ;;  %v2652_v42 = vpop.f32.mrf.mxu1 }
 0x746   : > { %v5969_v31 = vadd.f32 %v2539_v17, %v1012_v34  ;;  %v5989_v20 = vadd.f32 %v2652_v42, %v1013_v6 }
 0x748   : > { %v2684_v57 = vmax.f32 %v2682_v36, %v5969_v31  ;;  %v2721_v0 = vmax.f32 %v2719_v46, %v5989_v20 }
 0x74a   : > { %v2685_v11 = vmax.f32 %v2683_v13, %v2684_v57  ;;  %v2722_v2 = vmax.f32 %v2720_v44, %v2721_v0  ;;  %v7209_v57 = vld [vmem:[#allocation5_spill] sm:$0xff]  ;;  %v7214_v0 = vld [vmem:[#allocation35_spill] sm:$0xff] }
 0x74c   : > { %v2686_v53 = vrot.slane %v2685_v11, 4  ;;  %v2723_v34 = vrot.slane %v2722_v2, 4 }
 0x74e   : > { %v2687_v52 = vmax.f32 %v2685_v11, %v2686_v53  ;;  %v2724_v23 = vmax.f32 %v2722_v2, %v2723_v34  ;;  %v7212_v2 = vld [vmem:[#allocation59_spill] sm:$0xff]  ;;  %v7213_v53 = vld [vmem:[#allocation48_spill] sm:$0xff] }
 0x750   : > { %v2688_v9 = vrot.slane %v2687_v52, 2  ;;  %v2725_v46 = vrot.slane %v2724_v23, 2 }
 0x752   : > { %v2689_v41 = vmax.f32 %v2687_v52, %v2688_v9  ;;  %v2726_v6 = vmax.f32 %v2724_v23, %v2725_v46 }
 0x754   : > { %v2690_v1 = vrot.slane %v2689_v41, 1 }
 0x756   : > { %v5993_v56 = vmax.f32 %v2689_v41, %v2690_v1  ;;  %v7211_v41 = vld [vmem:[#allocation54_spill] sm:$0xff] }
 0x758   : > { %v2729_v32 = vsub.f32 %v5455_v8, %v5993_v56  ;;  %v2731_v38 = vsub.f32 %v5482_v16, %v5993_v56  ;;  %v2747_v60 = vsub.f32 %v5582_v28, %v5993_v56  ;;  %v2749_v54 = vsub.f32 %v5618_v43, %v5993_v56  ;;  %v7205_v28 = vld [vmem:[#allocation12_spill] sm:$0xff]  ;;  %v7234_v16 = vld [vmem:[#allocation2_spill] sm:$0xff] }
 0x759   : > { %v2751_v22 = vsub.f32 %v5602_v19, %v5993_v56  ;;  %v2753_v12 = vsub.f32 %v5626_v33, %v5993_v56  ;;  %v2755_v17 = vsub.f32 %v5646_v27, %v5993_v56  ;;  %v7206_v43 = vld [vmem:[#allocation40_spill] sm:$0xff]  ;;  %v7207_v19 = vld [vmem:[#allocation3_spill] sm:$0xff]  ;;  %v2733_v13 = vsub.f32 %v7208_v63, %v5993_v56  ;;  %v7233_v33 = vld [vmem:[#allocation34_spill] sm:$0xff] }
 0x75a   : > { %v2735_v11 = vsub.f32 %v7210_v10, %v5993_v56  ;;  %v2793_v52 = vmul.f32 1.442695, %v2729_v32  ;;  %v2797_v9 = vmul.f32 1.442695, %v2731_v38  ;;  %v2737_v1 = vsub.f32 %v7211_v41, %v5993_v56  ;;  %v7238_v27 = vld [vmem:[#allocation31_spill] sm:$0xff] }
 0x75b   : > { %v2801_v63 = vmul.f32 1.442695, %v2733_v13  ;;  %v2739_v34 = vsub.f32 %v7212_v2, %v5993_v56  ;;  %v2741_v42 = vsub.f32 %v7213_v53, %v5993_v56  ;;  %v2743_v32 = vsub.f32 %v7214_v0, %v5993_v56 }
 0x75c   : > { %3603 = vpow2.f32 %v2793_v52  ;;  %v2805_v10 = vmul.f32 1.442695, %v2735_v11  ;;  %v2809_v44 = vmul.f32 1.442695, %v2737_v1  ;;  %v7217_v52 = vld [vmem:[#allocation42_spill] sm:$0xff]  ;;  %v2727_v0 = vrot.slane %v2726_v6, 1 }
 0x75d   : > { %3605 = vpow2.f32 %v2797_v9  ;;  %v2813_v38 = vmul.f32 1.442695, %v2739_v34  ;;  %v2745_v9 = vsub.f32 %v7217_v52, %v5993_v56  ;;  %v2817_v11 = vmul.f32 1.442695, %v2741_v42 }
 0x75e   : > { %3607 = vpow2.f32 %v2801_v63  ;;  %v2821_v1 = vmul.f32 1.442695, %v2743_v32  ;;  %v2829_v42 = vmul.f32 1.442695, %v2747_v60  ;;  %v2833_v32 = vmul.f32 1.442695, %v2749_v54 }
 0x75f   : > { %3609 = vpow2.f32 %v2805_v10  ;;  %v2825_v46 = vmul.f32 1.442695, %v2745_v9  ;;  %v6061_v10 = vmax.f32 %v2726_v6, %v2727_v0  ;;  %v7225_v60 = vld [vmem:[#allocation29_spill] sm:$0xff]  ;;  %v7237_v4 = vsub.f32 %v5684_v61, %v5993_v56 }
 0x760   : > { %3611 = vpow2.f32 %v2809_v44  ;;  %v7227_v54 = vld [vmem:[#allocation37_spill] sm:$0xff]  ;;  %v7240_v61 = vsub.f32 %v7205_v28, %v5993_v56  ;;  %v7243_v28 = vld [vmem:[#allocation52_spill] sm:$0xff] }
 0x761   : > { %3613 = vpow2.f32 %v2813_v38  ;;  %v2837_v38 = vmul.f32 1.442695, %v2751_v22  ;;  %v7228_v6 = vld [vmem:[#allocation21_spill] sm:$0xff]  ;;  %v7232_v22 = vld [vmem:[#allocation58_spill] sm:$0xff] }
 0x762   : > { %v6047_v41 = vpop.eup %3603  ;;  %3615 = vpow2.f32 %v2817_v11  ;;  %v7222_v11 = vld [vmem:[#allocation57_spill] sm:$0xff] }
 0x763   : > { %7215 = vst [vmem:[#allocation6_spill] sm:$0xff] %v6047_v41  ;;  %v6049_v13 = vpop.eup %3605  ;;  %3617 = vpow2.f32 %v2821_v1 }
 0x764   : > { %7216 = vst [vmem:[#allocation8_spill] sm:$0xff] %v6049_v13  ;;  %v2921_v53 = vadd.f32 %v6049_v13, %v6047_v41  ;;  %v6055_v63 = vpop.eup %3607  ;;  %3619 = vpow2.f32 %v2825_v46  ;;  %v2841_v46 = vmul.f32 1.442695, %v2753_v12 }
 0x765   : > { %7218 = vst [vmem:[#allocation7_spill] sm:$0xff] %v6055_v63  ;;  %v6058_v23 = vpop.eup %3609  ;;  %3621 = vpow2.f32 %v2829_v42  ;;  %v7229_v42 = vld [vmem:[#allocation39_spill] sm:$0xff] }
 0x766   : > { %v2922_v2 = vadd.f32 %v6055_v63, %v2921_v53  ;;  %7219 = vst [vmem:[#allocation9_spill] sm:$0xff] %v6058_v23  ;;  %v6063_v44 = vpop.eup %3611  ;;  %3623 = vpow2.f32 %v2833_v32  ;;  %v2845_v32 = vmul.f32 1.442695, %v2755_v17  ;;  %v2730_v17 = vsub.f32 %v7238_v27, %v6061_v10 }
 0x767   : > { %7220 = vst [vmem:[#allocation10_spill] sm:$0xff] %v6063_v44  ;;  %v6066_v59 = vpop.eup %3613  ;;  %3625 = vpow2.f32 %v2837_v38  ;;  %v2853_v38 = vmul.f32 1.442695, %v7237_v4  ;;  %v2857_v4 = vmul.f32 1.442695, %v7240_v61  ;;  %v2736_v61 = vsub.f32 %v7243_v28, %v6061_v10 }
 0x768   : > { %v2923_v34 = vadd.f32 %v6058_v23, %v2922_v2  ;;  %7221 = vst [vmem:[#allocation14_spill] sm:$0xff] %v6066_v59  ;;  %v7223_v2 = vld [vmem:[#allocation51_spill] sm:$0xff]  ;;  %v6073_v0 = vpop.eup %3615  ;;  %3627 = vpow2.f32 %v2841_v46 }
 0x769   : > { %7224 = vst [vmem:[#allocation11_spill] sm:$0xff] %v6073_v0  ;;  %v6089_v36 = vpop.eup %3617  ;;  %3629 = vpow2.f32 %v2845_v32  ;;  %v7241_v32 = vsub.f32 %v7206_v43, %v5993_v56 }
 0x76a   : > { %v2924_v52 = vadd.f32 %v6063_v44, %v2923_v34  ;;  %v7226_v34 = vld [vmem:[#allocation45_spill] sm:$0xff]  ;;  %7230 = vst [vmem:[#allocation25_spill] sm:$0xff] %v6089_v36  ;;  %v6102_v8 = vpop.eup %3619  ;;  %v2795_v44 = vmul.f32 1.442695, %v2730_v17 }
 0x76b   : > { %v6110_v41 = vpop.eup %3621  ;;  %v2861_v27 = vmul.f32 1.442695, %v7241_v32 }
 0x76c   : > { %v2925_v53 = vadd.f32 %v6066_v59, %v2924_v52  ;;  %v6121_v63 = vpop.eup %3623 }
 0x76e   : > { %v2926_v52 = vadd.f32 %v6073_v0, %v2925_v53 }
 0x770   : > { %v2927_v53 = vadd.f32 %v6089_v36, %v2926_v52  ;;  %v7236_v52 = vsub.f32 %v5666_v45, %v5993_v56 }
 0x772   : > { %v2928_v12 = vadd.f32 %v6102_v8, %v2927_v53  ;;  %v2849_v9 = vmul.f32 1.442695, %v7236_v52  ;;  %v7239_v53 = vld [vmem:[#allocation38_spill] sm:$0xff]  ;;  %v6133_v52 = vpop.eup %3625 }
 0x773   : > { %v2732_v1 = vsub.f32 %v7239_v53, %v6061_v10  ;;  %v7242_v53 = vld [vmem:[#allocation22_spill] sm:$0xff]  ;;  %v6141_v45 = vpop.eup %3627 }
 0x774   : > { %v2929_v13 = vadd.f32 %v6110_v41, %v2928_v12  ;;  %3631 = vpow2.f32 %v2849_v9  ;;  %v2734_v23 = vsub.f32 %v7242_v53, %v6061_v10  ;;  %v7244_v9 = vsub.f32 %v7207_v19, %v5993_v56  ;;  %v6149_v32 = vpop.eup %3629 }
 0x775   : > { %3633 = vpow2.f32 %v2853_v38  ;;  %v2771_v38 = vsub.f32 %v5861_v48, %v5993_v56  ;;  %v7248_v48 = vsub.f32 %v7209_v57, %v5993_v56 }
 0x776   : > { %v2930_v12 = vadd.f32 %v6121_v63, %v2929_v13  ;;  %v2799_v13 = vmul.f32 1.442695, %v2732_v1  ;;  %3635 = vpow2.f32 %v2857_v4  ;;  %v2865_v59 = vmul.f32 1.442695, %v7244_v9 }
 0x777   : > { %3637 = vpow2.f32 %v2861_v27  ;;  %v2803_v53 = vmul.f32 1.442695, %v2734_v23  ;;  %v7246_v1 = vsub.f32 %v5746_v62, %v5993_v56  ;;  %v2807_v27 = vmul.f32 1.442695, %v2736_v61 }
 0x778   : > { %v2931_v46 = vadd.f32 %v6133_v52, %v2930_v12  ;;  %v7245_v12 = vld [vmem:[#allocation43_spill] sm:$0xff]  ;;  %3639 = vpow2.f32 %v2795_v44  ;;  %v2773_v23 = vsub.f32 %v5873_v25, %v5993_v56  ;;  %v7249_v44 = vld [vmem:[#allocation46_spill] sm:$0xff]  ;;  %v2775_v61 = vsub.f32 %v5896_v15, %v5993_v56 }
 0x779   : > { %v2738_v17 = vsub.f32 %v7245_v12, %v6061_v10  ;;  %v2869_v4 = vmul.f32 1.442695, %v7246_v1  ;;  %3641 = vpow2.f32 %v2799_v13  ;;  %v2873_v12 = vmul.f32 1.442695, %v7248_v48  ;;  %v7250_v13 = vld [vmem:[#allocation56_spill] sm:$0xff] }
 0x77a   : > { %v2932_v43 = vadd.f32 %v6141_v45, %v2931_v46  ;;  %v6159_v19 = vpop.eup %3631  ;;  %v7247_v46 = vld [vmem:[#allocation33_spill] sm:$0xff]  ;;  %3643 = vpow2.f32 %v2865_v59  ;;  %v2877_v25 = vmul.f32 1.442695, %v2771_v38  ;;  %v2779_v38 = vsub.f32 %v5915_v21, %v5993_v56 }
 0x77b   : > { %v2740_v9 = vsub.f32 %v7247_v46, %v6061_v10  ;;  %v6169_v1 = vpop.eup %3633  ;;  %3645 = vpow2.f32 %v2803_v53  ;;  %v2811_v0 = vmul.f32 1.442695, %v2738_v17  ;;  %v2777_v17 = vsub.f32 %v5912_v29, %v5993_v56 }
 0x77c   : > { %v2933_v28 = vadd.f32 %v6149_v32, %v2932_v43  ;;  %v2742_v43 = vsub.f32 %v7249_v44, %v6061_v10  ;;  %v6173_v46 = vpop.eup %3635  ;;  %3647 = vpow2.f32 %v2869_v4  ;;  %v2881_v53 = vmul.f32 1.442695, %v2773_v23 }
 0x77d   : > { %v6178_v57 = vpop.eup %3637  ;;  %3649 = vpow2.f32 %v2807_v27  ;;  %v2815_v48 = vmul.f32 1.442695, %v2740_v9  ;;  %v2885_v9 = vmul.f32 1.442695, %v2775_v61  ;;  %v7254_v61 = vsub.f32 %v7222_v11, %v6061_v10 }
 0x77e   : > { %v2934_v62 = vadd.f32 %v6159_v19, %v2933_v28  ;;  %v2744_v28 = vsub.f32 %v7250_v13, %v6061_v10  ;;  %v6182_v36 = vpop.eup %3639  ;;  %3651 = vpow2.f32 %v2873_v12  ;;  %v2889_v13 = vmul.f32 1.442695, %v2777_v17 }
 0x77f   : > { %7251 = vst [vmem:[#allocation26_spill] sm:$0xff] %v6182_v36  ;;  %v6187_v4 = vpop.eup %3641  ;;  %3653 = vpow2.f32 %v2811_v0  ;;  %v7256_v11 = vsub.f32 %v5926_v49, %v5993_v56 }
 0x780   : > { %v2935_v59 = vadd.f32 %v6169_v1, %v2934_v62  ;;  %7252 = vst [vmem:[#allocation17_spill] sm:$0xff] %v6187_v4  ;;  %v2819_v62 = vmul.f32 1.442695, %v2742_v43  ;;  %v6191_v44 = vpop.eup %3643  ;;  %3655 = vpow2.f32 %v2877_v25  ;;  %v2958_v29 = vadd.f32 %v6187_v4, %v6182_v36 }
 0x781   : > { %v6196_v12 = vpop.eup %3645  ;;  %3657 = vpow2.f32 %v2815_v48  ;;  %v2823_v23 = vmul.f32 1.442695, %v2744_v28  ;;  %v2827_v25 = vmul.f32 1.442695, %v7254_v61  ;;  %v2893_v48 = vmul.f32 1.442695, %v2779_v38 }
 0x782   : > { %v2936_v15 = vadd.f32 %v6173_v46, %v2935_v59  ;;  %7253 = vst [vmem:[#allocation23_spill] sm:$0xff] %v6196_v12  ;;  %v6198_v59 = vpop.eup %3647  ;;  %3659 = vpow2.f32 %v2881_v53  ;;  %v2959_v0 = vadd.f32 %v6196_v12, %v2958_v29  ;;  %v2897_v61 = vmul.f32 1.442695, %v7256_v11 }
 0x783   : > { %v6202_v43 = vpop.eup %3649  ;;  %3661 = vpow2.f32 %v2819_v62 }
 0x784   : > { %v2937_v27 = vadd.f32 %v6178_v57, %v2936_v15  ;;  %v6207_v15 = vpop.eup %3651  ;;  %3663 = vpow2.f32 %v2885_v9  ;;  %v2960_v53 = vadd.f32 %v6202_v43, %v2959_v0 }
 0x785   : > { %v6211_v17 = vpop.eup %3653  ;;  %3665 = vpow2.f32 %v2823_v23  ;;  %v7257_v23 = vsub.f32 %v7225_v60, %v6061_v10 }
 0x786   : > { %v2938_v21 = vadd.f32 %v6191_v44, %v2937_v27  ;;  %v7255_v27 = vsub.f32 %v7223_v2, %v6061_v10  ;;  %v6216_v62 = vpop.eup %3655  ;;  %3667 = vpow2.f32 %v2889_v13  ;;  %v2961_v9 = vadd.f32 %v6211_v17, %v2960_v53 }
 0x787   : > { %3669 = vpow2.f32 %v2827_v25  ;;  %v2835_v0 = vmul.f32 1.442695, %v7257_v23  ;;  %v7258_v13 = vsub.f32 %v5929_v30, %v5993_v56  ;;  %v7259_v25 = vsub.f32 %v7226_v34, %v6061_v10 }
 0x788   : > { %v2939_v28 = vadd.f32 %v6198_v59, %v2938_v21  ;;  %v2831_v29 = vmul.f32 1.442695, %v7255_v27  ;;  %v6223_v21 = vpop.eup %3657  ;;  %3671 = vpow2.f32 %v2893_v48  ;;  %v7260_v48 = vsub.f32 %v5942_v14, %v5993_v56 }
 0x789   : > { %v6228_v2 = vpop.eup %3659  ;;  %v2901_v27 = vmul.f32 1.442695, %v7258_v13  ;;  %v2839_v53 = vmul.f32 1.442695, %v7259_v25 }
 0x78a   : > { %v2940_v38 = vadd.f32 %v6207_v15, %v2939_v28  ;;  %v2962_v28 = vadd.f32 %v6223_v21, %v2961_v9  ;;  %v6235_v11 = vpop.eup %3661  ;;  %3673 = vpow2.f32 %v2831_v29  ;;  %v2905_v23 = vmul.f32 1.442695, %v7260_v48 }
 0x78b   : > { %v6240_v60 = vpop.eup %3663  ;;  %3675 = vpow2.f32 %v2897_v61  ;;  %v7261_v29 = vsub.f32 %v7227_v54, %v6061_v10  ;;  %v7262_v61 = vsub.f32 %v5944_v40, %v5993_v56 }
 0x78c   : > { %v2941_v49 = vadd.f32 %v6216_v62, %v2940_v38  ;;  %v2963_v38 = vadd.f32 %v6235_v11, %v2962_v28  ;;  %v6247_v13 = vpop.eup %3665  ;;  %3677 = vpow2.f32 %v2835_v0  ;;  %v7263_v0 = vsub.f32 %v7228_v6, %v6061_v10 }
 0x78d   : > { %v2843_v9 = vmul.f32 1.442695, %v7261_v29  ;;  %v6252_v34 = vpop.eup %3667  ;;  %3679 = vpow2.f32 %v2901_v27  ;;  %v2909_v25 = vmul.f32 1.442695, %v7262_v61  ;;  %v7264_v27 = vsub.f32 %v5955_v50, %v5993_v56 }
 0x78e   : > { %v2942_v30 = vadd.f32 %v6228_v2, %v2941_v49  ;;  %v2964_v49 = vadd.f32 %v6247_v13, %v2963_v38  ;;  %v6259_v48 = vpop.eup %3669  ;;  %3681 = vpow2.f32 %v2839_v53  ;;  %v2847_v28 = vmul.f32 1.442695, %v7263_v0 }
 0x78f   : > { %v6264_v54 = vpop.eup %3671  ;;  %3683 = vpow2.f32 %v2905_v23  ;;  %v2913_v29 = vmul.f32 1.442695, %v7264_v27  ;;  %v7265_v53 = vsub.f32 %v7229_v42, %v6061_v10  ;;  %v7266_v23 = vsub.f32 %v5969_v31, %v5993_v56 }
 0x790   : > { %v2943_v14 = vadd.f32 %v6240_v60, %v2942_v30  ;;  %v2965_v30 = vadd.f32 %v6259_v48, %v2964_v49  ;;  %v6271_v61 = vpop.eup %3673  ;;  %3685 = vpow2.f32 %v2843_v9  ;;  %v7267_v9 = vsub.f32 %v7231_v39, %v6061_v10 }
 0x791   : > { %v2851_v38 = vmul.f32 1.442695, %v7265_v53  ;;  %v6276_v6 = vpop.eup %3675  ;;  %3687 = vpow2.f32 %v2909_v25  ;;  %v2917_v0 = vmul.f32 1.442695, %v7266_v23  ;;  %v7268_v56 = vsub.f32 %v7232_v22, %v6061_v10 }
 0x792   : > { %v2944_v40 = vadd.f32 %v6252_v34, %v2943_v14  ;;  %v2966_v14 = vadd.f32 %v6271_v61, %v2965_v30  ;;  %v6283_v27 = vpop.eup %3677  ;;  %3689 = vpow2.f32 %v2847_v28  ;;  %v2855_v49 = vmul.f32 1.442695, %v7267_v9 }
 0x793   : > { %v6288_v42 = vpop.eup %3679  ;;  %3691 = vpow2.f32 %v2913_v29  ;;  %v7269_v29 = vsub.f32 %v7233_v33, %v6061_v10 }
 0x794   : > { %v2945_v50 = vadd.f32 %v6264_v54, %v2944_v40  ;;  %v2967_v53 = vadd.f32 %v6283_v27, %v2966_v14  ;;  %v6292_v31 = vpop.eup %3681  ;;  %3693 = vpow2.f32 %v2851_v38  ;;  %v2859_v40 = vmul.f32 1.442695, %v7268_v56 }
 0x795   : > { %v6297_v30 = vpop.eup %3683  ;;  %3695 = vpow2.f32 %v2917_v0  ;;  %v7270_v0 = vsub.f32 %v7234_v16, %v6061_v10 }
 0x796   : > { %v2946_v25 = vadd.f32 %v6276_v6, %v2945_v50  ;;  %v2968_v28 = vadd.f32 %v6292_v31, %v2967_v53  ;;  %v6301_v23 = vpop.eup %3685  ;;  %3697 = vpow2.f32 %v2855_v49  ;;  %v2863_v50 = vmul.f32 1.442695, %v7269_v29 }
 0x797   : > { %v6306_v14 = vpop.eup %3687  ;;  %3699 = vpow2.f32 %v2859_v40 }
 0x798   : > { %v2947_v39 = vadd.f32 %v6288_v42, %v2946_v25  ;;  %v2969_v22 = vadd.f32 %v6301_v23, %v2968_v28  ;;  %v6310_v9 = vpop.eup %3689  ;;  %v2867_v25 = vmul.f32 1.442695, %v7270_v0  ;;  %3701 = vpow2.f32 %v2863_v50 }
 0x799   : > { %v6315_v53 = vpop.eup %3691  ;;  %v7271_v28 = vsub.f32 %v5748_v26, %v6061_v10  ;;  %v2774_v50 = vsub.f32 %v5902_v3, %v6061_v10 }
 0x79a   : > { %v2948_v38 = vadd.f32 %v6297_v30, %v2947_v39  ;;  %v2970_v33 = vadd.f32 %v6310_v9, %v2969_v22  ;;  %v6319_v56 = vpop.eup %3693  ;;  %v2772_v39 = vsub.f32 %v5864_v47, %v6061_v10  ;;  %3703 = vpow2.f32 %v2867_v25 }
 0x79b   : > { %v2871_v40 = vmul.f32 1.442695, %v7271_v28  ;;  %v6326_v29 = vpop.eup %3695  ;;  %v2883_v3 = vmul.f32 1.442695, %v2774_v50 }
 0x79c   : > { %v2949_v49 = vadd.f32 %v6306_v14, %v2948_v38  ;;  %v2971_v0 = vadd.f32 %v6319_v56, %v2970_v33  ;;  %v6330_v36 = vpop.eup %3697  ;;  %v7272_v38 = vsub.f32 %v7235_v35, %v6061_v10  ;;  %v2776_v33 = vsub.f32 %v5921_v18, %v6061_v10 }
 0x79d   : > { %v6339_v28 = vpop.eup %3699  ;;  %3705 = vpow2.f32 %v2871_v40 }
 0x79e   : > { %v2950_v16 = vadd.f32 %v6315_v53, %v2949_v49  ;;  %v2875_v22 = vmul.f32 1.442695, %v7272_v38  ;;  %v2972_v26 = vadd.f32 %v6330_v36, %v2971_v0  ;;  %7273 = vst [vmem:[#allocation24_spill] sm:$0xff] %v6339_v28  ;;  %v2879_v49 = vmul.f32 1.442695, %v2772_v39  ;;  %v6344_v12 = vpop.eup %3701 }
 0x79f   : > { %7274 = vst [vmem:[#allocation27_spill] sm:$0xff] %v6344_v12  ;;  %v2780_v39 = vsub.f32 %v5947_v37, %v6061_v10  ;;  %v2887_v18 = vmul.f32 1.442695, %v2776_v33  ;;  %v2784_v37 = vsub.f32 %v5964_v55, %v6061_v10  ;;  %v2788_v55 = vsub.f32 %v5977_v51, %v6061_v10 }
 0x7a0   : > { %v2951_v47 = vadd.f32 %v6326_v29, %v2950_v16  ;;  %v2973_v25 = vadd.f32 %v6339_v28, %v2972_v26  ;;  %3707 = vpow2.f32 %v2875_v22  ;;  %v2778_v16 = vsub.f32 %v5934_v24, %v6061_v10  ;;  %v6349_v38 = vpop.eup %3703 }
 0x7a1   : > { %3709 = vpow2.f32 %v2879_v49  ;;  %v7275_v51 = vsub.f32 %v5983_v7, %v6061_v10 }
 0x7a2   : > { %v2952_v4 = vrot.slane %v2951_v47, 4  ;;  %v2974_v0 = vadd.f32 %v6344_v12, %v2973_v25  ;;  %3711 = vpow2.f32 %v2883_v3  ;;  %v2891_v24 = vmul.f32 1.442695, %v2778_v16 }
 0x7a3   : > { %v6354_v28 = vpop.eup %3705  ;;  %v2895_v25 = vmul.f32 1.442695, %v2780_v39  ;;  %3713 = vpow2.f32 %v2887_v18  ;;  %v2903_v39 = vmul.f32 1.442695, %v2784_v37 }
 0x7a4   : > { %v2953_v35 = vadd.f32 %v2952_v4, %v2951_v47  ;;  %v2975_v26 = vadd.f32 %v6349_v38, %v2974_v0  ;;  %v2782_v4 = vsub.f32 %v5961_v5, %v6061_v10  ;;  %v2786_v5 = vsub.f32 %v5974_v58, %v6061_v10 }
 0x7a5   : > { %3715 = vpow2.f32 %v2891_v24 }
 0x7a6   : > { %v2954_v40 = vrot.slane %v2953_v35, 2  ;;  %v2976_v47 = vadd.f32 %v6354_v28, %v2975_v26  ;;  %v6359_v50 = vpop.eup %3707  ;;  %v2899_v16 = vmul.f32 1.442695, %v2782_v4  ;;  %3717 = vpow2.f32 %v2895_v25 }
 0x7a7   : > { %v6364_v33 = vpop.eup %3709  ;;  %v2907_v26 = vmul.f32 1.442695, %v2786_v5  ;;  %v2911_v4 = vmul.f32 1.442695, %v2788_v55  ;;  %v2915_v25 = vmul.f32 1.442695, %v7275_v51 }
 0x7a8   : > { %v2955_v22 = vadd.f32 %v2954_v40, %v2953_v35  ;;  %v2977_v49 = vadd.f32 %v6359_v50, %v2976_v47  ;;  %v6369_v0 = vpop.eup %3711 }
 0x7a9   : > { %v6374_v18 = vpop.eup %3713 }
 0x7aa   : > { %v2956_v12 = vrot.slane %v2955_v22, 1  ;;  %v2978_v3 = vadd.f32 %v6364_v33, %v2977_v49 }
 0x7ac   : > { %v2957_v35 = vadd.f32 %v2956_v12, %v2955_v22  ;;  %v2979_v40 = vadd.f32 %v6369_v0, %v2978_v3  ;;  %v6377_v12 = vpop.eup %3715 }
 0x7ad   : > { %v6379_v22 = vpop.eup %3717 }
 0x7ae   : > { %3719 = vrcp.f32 %v2957_v35  ;;  %v2980_v58 = vadd.f32 %v6374_v18, %v2979_v40  ;;  %v3004_v7 = vand.u32 2147483647, %v2957_v35  ;;  %vm3000_vm5 = vweird.f32 %v2957_v35 }
 0x7af   : > { %3721 = vpow2.f32 %v2899_v16  ;;  %v7276_v16 = vsub.f32 %v5989_v20, %v6061_v10 }
 0x7b0   : > { %3723 = vpow2.f32 %v2903_v39  ;;  %v2981_v24 = vadd.f32 %v6377_v12, %v2980_v58  ;;  %vm3005_vm7 = vcmp.eq.f32.partialorder %v3004_v7, 8.507059e+37 }
 0x7b1   : > { %3725 = vpow2.f32 %v2907_v26  ;;  %v2919_v3 = vmul.f32 1.442695, %v7276_v16  ;;  %v3006_v26 = vand.u32 2147483648, %v2957_v35 }
 0x7b2   : > { %v2982_v49 = vadd.f32 %v6379_v22, %v2981_v24  ;;  %3727 = vpow2.f32 %v2911_v4 }
 0x7b3   : > { %3729 = vpow2.f32 %v2915_v25 }
 0x7b4   : > { %v3720_v47 = vpop.eup %3719  ;;  %3731 = vpow2.f32 %v2919_v3 }
 0x7b5   : > { %v2996_v37 = vmul.f32 %v3720_v47, %v2957_v35  ;;  %v6386_v5 = vpop.eup %3721  ;;  %vm3001_vm4 = vweird.f32 %v3720_v47 }
 0x7b6   : > { %v2983_v39 = vadd.f32 %v6386_v5, %v2982_v49  ;;  %v6392_v40 = vpop.eup %3723  ;;  %vm3002_vm6 = vmor %vm3000_vm5, %vm3001_vm4 }
 0x7b7   : > { %v2997_v55 = vsub.f32 1.0, %v2996_v37  ;;  %v6395_v24 = vpop.eup %3725  ;;  %v3007_v37 = vor.u32 1.1754944e-38, %v3006_v26 }
 0x7b8   : > { %v2984_v51 = vadd.f32 %v6392_v40, %v2983_v39  ;;  %v6398_v10 = vpop.eup %3727 }
 0x7b9   : > { %v2998_v58 = vmul.f32 %v3720_v47, %v2997_v55  ;;  %v6401_v16 = vpop.eup %3729 }
 0x7ba   : > { %v2985_v20 = vadd.f32 %v6395_v24, %v2984_v51  ;;  %v6408_v35 = vpop.eup %3731 }
 0x7bb   : > { %v2999_v4 = vadd.f32 %v3720_v47, %v2998_v58 }
 0x7bc   : > { %v2986_v25 = vadd.f32 %v6398_v10, %v2985_v20 }
 0x7bd   : > { %v3003_v49 = vsel %vm3002_vm6, %v3720_v47, %v2999_v4 }
 0x7be   : > { %v6403_v55 = vsel %vm3005_vm7, %v3007_v37, %v3003_v49  ;;  %v2987_v39 = vadd.f32 %v6401_v16, %v2986_v25 }
 0x7bf   : > { %v3053_v3 = vmul.f32 %v6169_v1, %v6403_v55  ;;  %v3085_v47 = vmul.f32 %v6326_v29, %v6403_v55  ;;  %v3051_v7 = vmul.f32 %v6159_v19, %v6403_v55  ;;  %v3083_v4 = vmul.f32 %v6315_v53, %v6403_v55 }
 0x7c0   : > { %v2988_v58 = vadd.f32 %v6408_v35, %v2987_v39  ;;  %v3049_v1 = vmul.f32 %v6149_v32, %v6403_v55  ;;  %v3081_v29 = vmul.f32 %v6306_v14, %v6403_v55  ;;  %v3047_v19 = vmul.f32 %v6141_v45, %v6403_v55 }
 0x7c1   : > { %3087 = vmatpush.xpose.msra.mxu0 %v3053_v3  ;;  %3127 = vmatpush.xpose.msra.mxu2 %v3085_v47  ;;  %v3079_v53 = vmul.f32 %v6297_v30, %v6403_v55  ;;  %v3045_v32 = vmul.f32 %v6133_v52, %v6403_v55  ;;  %v3077_v39 = vmul.f32 %v6288_v42, %v6403_v55 }
 0x7c2   : > { %v2989_v26 = vrot.slane %v2988_v58, 4  ;;  %v3043_v14 = vmul.f32 %v6121_v63, %v6403_v55  ;;  %v3041_v30 = vmul.f32 %v6110_v41, %v6403_v55  ;;  %v3073_v63 = vmul.f32 %v6264_v54, %v6403_v55 }
 0x7c4   : > { %v2990_v51 = vadd.f32 %v2989_v26, %v2988_v58  ;;  %v3075_v58 = vmul.f32 %v6276_v6, %v6403_v55 }
 0x7c5   : > { %3088 = vmatpush.xpose.msra.mxu0 %v3051_v7  ;;  %3128 = vmatpush.xpose.msra.mxu2 %v3083_v4  ;;  %v3039_v7 = vmul.f32 %v6102_v8, %v6403_v55  ;;  %v3071_v4 = vmul.f32 %v6252_v34, %v6403_v55  ;;  %v3069_v8 = vmul.f32 %v6240_v60, %v6403_v55 }
 0x7c6   : > { %v2991_v20 = vrot.slane %v2990_v51, 2 }
 0x7c8   : > { %v2992_v37 = vadd.f32 %v2991_v20, %v2990_v51 }
 0x7c9   : > { %3089 = vmatpush.xpose.msra.mxu0 %v3049_v1  ;;  %3129 = vmatpush.xpose.msra.mxu2 %v3081_v29  ;;  %v7277_v1 = vld [vmem:[#allocation25_spill] sm:$0xff]  ;;  %v7278_v29 = vld [vmem:[#allocation11_spill] sm:$0xff] }
 0x7ca   : > { %v2993_v49 = vrot.slane %v2992_v37, 1 }
 0x7cc   : > { %v2994_v25 = vadd.f32 %v2993_v49, %v2992_v37  ;;  %v3037_v37 = vmul.f32 %v7277_v1, %v6403_v55  ;;  %v3035_v49 = vmul.f32 %v7278_v29, %v6403_v55  ;;  %v7290_v1 = vld [vmem:[#allocation26_spill] sm:$0xff]  ;;  %v7292_v29 = vld [vmem:[#allocation24_spill] sm:$0xff] }
 0x7cd   : > { %3090 = vmatpush.xpose.msra.mxu0 %v3047_v19  ;;  %3130 = vmatpush.xpose.msra.mxu2 %v3079_v53 }
 0x7ce   : > { %3733 = vrcp.f32 %v2994_v25  ;;  %v3020_v52 = vand.u32 2147483648, %v2994_v25  ;;  %v3018_v42 = vand.u32 2147483647, %v2994_v25  ;;  %vm3014_vm9 = vweird.f32 %v2994_v25 }
 0x7d0   : > { %v3021_v6 = vor.u32 1.1754944e-38, %v3020_v52  ;;  %vm3019_vm10 = vcmp.eq.f32.partialorder %v3018_v42, 8.507059e+37  ;;  %v7285_v52 = vld [vmem:[#allocation20_spill] sm:$0xff]  ;;  %v7286_v42 = vld [vmem:[#allocation6_spill] sm:$0xff] }
 0x7d1   : > { %3091 = vmatpush.xpose.msra.mxu0 %v3045_v32  ;;  %3131 = vmatpush.xpose.msra.mxu2 %v3077_v39 }
 0x7d4   : > { %v3734_v45 = vpop.eup %3733 }
 0x7d5   : > { %3092 = vmatpush.xpose.msra.mxu0 %v3043_v14  ;;  %v3010_v3 = vmul.f32 %v3734_v45, %v2994_v25  ;;  %3132 = vmatpush.xpose.msra.mxu2 %v3075_v58  ;;  %vm3015_vm8 = vweird.f32 %v3734_v45  ;;  %v7279_v25 = vld [vmem:[#allocation14_spill] sm:$0xff] }
 0x7d6   : > { %vm3016_vm0 = vmor %vm3014_vm9, %vm3015_vm8  ;;  %v3033_v53 = vmul.f32 %v7279_v25, %v6403_v55 }
 0x7d7   : > { %v3011_v47 = vsub.f32 1.0, %v3010_v3 }
 0x7d9   : > { %3093 = vmatpush.xpose.msra.mxu0 %v3041_v30  ;;  %v3012_v26 = vmul.f32 %v3734_v45, %v3011_v47  ;;  %3133 = vmatpush.xpose.msra.mxu2 %v3073_v63  ;;  %v3023_v63 = vmul.f32 %v7286_v42, %v6403_v55 }
 0x7db   : > { %v3013_v51 = vadd.f32 %v3734_v45, %v3012_v26 }
 0x7dd   : > { %3094 = vmatpush.xpose.msra.mxu0 %v3039_v7  ;;  %v3017_v41 = vsel %vm3016_vm0, %v3734_v45, %v3013_v51  ;;  %3134 = vmatpush.xpose.msra.mxu2 %v3071_v4  ;;  %v7289_v4 = vld [vmem:[#allocation19_spill] sm:$0xff] }
 0x7de   : > { %v6441_v20 = vsel %vm3019_vm10, %v3021_v6, %v3017_v41  ;;  %v7288_v41 = vld [vmem:[#allocation17_spill] sm:$0xff] }
 0x7df   : > { %v3054_v54 = vmul.f32 %v6330_v36, %v6441_v20  ;;  %v3052_v34 = vmul.f32 %v6319_v56, %v6441_v20  ;;  %v3050_v19 = vmul.f32 %v6310_v9, %v6441_v20  ;;  %v3067_v36 = vmul.f32 %v6228_v2, %v6403_v55 }
 0x7e0   : > { %v6461_v60 = vmul.f32 %v6408_v35, %v6441_v20  ;;  %v6465_v32 = vmul.f32 %v6401_v16, %v6441_v20  ;;  %v6469_v56 = vmul.f32 %v6398_v10, %v6441_v20  ;;  %v6473_v9 = vmul.f32 %v6395_v24, %v6441_v20 }
 0x7e1   : > { %3095 = vmatpush.xpose.msra.mxu0 %v3037_v37  ;;  %3107 = vmatpush.xpose.msra.mxu3 %v3054_v54  ;;  %v6477_v2 = vmul.f32 %v6392_v40, %v6441_v20  ;;  %v6481_v35 = vmul.f32 %v6386_v5, %v6441_v20  ;;  %v6485_v16 = vmul.f32 %v6379_v22, %v6441_v20  ;;  %v7291_v54 = vld [vmem:[#allocation27_spill] sm:$0xff] }
 0x7e2   : > { %3135 = vmatpush.xpose.msra.mxu2 %v3069_v8  ;;  %v6489_v10 = vmul.f32 %v6377_v12, %v6441_v20  ;;  %v6493_v24 = vmul.f32 %v6374_v18, %v6441_v20  ;;  %v6497_v40 = vmul.f32 %v6369_v0, %v6441_v20  ;;  %v6501_v5 = vmul.f32 %v6364_v33, %v6441_v20  ;;  %v7280_v0 = vld [vmem:[#allocation10_spill] sm:$0xff] }
 0x7e3   : > { %v6505_v22 = vmul.f32 %v6359_v50, %v6441_v20  ;;  %v6509_v12 = vmul.f32 %v6354_v28, %v6441_v20  ;;  %v3065_v18 = vmul.f32 %v6216_v62, %v6403_v55  ;;  %v3031_v39 = vmul.f32 %v7280_v0, %v6403_v55  ;;  %v7281_v28 = vld [vmem:[#allocation9_spill] sm:$0xff] }
 0x7e4   : > { %v3048_v33 = vmul.f32 %v6301_v23, %v6441_v20  ;;  %v3063_v50 = vmul.f32 %v6207_v15, %v6403_v55  ;;  %v3029_v14 = vmul.f32 %v7281_v28, %v6403_v55  ;;  %v3046_v45 = vmul.f32 %v6292_v31, %v6441_v20  ;;  %v7282_v23 = vld [vmem:[#allocation7_spill] sm:$0xff]  ;;  %v7283_v31 = vld [vmem:[#allocation8_spill] sm:$0xff] }
 0x7e5   : > { %3096 = vmatpush.xpose.msra.mxu0 %v3035_v49  ;;  %3108 = vmatpush.xpose.msra.mxu3 %v3052_v34  ;;  %v3061_v62 = vmul.f32 %v6198_v59, %v6403_v55  ;;  %v3027_v3 = vmul.f32 %v7282_v23, %v6403_v55  ;;  %v3044_v58 = vmul.f32 %v6283_v27, %v6441_v20  ;;  %v7284_v59 = vld [vmem:[#allocation15_spill] sm:$0xff] }
 0x7e6   : > { %3136 = vmatpush.xpose.msra.mxu2 %v3067_v36  ;;  %v3059_v15 = vmul.f32 %v6191_v44, %v6403_v55  ;;  %v3025_v30 = vmul.f32 %v7283_v31, %v6403_v55  ;;  %v3042_v47 = vmul.f32 %v6271_v61, %v6441_v20  ;;  %v2239_v26 = vadd.f32 %v7285_v52, %v7284_v59 }
 0x7e7   : > { %v3057_v27 = vmul.f32 %v6178_v57, %v6403_v55  ;;  %v3040_v44 = vmul.f32 %v6259_v48, %v6441_v20  ;;  %v3055_v61 = vmul.f32 %v6173_v46, %v6403_v55  ;;  %v3038_v51 = vmul.f32 %v6247_v13, %v6441_v20  ;;  %v7287_v13 = vld [vmem:[#allocation23_spill] sm:$0xff] }
 0x7e8   : > { %v2261_v7 = vmax.f32 %v2239_v26, 0.0  ;;  %v3036_v57 = vmul.f32 %v6235_v11, %v6441_v20  ;;  %v3034_v48 = vmul.f32 %v6223_v21, %v6441_v20  ;;  %v3032_v6 = vmul.f32 %v6211_v17, %v6441_v20 }
 0x7e9   : > { %3097 = vmatpush.xpose.msra.mxu0 %v3033_v53  ;;  %3109 = vmatpush.xpose.msra.mxu3 %v3050_v19  ;;  %v3030_v46 = vmul.f32 %v6202_v43, %v6441_v20  ;;  %v3028_v55 = vmul.f32 %v7287_v13, %v6441_v20  ;;  %v3026_v11 = vmul.f32 %v7288_v41, %v6441_v20 }
 0x7ea   : > { %3137 = vmatpush.xpose.msra.mxu2 %v3065_v18  ;;  %v2259_v21 = vadd.f32 %v7289_v4, %v7284_v59  ;;  %v3024_v37 = vmul.f32 %v7290_v1, %v6441_v20  ;;  %v3060_v43 = vmul.f32 %v6349_v38, %v6441_v20  ;;  %v3058_v8 = vmul.f32 %v7291_v54, %v6441_v20  ;;  %v3739_v38 = vld [vmem:[%s6612_s8] sm:$0xff] }
 0x7eb   : > { %v3056_v49 = vmul.f32 %v7292_v29, %v6441_v20 }
 0x7ec   : > { %v2262_v17 = vmax.f32 %v2259_v21, 0.0 }
 0x7ed   : > { %3098 = vmatpush.xpose.msra.mxu0 %v3031_v39  ;;  %3110 = vmatpush.xpose.msra.mxu3 %v3048_v33 }
 0x7ee   : > { %3138 = vmatpush.xpose.msra.mxu2 %v3063_v50 }
 0x7f1   : > { %3099 = vmatpush.xpose.msra.mxu0 %v3029_v14  ;;  %3111 = vmatpush.xpose.msra.mxu3 %v3046_v45 }
 0x7f2   : > { %3139 = vmatpush.xpose.msra.mxu2 %v3061_v62 }
 0x7f5   : > { %3100 = vmatpush.xpose.msra.mxu0 %v3027_v3  ;;  %3112 = vmatpush.xpose.msra.mxu3 %v3044_v58 }
 0x7f6   : > { %3140 = vmatpush.xpose.msra.mxu2 %v3059_v15 }
 0x7f9   : > { %3101 = vmatpush.xpose.msra.mxu0 %v3025_v30  ;;  %3113 = vmatpush.xpose.msra.mxu3 %v3042_v47 }
 0x7fa   : > { %3141 = vmatpush.xpose.msra.mxu2 %v3057_v27 }
 0x7fd   : > { %3102 = vmatpush.xpose.msra.mxu0 %v3023_v63  ;;  %3114 = vmatpush.xpose.msra.mxu3 %v3040_v44 }
 0x7fe   : > { %3142 = vmatpush.xpose.msra.mxu2 %v3055_v61 }
 0x800   : > { %3103 = vmatmul.f32.vlgmr.msra.gmra.mxu0 %v2261_v7 }
 0x801   : > { %3115 = vmatpush.xpose.msra.mxu3 %v3038_v51  ;;  %3143 = vmatmul.f32.vlgmr.msra.gmra.mxu2 %v2261_v7 }
 0x805   : > { %3116 = vmatpush.xpose.msra.mxu3 %v3036_v57 }
 0x809   : > { %3117 = vmatpush.xpose.msra.mxu3 %v3034_v48 }
 0x80d   : > { %3118 = vmatpush.xpose.msra.mxu3 %v3032_v6 }
 0x811   : > { %3119 = vmatpush.xpose.msra.mxu3 %v3030_v46 }
 0x815   : > { %3120 = vmatpush.xpose.msra.mxu3 %v3028_v55 }
 0x819   : > { %3121 = vmatpush.xpose.msra.mxu3 %v3026_v11 }
 0x81d   : > { %3122 = vmatpush.xpose.msra.mxu3 %v3024_v37 }
 0x820   : > { %3123 = vmatmul.f32.vlgmr.msra.gmra.mxu3 %v2262_v17 }
 0x821   : > { %3147 = vmatpush.xpose.msrb.mxu3 %v6461_v60 }
 0x825   : > { %3148 = vmatpush.xpose.msrb.mxu3 %v6465_v32  ;;  %v7293_v32 = vld [vmem:[#allocation13_spill] sm:$0xff] }
 0x829   : > { %3149 = vmatpush.xpose.msrb.mxu3 %v6469_v56 }
 0x82d   : > { %3150 = vmatpush.xpose.msrb.mxu3 %v6473_v9 }
 0x831   : > { %3151 = vmatpush.xpose.msrb.mxu3 %v6477_v2  ;;  %v3217_v2 = vld [vmem:[%s374_s25] sm:$0xff] }
 0x835   : > { %3152 = vmatpush.xpose.msrb.mxu3 %v6481_v35  ;;  %v7294_v35 = vld [vmem:[#allocation18_spill] sm:$0xff] }
 0x839   : > { %3153 = vmatpush.xpose.msrb.mxu3 %v6485_v16 }
 0x83d   : > { %3154 = vmatpush.xpose.msrb.mxu3 %v6489_v10 }
 0x841   : > { %3155 = vmatpush.xpose.msrb.mxu3 %v6493_v24 }
 0x845   : > { %3156 = vmatpush.xpose.msrb.mxu3 %v6497_v40 }
 0x849   : > { %3157 = vmatpush.xpose.msrb.mxu3 %v6501_v5 }
 0x84d   : > { %3158 = vmatpush.xpose.msrb.mxu3 %v6505_v22  ;;  %v3218_v22 = vld [vmem:[%s374_s25 + $0x8] sm:$0xff] }
 0x851   : > { %3159 = vmatpush.xpose.msrb.mxu3 %v6509_v12  ;;  %v7295_v12 = vld [vmem:[#allocation16_spill] sm:$0xff] }
 0x855   : > { %3160 = vmatpush.xpose.msrb.mxu3 %v3060_v43 }
 0x859   : > { %3161 = vmatpush.xpose.msrb.mxu3 %v3058_v8 }
 0x85d   : > { %3162 = vmatpush.xpose.msrb.mxu3 %v3056_v49 }
 0x860   : > { %3163 = vmatmul.f32.vlgmr.msrb.gmra.mxu3 %v2262_v17 }
 0x87d   : > { %v3104_v34 = vpop.f32.mrf.mxu0 }
 0x884   : > { %v3144_v25 = vpop.f32.mrf.mxu2 }
 0x8a3   : > { %v3124_v19 = vpop.f32.mrf.mxu3 }
 0x8a4   : > { %v3125_v36 = vadd.f32 %v3124_v19, %v3104_v34 }
 0x8a6   : > { %3449 = vmatpush.msk.msrb.mxu2 %vm1334_vm1, %v3125_v36 }
 0x8a7   : > { %3450 = vmatmul.msk.f32.vlgmr.msrb.gmra.mxu2 %vm1237_vm2, %v3739_v38 }
 0x8e3   : > { %v3164_v53 = vpop.f32.mrf.mxu3 }
 0x8e4   : > { %v3165_v60 = vadd.f32 %v3164_v53, %v3144_v25 }
 0x8e6   : > { %3451 = vmatpush.msk.msra.mxu2 %vm1334_vm1, %v3165_v60 }
 0x8e7   : > { %3452 = vmatmul.msk.f32.vlgmr.msra.gmra.mxu2 %vm1237_vm2, %v3739_v38 }
 0x92a   : > { %v3190_v20 = vpop.f32.mrf.mxu2 }
 0x92b   : > { %v3191_v56 = vadd.f32 %v3190_v20, %v7293_v32 }
 0x92d   : > { %v3213_v9 = vmax.f32 %v3191_v56, 0.0 }
 0x92f   : > { %v3215_v16 = vadd.f32 %v3213_v9, %v7294_v35 }
 0x931   : > { %v3219_v10 = vadd.f32 %v3217_v2, %v3215_v16 }
 0x933   : > { %3221 = vst [vmem:[%s379_s28] sm:$0xff] %v3219_v10 }
 0x96a   : > { %v3210_v24 = vpop.f32.mrf.mxu2 }
 0x96b   : > { %v3211_v40 = vadd.f32 %v3210_v24, %v7293_v32 }
 0x96d   : > { %v3214_v5 = vmax.f32 %v3211_v40, 0.0 }
 0x96f   : > { %v3216_v18 = vadd.f32 %v3214_v5, %v7295_v12 }
 0x971   : > { %v3220_v0 = vadd.f32 %v3218_v22, %v3216_v18 }
 0x973   : > { %3222 = vst [vmem:[%s379_s28 + $0x8] sm:$0xff] %v3220_v0 }
 0x974 PF: > { %s20_s13 = sadd.s32 1, %s3746_s13  }
 0x975   : > { %p17_p4 = scmp.ge.s32.totalorder %s20_s13, 4  }
 0x977   :  { %19 = sbr.rel (!%p17_p4) target bundleno = 1 (0x1), region = 93 }

</bundles_post_ra>
